<compile_context>
chip_gen: v5e
topology: v5e:2x2
jax: 0.10.0
libtpu: 0.0.40
codegen_flags: <defaults>
</compile_context>

<pallas_src>
import numpy as np
import jax
import jax.numpy as jnp
from jax.experimental import pallas as pl
from jax.experimental.pallas import tpu as pltpu


def _round_up(x, m):
    return ((x + m - 1) // m) * m


# ----------------------------------------------------------------------------
# Pallas kernel: one grid step == one GRU direction (0 = forward, 1 = backward)
# ----------------------------------------------------------------------------
def bigru_kernel(len_ref, x_ref, wi_ref, wh_ref, bi_ref, bhn_ref, wfc_ref,
                 out_ref, fc_ref, gx_ref):
    """
    len_ref : [Bp, 1]  int32     sequence lengths (0 for padded batch rows)
    x_ref   : [T*Bp, E]          time-major embedded inputs (shared by both dirs)
    wi_ref  : [E,  3*Hp]         input->gates weights for this direction (r|z|n slabs)
    wh_ref  : [Hp, 3*Hp]         hidden->gates weights (fused 3-gate dot)
    bi_ref  : [1,  3*Hp]         folded bias: (b_ir+b_hr | b_iz+b_hz | b_in)
    bhn_ref : [1,  Hp]           n-gate hidden bias b_hn (must stay under r*)
    wfc_ref : [Hp, Dp]           this direction's half of the encoder fc weight
    out_ref : [T, Bp, Hp]        per-timestep outputs (zero past each length)
    fc_ref  : [Bp, Dp]           h_final @ wfc  (partial fc product, summed outside)
    gx_ref  : VMEM [T*Bp, 3*Hp]  scratch for the hoisted input-side gates
    """
    d = pl.program_id(0)                       # 0 = forward, 1 = backward
    T, Bp, Hp = out_ref.shape

    # ---- hoisted input-side gates: ONE big MXU matmul covering all timesteps ----
    gx_ref[...] = (
        jnp.dot(x_ref[...], wi_ref[...], preferred_element_type=jnp.float32)
        + bi_ref[...])

    wh = wh_ref[...]                           # [Hp, 3Hp]
    bhn = bhn_ref[...]                         # [1, Hp]
    lengths = len_ref[...]                     # [Bp, 1] int32

    def step(s, h):
        # walk time forward for dir 0, backward for dir 1 (packed-sequence order)
        ta = s * (1 - d) + (T - 1 - s) * d
        start = pl.multiple_of(ta * Bp, Bp)
        gx = gx_ref[pl.ds(start, Bp), :]                            # [Bp, 3Hp]
        # fused hidden-side gates: one [Bp,Hp] x [Hp,3Hp] dot per step (no bias add;
        # r/z hidden biases already folded into gx)
        gh = jnp.dot(h, wh, preferred_element_type=jnp.float32)
        r = jax.nn.sigmoid(gx[:, 0:Hp] + gh[:, 0:Hp])
        z = jax.nn.sigmoid(gx[:, Hp:2 * Hp] + gh[:, Hp:2 * Hp])
        n = jnp.tanh(gx[:, 2 * Hp:3 * Hp] + r * (gh[:, 2 * Hp:3 * Hp] + bhn))
        h_new = (1.0 - z) * n + z * h
        valid = ta < lengths                                        # [Bp, 1] bool
        out_ref[ta] = jnp.where(valid, h_new, 0.0)                  # pad_packed zero-fill
        return jnp.where(valid, h_new, h)                           # freeze state on padding

    h0 = jnp.zeros((Bp, Hp), jnp.float32)
    h_fin = jax.lax.fori_loop(0, T, step, h0, unroll=True)

    # folded encoder fc: per-direction partial product (fwd+bwd summed + tanh'd outside)
    fc_ref[...] = jnp.dot(h_fin, wfc_ref[...], preferred_element_type=jnp.float32)


# ----------------------------------------------------------------------------
# Parameter packing (lane-aligned, per-direction slabs) and wrapper
# ----------------------------------------------------------------------------
def _pack_dir_params(p, Hp, Dp):
    E = p["wi_f"].shape[1]
    H = p["wi_f"].shape[2]

    def gates(w, rows, rows_pad):               # w: [3, rows, H] -> [rows_pad, 3*Hp]
        out = jnp.zeros((rows_pad, 3 * Hp), jnp.float32)
        for k in range(3):
            out = out.at[:rows, k * Hp:k * Hp + H].set(w[k])
        return out

    def bias_fold(bi, bh):                      # fold r/z hidden biases into input bias
        out = jnp.zeros((1, 3 * Hp), jnp.float32)
        out = out.at[:, 0 * Hp:0 * Hp + H].set(bi[0] + bh[0])   # r: b_ir + b_hr
        out = out.at[:, 1 * Hp:1 * Hp + H].set(bi[1] + bh[1])   # z: b_iz + b_hz
        out = out.at[:, 2 * Hp:2 * Hp + H].set(bi[2])           # n: b_in only
        return out

    def bias_n(bh):                             # b_hn: [1, H] -> [1, Hp]
        return jnp.zeros((1, Hp), jnp.float32).at[:, :H].set(bh[2])

    def fc_half(w_half):                        # [H, D] -> [Hp, Dp]
        return jnp.zeros((Hp, Dp), jnp.float32).at[:H, :w_half.shape[1]].set(w_half)

    wi = jnp.stack([gates(p["wi_f"], E, E), gates(p["wi_b"], E, E)])
    wh = jnp.stack([gates(p["wh_f"], H, Hp), gates(p["wh_b"], H, Hp)])
    bi = jnp.stack([bias_fold(p["bi_f"], p["bh_f"]), bias_fold(p["bi_b"], p["bh_b"])])
    bhn = jnp.stack([bias_n(p["bh_f"]), bias_n(p["bh_b"])])
    wfc = jnp.stack([fc_half(p["w_fc"][:H]), fc_half(p["w_fc"][H:])])
    return wi, wh, bi, bhn, wfc


def encoder_forward(x_ids, lengths, p):
    """x_ids: [B, T] int32 token ids; lengths: [B] int32 (max(lengths) == T)."""
    B, T = x_ids.shape
    E = p["embed"].shape[1]
    H = p["wi_f"].shape[-1]
    D = p["w_fc"].shape[-1]
    Hp = _round_up(H, 128)        # lane-dense hidden width
    Dp = _round_up(D, 128)        # lane-dense fc width
    Bp = _round_up(B, 8)          # sublane-dense batch

    # pad batch to a sublane multiple; padded rows get length 0 (fully masked)
    x_ids_p = jnp.pad(x_ids, ((0, Bp - B), (0, 0)))
    lengths_p = jnp.pad(lengths.astype(jnp.int32), (0, Bp - B)).reshape(Bp, 1)

    # embedding lookup emitted directly in time-major order (no activation transpose)
    # TODO(synk): nn.Dropout(0.2) is inference-mode identity here.
    x2d = jnp.take(p["embed"], jnp.transpose(x_ids_p).reshape(T * Bp), axis=0)
    x2d = x2d.astype(jnp.float32)

    wi, wh, bi, bhn, wfc = _pack_dir_params(p, Hp, Dp)

    out_pad, fc_part = pl.pallas_call(
        bigru_kernel,
        out_shape=(jax.ShapeDtypeStruct((2, T, Bp, Hp), jnp.float32),
                   jax.ShapeDtypeStruct((2, Bp, Dp), jnp.float32)),
        grid_spec=pltpu.PrefetchScalarGridSpec(
            num_scalar_prefetch=0,
            grid=(2,),                                            # direction axis
            in_specs=[
                pl.BlockSpec((Bp, 1), lambda d: (0, 0)),          # lengths
                pl.BlockSpec((T * Bp, E), lambda d: (0, 0)),      # x (shared by dirs)
                pl.BlockSpec((None, E, 3 * Hp), lambda d: (d, 0, 0)),   # W_ih
                pl.BlockSpec((None, Hp, 3 * Hp), lambda d: (d, 0, 0)),  # W_hh
                pl.BlockSpec((None, 1, 3 * Hp), lambda d: (d, 0, 0)),   # folded bias
                pl.BlockSpec((None, 1, Hp), lambda d: (d, 0, 0)),       # b_hn
                pl.BlockSpec((None, Hp, Dp), lambda d: (d, 0, 0)),      # W_fc half
            ],
            out_specs=[
                pl.BlockSpec((None, T, Bp, Hp), lambda d: (d, 0, 0, 0)),
                pl.BlockSpec((None, Bp, Dp), lambda d: (d, 0, 0)),
            ],
            scratch_shapes=[pltpu.VMEM((T * Bp, 3 * Hp), jnp.float32)],
        ),
        compiler_params=pltpu.CompilerParams(
            dimension_semantics=("parallel",)),   # fwd/bwd on separate TCs on v7x
    )(lengths_p, x2d, wi, wh, bi, bhn, wfc)

    # assemble [B, T, 2H] (single fused slice+concat+transpose pass on a small tensor)
    out = jnp.concatenate(
        [out_pad[0, :, :B, :H], out_pad[1, :, :B, :H]], axis=-1)     # [T, B, 2H]
    out = jnp.transpose(out, (1, 0, 2))                              # [B, T, 2H]

    # finish the folded fc: sum of per-direction partial products + bias, tanh
    hid = jnp.tanh(fc_part[0, :B, :D] + fc_part[1, :B, :D] + p["b_fc"])
    return out, hid[None]                                            # [1, B, D]


# ----------------------------------------------------------------------------
# Pure numpy/JAX reference (independent of the Pallas path)
# ----------------------------------------------------------------------------
def _gru_cell_ref(x_t, h, wi, wh, bi, bh):
    gx = [x_t @ wi[k] + bi[k] for k in range(3)]
    gh = [h @ wh[k] + bh[k] for k in range(3)]
    r = jax.nn.sigmoid(gx[0] + gh[0])
    z = jax.nn.sigmoid(gx[1] + gh[1])
    n = jnp.tanh(gx[2] + r * gh[2])
    return (1.0 - z) * n + z * h


def encoder_reference(x_ids, lengths, p):
    emb = np.asarray(jnp.take(p["embed"], x_ids, axis=0))
    B, T, E = emb.shape
    H = p["wi_f"].shape[-1]
    out_f = np.zeros((B, T, H), np.float32)
    out_b = np.zeros((B, T, H), np.float32)
    h_f_fin = np.zeros((B, H), np.float32)
    h_b_fin = np.zeros((B, H), np.float32)
    for b in range(B):
        Lb = int(lengths[b])
        h = jnp.zeros((1, H), jnp.float32)
        for t in range(Lb):
            h = _gru_cell_ref(jnp.asarray(emb[b:b + 1, t]), h,
                              p["wi_f"], p["wh_f"], p["bi_f"], p["bh_f"])
            out_f[b, t] = np.asarray(h[0])
        h_f_fin[b] = np.asarray(h[0])
        h = jnp.zeros((1, H), jnp.float32)
        for t in range(Lb - 1, -1, -1):
            h = _gru_cell_ref(jnp.asarray(emb[b:b + 1, t]), h,
                              p["wi_b"], p["wh_b"], p["bi_b"], p["bh_b"])
            out_b[b, t] = np.asarray(h[0])
        h_b_fin[b] = np.asarray(h[0])
    out = np.concatenate([out_f, out_b], axis=-1)
    h_cat = np.concatenate([h_f_fin, h_b_fin], axis=1)
    hid = np.tanh(h_cat @ np.asarray(p["w_fc"]) + np.asarray(p["b_fc"]))[None]
    return out, hid


# ----------------------------------------------------------------------------
if __name__ == "__main__":
    VOCAB, E, H_ENC, H_DEC = 50, 32, 32, 32
    B, T = 4, 8

    key = jax.random.PRNGKey(0)
    keys = jax.random.split(key, 12)
    s = 1.0 / np.sqrt(H_ENC)

    def u(k, shape):
        return jax.random.uniform(k, shape, jnp.float32, -s, s)

    params = {
        "embed": jax.random.normal(keys[0], (VOCAB, E), jnp.float32) * 0.1,
        "wi_f": u(keys[1], (3, E, H_ENC)),
        "wh_f": u(keys[2], (3, H_ENC, H_ENC)),
        "bi_f": u(keys[3], (3, 1, H_ENC)),
        "bh_f": u(keys[4], (3, 1, H_ENC)),
        "wi_b": u(keys[5], (3, E, H_ENC)),
        "wh_b": u(keys[6], (3, H_ENC, H_ENC)),
        "bi_b": u(keys[7], (3, 1, H_ENC)),
        "bh_b": u(keys[8], (3, 1, H_ENC)),
        "w_fc": u(keys[9], (2 * H_ENC, H_DEC)),
        "b_fc": u(keys[10], (1, H_DEC)),
    }

    x_ids = jax.random.randint(keys[11], (B, T), 0, VOCAB, dtype=jnp.int32)
    lengths = jnp.array([8, 5, 7, 3], dtype=jnp.int32)  # max == T (pad_packed width)

    out, hid = encoder_forward(x_ids, lengths, params)
    out, hid = jax.block_until_ready((out, hid))

    out_ref, hid_ref = encoder_reference(x_ids, lengths, params)
    np.testing.assert_allclose(np.asarray(out), out_ref, atol=1e-4, rtol=1e-4)
    np.testing.assert_allclose(np.asarray(hid), hid_ref, atol=1e-4, rtol=1e-4)

    assert out.shape == (B, T, 2 * H_ENC) and hid.shape == (1, B, H_DEC)
    print("KERNEL_OK")
</pallas_src>

<mosaic_0001>
module attributes {stable_mosaic.version = 11 : i64} {
  func.func @bigru_kernel(%arg0: i32, %arg1: memref<8x1xi32, #tpu.memory_space<vmem>>, %arg2: memref<64x32xf32, #tpu.memory_space<vmem>>, %arg3: memref<1x32x384xf32, #tpu.memory_space<vmem>>, %arg4: memref<1x128x384xf32, #tpu.memory_space<vmem>>, %arg5: memref<1x1x384xf32, #tpu.memory_space<vmem>>, %arg6: memref<1x1x128xf32, #tpu.memory_space<vmem>>, %arg7: memref<1x128x128xf32, #tpu.memory_space<vmem>>, %arg8: memref<1x8x8x128xf32, #tpu.memory_space<vmem>>, %arg9: memref<1x8x128xf32, #tpu.memory_space<vmem>>, %arg10: memref<64x384xf32, #tpu.memory_space<vmem>>) attributes {dimension_semantics = [#tpu.dimension_semantics<parallel>], iteration_bounds = array<i64: 2>, scalar_prefetch = 0 : i64, scratch_operands = 1 : i64, tpu.core_type = #tpu.core_type<tc>, window_params = [{pipeline_mode = #tpu.pipeline_mode<synchronous>, transform_indices = @transform_0, window_bounds = array<i64: 8, 1>}, {pipeline_mode = #tpu.pipeline_mode<synchronous>, transform_indices = @transform_1, window_bounds = array<i64: 64, 32>}, {transform_indices = @transform_2, window_bounds = array<i64: 1, 32, 384>}, {transform_indices = @transform_3, window_bounds = array<i64: 1, 128, 384>}, {transform_indices = @transform_4, window_bounds = array<i64: 1, 1, 384>}, {transform_indices = @transform_5, window_bounds = array<i64: 1, 1, 128>}, {transform_indices = @transform_6, window_bounds = array<i64: 1, 128, 128>}, {transform_indices = @transform_7, window_bounds = array<i64: 1, 8, 8, 128>}, {transform_indices = @transform_8, window_bounds = array<i64: 1, 8, 128>}]} {
    %c0 = arith.constant 0 : index
    %c0_0 = arith.constant 0 : index
    %0 = vector.load %arg2[%c0, %c0_0] : memref<64x32xf32, #tpu.memory_space<vmem>>, vector<64x32xf32>
    %c0_1 = arith.constant 0 : index
    %c0_2 = arith.constant 0 : index
    %c0_3 = arith.constant 0 : index
    %1 = vector.load %arg3[%c0_1, %c0_2, %c0_3] : memref<1x32x384xf32, #tpu.memory_space<vmem>>, vector<1x32x384xf32>
    %2 = vector.shape_cast %1 : vector<1x32x384xf32> to vector<32x384xf32>
    %cst = arith.constant dense<0.000000e+00> : vector<64x384xf32>
    %3 = tpu.matmul %0, %2, %cst {dimension_numbers = #tpu.dot_dimension_numbers<[1], [0], [0], [1], [0, 0, 1, 1], [], []>} : vector<64x32xf32>, vector<32x384xf32>, vector<64x384xf32> -> vector<64x384xf32>
    %c0_4 = arith.constant 0 : index
    %c0_5 = arith.constant 0 : index
    %c0_6 = arith.constant 0 : index
    %4 = vector.load %arg5[%c0_4, %c0_5, %c0_6] : memref<1x1x384xf32, #tpu.memory_space<vmem>>, vector<1x1x384xf32>
    %5 = vector.shape_cast %4 : vector<1x1x384xf32> to vector<1x384xf32>
    %6 = vector.broadcast %5 : vector<1x384xf32> to vector<64x384xf32>
    %7 = arith.addf %3, %6 : vector<64x384xf32>
    %c0_7 = arith.constant 0 : index
    %c0_8 = arith.constant 0 : index
    %8 = vector.load %arg10[%c0_7, %c0_8] : memref<64x384xf32, #tpu.memory_space<vmem>>, vector<64x384xf32>
    tpu.vector_store %arg10[%c0_7, %c0_8], %7 {strides = array<i32>} : memref<64x384xf32, #tpu.memory_space<vmem>>, vector<64x384xf32>,
    %c0_9 = arith.constant 0 : index
    %c0_10 = arith.constant 0 : index
    %c0_11 = arith.constant 0 : index
    %9 = vector.load %arg4[%c0_9, %c0_10, %c0_11] : memref<1x128x384xf32, #tpu.memory_space<vmem>>, vector<1x128x384xf32>
    %10 = vector.shape_cast %9 : vector<1x128x384xf32> to vector<128x384xf32>
    %c0_12 = arith.constant 0 : index
    %c0_13 = arith.constant 0 : index
    %c0_14 = arith.constant 0 : index
    %11 = vector.load %arg6[%c0_12, %c0_13, %c0_14] : memref<1x1x128xf32, #tpu.memory_space<vmem>>, vector<1x1x128xf32>
    %12 = vector.shape_cast %11 : vector<1x1x128xf32> to vector<1x128xf32>
    %c0_15 = arith.constant 0 : index
    %c0_16 = arith.constant 0 : index
    %13 = vector.load %arg1[%c0_15, %c0_16] : memref<8x1xi32, #tpu.memory_space<vmem>>, vector<8x1xi32>
    %cst_17 = arith.constant 0.000000e+00 : f32
    %14 = vector.broadcast %cst_17 : f32 to vector<8x128xf32>
    %c0_i32 = arith.constant 0 : i32
    %c1_i32 = arith.constant 1 : i32
    %15 = arith.subi %c1_i32, %arg0 : i32
    %16 = arith.muli %c0_i32, %15 : i32
    %c7_i32 = arith.constant 7 : i32
    %17 = arith.subi %c7_i32, %c0_i32 : i32
    %18 = arith.muli %17, %arg0 : i32
    %19 = arith.addi %16, %18 : i32
    %c8_i32 = arith.constant 8 : i32
    %20 = arith.muli %19, %c8_i32 : i32
    %21 = tpu.assume_multiple %20, 8 : i32
    %22 = arith.index_cast %21 : i32 to index
    %c0_18 = arith.constant 0 : index
    %23 = vector.load %arg10[%22, %c0_18] : memref<64x384xf32, #tpu.memory_space<vmem>>, vector<8x384xf32>
    %cst_19 = arith.constant dense<0.000000e+00> : vector<8x384xf32>
    %24 = tpu.matmul %14, %10, %cst_19 {dimension_numbers = #tpu.dot_dimension_numbers<[1], [0], [0], [1], [0, 0, 1, 1], [], []>} : vector<8x128xf32>, vector<128x384xf32>, vector<8x384xf32> -> vector<8x384xf32>
    %25 = vector.extract_strided_slice %23 {offsets = [0, 0], sizes = [8, 128], strides = [1, 1]} : vector<8x384xf32> to vector<8x128xf32>
    %26 = vector.extract_strided_slice %24 {offsets = [0, 0], sizes = [8, 128], strides = [1, 1]} : vector<8x384xf32> to vector<8x128xf32>
    %27 = arith.addf %25, %26 : vector<8x128xf32>
    %28 = arith.negf %27 : vector<8x128xf32>
    %29 = math.exp %28 : vector<8x128xf32>
    %cst_20 = arith.constant 1.000000e+00 : f32
    %30 = vector.broadcast %cst_20 : f32 to vector<8x128xf32>
    %31 = arith.addf %30, %29 : vector<8x128xf32>
    %32 = arith.divf %30, %31 : vector<8x128xf32>
    %33 = vector.extract_strided_slice %23 {offsets = [0, 128], sizes = [8, 128], strides = [1, 1]} : vector<8x384xf32> to vector<8x128xf32>
    %34 = vector.extract_strided_slice %24 {offsets = [0, 128], sizes = [8, 128], strides = [1, 1]} : vector<8x384xf32> to vector<8x128xf32>
    %35 = arith.addf %33, %34 : vector<8x128xf32>
    %36 = arith.negf %35 : vector<8x128xf32>
    %37 = math.exp %36 : vector<8x128xf32>
    %cst_21 = arith.constant 1.000000e+00 : f32
    %38 = vector.broadcast %cst_21 : f32 to vector<8x128xf32>
    %39 = arith.addf %38, %37 : vector<8x128xf32>
    %40 = arith.divf %38, %39 : vector<8x128xf32>
    %41 = vector.extract_strided_slice %23 {offsets = [0, 256], sizes = [8, 128], strides = [1, 1]} : vector<8x384xf32> to vector<8x128xf32>
    %42 = vector.extract_strided_slice %24 {offsets = [0, 256], sizes = [8, 128], strides = [1, 1]} : vector<8x384xf32> to vector<8x128xf32>
    %43 = vector.broadcast %12 : vector<1x128xf32> to vector<8x128xf32>
    %44 = arith.addf %42, %43 : vector<8x128xf32>
    %45 = arith.mulf %32, %44 : vector<8x128xf32>
    %46 = arith.addf %41, %45 : vector<8x128xf32>
    %47 = math.tanh %46 : vector<8x128xf32>
    %cst_22 = arith.constant 1.000000e+00 : f32
    %48 = vector.broadcast %cst_22 : f32 to vector<8x128xf32>
    %49 = arith.subf %48, %40 : vector<8x128xf32>
    %50 = arith.mulf %49, %47 : vector<8x128xf32>
    %51 = arith.mulf %40, %14 : vector<8x128xf32>
    %52 = arith.addf %50, %51 : vector<8x128xf32>
    %53 = vector.broadcast %19 : i32 to vector<8x1xi32>
    %54 = arith.cmpi slt, %53, %13 : vector<8x1xi32>
    %cst_23 = arith.constant 0.000000e+00 : f32
    %55 = vector.shape_cast %54 : vector<8x1xi1> to vector<8x1xi1>
    %56 = vector.broadcast %55 : vector<8x1xi1> to vector<8x128xi1>
    %57 = vector.broadcast %cst_23 : f32 to vector<8x128xf32>
    %58 = arith.select %56, %52, %57 : vector<8x128xi1>, vector<8x128xf32>
    %c0_24 = arith.constant 0 : index
    %59 = arith.index_cast %19 : i32 to index
    %c0_25 = arith.constant 0 : index
    %c0_26 = arith.constant 0 : index
    %60 = vector.load %arg8[%c0_24, %59, %c0_25, %c0_26] : memref<1x8x8x128xf32, #tpu.memory_space<vmem>>, vector<1x1x8x128xf32>
    %61 = vector.shape_cast %60 : vector<1x1x8x128xf32> to vector<8x128xf32>
    %62 = vector.shape_cast %58 : vector<8x128xf32> to vector<1x1x8x128xf32>
    tpu.vector_store %arg8[%c0_24, %59, %c0_25, %c0_26], %62 {strides = array<i32>} : memref<1x8x8x128xf32, #tpu.memory_space<vmem>>, vector<1x1x8x128xf32>,
    %63 = vector.shape_cast %54 : vector<8x1xi1> to vector<8x1xi1>
    %64 = vector.broadcast %63 : vector<8x1xi1> to vector<8x128xi1>
    %65 = arith.select %64, %52, %14 : vector<8x128xi1>, vector<8x128xf32>
    %c1_i32_27 = arith.constant 1 : i32
    %c1_i32_28 = arith.constant 1 : i32
    %66 = arith.subi %c1_i32_28, %arg0 : i32
    %67 = arith.muli %c1_i32_27, %66 : i32
    %c7_i32_29 = arith.constant 7 : i32
    %68 = arith.subi %c7_i32_29, %c1_i32_27 : i32
    %69 = arith.muli %68, %arg0 : i32
    %70 = arith.addi %67, %69 : i32
    %c8_i32_30 = arith.constant 8 : i32
    %71 = arith.muli %70, %c8_i32_30 : i32
    %72 = tpu.assume_multiple %71, 8 : i32
    %73 = arith.index_cast %72 : i32 to index
    %c0_31 = arith.constant 0 : index
    %74 = vector.load %arg10[%73, %c0_31] : memref<64x384xf32, #tpu.memory_space<vmem>>, vector<8x384xf32>
    %cst_32 = arith.constant dense<0.000000e+00> : vector<8x384xf32>
    %75 = tpu.matmul %65, %10, %cst_32 {dimension_numbers = #tpu.dot_dimension_numbers<[1], [0], [0], [1], [0, 0, 1, 1], [], []>} : vector<8x128xf32>, vector<128x384xf32>, vector<8x384xf32> -> vector<8x384xf32>
    %76 = vector.extract_strided_slice %74 {offsets = [0, 0], sizes = [8, 128], strides = [1, 1]} : vector<8x384xf32> to vector<8x128xf32>
    %77 = vector.extract_strided_slice %75 {offsets = [0, 0], sizes = [8, 128], strides = [1, 1]} : vector<8x384xf32> to vector<8x128xf32>
    %78 = arith.addf %76, %77 : vector<8x128xf32>
    %79 = arith.negf %78 : vector<8x128xf32>
    %80 = math.exp %79 : vector<8x128xf32>
    %cst_33 = arith.constant 1.000000e+00 : f32
    %81 = vector.broadcast %cst_33 : f32 to vector<8x128xf32>
    %82 = arith.addf %81, %80 : vector<8x128xf32>
    %83 = arith.divf %81, %82 : vector<8x128xf32>
    %84 = vector.extract_strided_slice %74 {offsets = [0, 128], sizes = [8, 128], strides = [1, 1]} : vector<8x384xf32> to vector<8x128xf32>
    %85 = vector.extract_strided_slice %75 {offsets = [0, 128], sizes = [8, 128], strides = [1, 1]} : vector<8x384xf32> to vector<8x128xf32>
    %86 = arith.addf %84, %85 : vector<8x128xf32>
    %87 = arith.negf %86 : vector<8x128xf32>
    %88 = math.exp %87 : vector<8x128xf32>
    %cst_34 = arith.constant 1.000000e+00 : f32
    %89 = vector.broadcast %cst_34 : f32 to vector<8x128xf32>
    %90 = arith.addf %89, %88 : vector<8x128xf32>
    %91 = arith.divf %89, %90 : vector<8x128xf32>
    %92 = vector.extract_strided_slice %74 {offsets = [0, 256], sizes = [8, 128], strides = [1, 1]} : vector<8x384xf32> to vector<8x128xf32>
    %93 = vector.extract_strided_slice %75 {offsets = [0, 256], sizes = [8, 128], strides = [1, 1]} : vector<8x384xf32> to vector<8x128xf32>
    %94 = vector.broadcast %12 : vector<1x128xf32> to vector<8x128xf32>
    %95 = arith.addf %93, %94 : vector<8x128xf32>
    %96 = arith.mulf %83, %95 : vector<8x128xf32>
    %97 = arith.addf %92, %96 : vector<8x128xf32>
    %98 = math.tanh %97 : vector<8x128xf32>
    %cst_35 = arith.constant 1.000000e+00 : f32
    %99 = vector.broadcast %cst_35 : f32 to vector<8x128xf32>
    %100 = arith.subf %99, %91 : vector<8x128xf32>
    %101 = arith.mulf %100, %98 : vector<8x128xf32>
    %102 = arith.mulf %91, %65 : vector<8x128xf32>
    %103 = arith.addf %101, %102 : vector<8x128xf32>
    %104 = vector.broadcast %70 : i32 to vector<8x1xi32>
    %105 = arith.cmpi slt, %104, %13 : vector<8x1xi32>
    %cst_36 = arith.constant 0.000000e+00 : f32
    %106 = vector.shape_cast %105 : vector<8x1xi1> to vector<8x1xi1>
    %107 = vector.broadcast %106 : vector<8x1xi1> to vector<8x128xi1>
    %108 = vector.broadcast %cst_36 : f32 to vector<8x128xf32>
    %109 = arith.select %107, %103, %108 : vector<8x128xi1>, vector<8x128xf32>
    %c0_37 = arith.constant 0 : index
    %110 = arith.index_cast %70 : i32 to index
    %c0_38 = arith.constant 0 : index
    %c0_39 = arith.constant 0 : index
    %111 = vector.load %arg8[%c0_37, %110, %c0_38, %c0_39] : memref<1x8x8x128xf32, #tpu.memory_space<vmem>>, vector<1x1x8x128xf32>
    %112 = vector.shape_cast %111 : vector<1x1x8x128xf32> to vector<8x128xf32>
    %113 = vector.shape_cast %109 : vector<8x128xf32> to vector<1x1x8x128xf32>
    tpu.vector_store %arg8[%c0_37, %110, %c0_38, %c0_39], %113 {strides = array<i32>} : memref<1x8x8x128xf32, #tpu.memory_space<vmem>>, vector<1x1x8x128xf32>,
    %114 = vector.shape_cast %105 : vector<8x1xi1> to vector<8x1xi1>
    %115 = vector.broadcast %114 : vector<8x1xi1> to vector<8x128xi1>
    %116 = arith.select %115, %103, %65 : vector<8x128xi1>, vector<8x128xf32>
    %c2_i32 = arith.constant 2 : i32
    %c1_i32_40 = arith.constant 1 : i32
    %117 = arith.subi %c1_i32_40, %arg0 : i32
    %118 = arith.muli %c2_i32, %117 : i32
    %c7_i32_41 = arith.constant 7 : i32
    %119 = arith.subi %c7_i32_41, %c2_i32 : i32
    %120 = arith.muli %119, %arg0 : i32
    %121 = arith.addi %118, %120 : i32
    %c8_i32_42 = arith.constant 8 : i32
    %122 = arith.muli %121, %c8_i32_42 : i32
    %123 = tpu.assume_multiple %122, 8 : i32
    %124 = arith.index_cast %123 : i32 to index
    %c0_43 = arith.constant 0 : index
    %125 = vector.load %arg10[%124, %c0_43] : memref<64x384xf32, #tpu.memory_space<vmem>>, vector<8x384xf32>
    %cst_44 = arith.constant dense<0.000000e+00> : vector<8x384xf32>
    %126 = tpu.matmul %116, %10, %cst_44 {dimension_numbers = #tpu.dot_dimension_numbers<[1], [0], [0], [1], [0, 0, 1, 1], [], []>} : vector<8x128xf32>, vector<128x384xf32>, vector<8x384xf32> -> vector<8x384xf32>
    %127 = vector.extract_strided_slice %125 {offsets = [0, 0], sizes = [8, 128], strides = [1, 1]} : vector<8x384xf32> to vector<8x128xf32>
    %128 = vector.extract_strided_slice %126 {offsets = [0, 0], sizes = [8, 128], strides = [1, 1]} : vector<8x384xf32> to vector<8x128xf32>
    %129 = arith.addf %127, %128 : vector<8x128xf32>
    %130 = arith.negf %129 : vector<8x128xf32>
    %131 = math.exp %130 : vector<8x128xf32>
    %cst_45 = arith.constant 1.000000e+00 : f32
    %132 = vector.broadcast %cst_45 : f32 to vector<8x128xf32>
    %133 = arith.addf %132, %131 : vector<8x128xf32>
    %134 = arith.divf %132, %133 : vector<8x128xf32>
    %135 = vector.extract_strided_slice %125 {offsets = [0, 128], sizes = [8, 128], strides = [1, 1]} : vector<8x384xf32> to vector<8x128xf32>
    %136 = vector.extract_strided_slice %126 {offsets = [0, 128], sizes = [8, 128], strides = [1, 1]} : vector<8x384xf32> to vector<8x128xf32>
    %137 = arith.addf %135, %136 : vector<8x128xf32>
    %138 = arith.negf %137 : vector<8x128xf32>
    %139 = math.exp %138 : vector<8x128xf32>
    %cst_46 = arith.constant 1.000000e+00 : f32
    %140 = vector.broadcast %cst_46 : f32 to vector<8x128xf32>
    %141 = arith.addf %140, %139 : vector<8x128xf32>
    %142 = arith.divf %140, %141 : vector<8x128xf32>
    %143 = vector.extract_strided_slice %125 {offsets = [0, 256], sizes = [8, 128], strides = [1, 1]} : vector<8x384xf32> to vector<8x128xf32>
    %144 = vector.extract_strided_slice %126 {offsets = [0, 256], sizes = [8, 128], strides = [1, 1]} : vector<8x384xf32> to vector<8x128xf32>
    %145 = vector.broadcast %12 : vector<1x128xf32> to vector<8x128xf32>
    %146 = arith.addf %144, %145 : vector<8x128xf32>
    %147 = arith.mulf %134, %146 : vector<8x128xf32>
    %148 = arith.addf %143, %147 : vector<8x128xf32>
    %149 = math.tanh %148 : vector<8x128xf32>
    %cst_47 = arith.constant 1.000000e+00 : f32
    %150 = vector.broadcast %cst_47 : f32 to vector<8x128xf32>
    %151 = arith.subf %150, %142 : vector<8x128xf32>
    %152 = arith.mulf %151, %149 : vector<8x128xf32>
    %153 = arith.mulf %142, %116 : vector<8x128xf32>
    %154 = arith.addf %152, %153 : vector<8x128xf32>
    %155 = vector.broadcast %121 : i32 to vector<8x1xi32>
    %156 = arith.cmpi slt, %155, %13 : vector<8x1xi32>
    %cst_48 = arith.constant 0.000000e+00 : f32
    %157 = vector.shape_cast %156 : vector<8x1xi1> to vector<8x1xi1>
    %158 = vector.broadcast %157 : vector<8x1xi1> to vector<8x128xi1>
    %159 = vector.broadcast %cst_48 : f32 to vector<8x128xf32>
    %160 = arith.select %158, %154, %159 : vector<8x128xi1>, vector<8x128xf32>
    %c0_49 = arith.constant 0 : index
    %161 = arith.index_cast %121 : i32 to index
    %c0_50 = arith.constant 0 : index
    %c0_51 = arith.constant 0 : index
    %162 = vector.load %arg8[%c0_49, %161, %c0_50, %c0_51] : memref<1x8x8x128xf32, #tpu.memory_space<vmem>>, vector<1x1x8x128xf32>
    %163 = vector.shape_cast %162 : vector<1x1x8x128xf32> to vector<8x128xf32>
    %164 = vector.shape_cast %160 : vector<8x128xf32> to vector<1x1x8x128xf32>
    tpu.vector_store %arg8[%c0_49, %161, %c0_50, %c0_51], %164 {strides = array<i32>} : memref<1x8x8x128xf32, #tpu.memory_space<vmem>>, vector<1x1x8x128xf32>,
    %165 = vector.shape_cast %156 : vector<8x1xi1> to vector<8x1xi1>
    %166 = vector.broadcast %165 : vector<8x1xi1> to vector<8x128xi1>
    %167 = arith.select %166, %154, %116 : vector<8x128xi1>, vector<8x128xf32>
    %c3_i32 = arith.constant 3 : i32
    %c1_i32_52 = arith.constant 1 : i32
    %168 = arith.subi %c1_i32_52, %arg0 : i32
    %169 = arith.muli %c3_i32, %168 : i32
    %c7_i32_53 = arith.constant 7 : i32
    %170 = arith.subi %c7_i32_53, %c3_i32 : i32
    %171 = arith.muli %170, %arg0 : i32
    %172 = arith.addi %169, %171 : i32
    %c8_i32_54 = arith.constant 8 : i32
    %173 = arith.muli %172, %c8_i32_54 : i32
    %174 = tpu.assume_multiple %173, 8 : i32
    %175 = arith.index_cast %174 : i32 to index
    %c0_55 = arith.constant 0 : index
    %176 = vector.load %arg10[%175, %c0_55] : memref<64x384xf32, #tpu.memory_space<vmem>>, vector<8x384xf32>
    %cst_56 = arith.constant dense<0.000000e+00> : vector<8x384xf32>
    %177 = tpu.matmul %167, %10, %cst_56 {dimension_numbers = #tpu.dot_dimension_numbers<[1], [0], [0], [1], [0, 0, 1, 1], [], []>} : vector<8x128xf32>, vector<128x384xf32>, vector<8x384xf32> -> vector<8x384xf32>
    %178 = vector.extract_strided_slice %176 {offsets = [0, 0], sizes = [8, 128], strides = [1, 1]} : vector<8x384xf32> to vector<8x128xf32>
    %179 = vector.extract_strided_slice %177 {offsets = [0, 0], sizes = [8, 128], strides = [1, 1]} : vector<8x384xf32> to vector<8x128xf32>
    %180 = arith.addf %178, %179 : vector<8x128xf32>
    %181 = arith.negf %180 : vector<8x128xf32>
    %182 = math.exp %181 : vector<8x128xf32>
    %cst_57 = arith.constant 1.000000e+00 : f32
    %183 = vector.broadcast %cst_57 : f32 to vector<8x128xf32>
    %184 = arith.addf %183, %182 : vector<8x128xf32>
    %185 = arith.divf %183, %184 : vector<8x128xf32>
    %186 = vector.extract_strided_slice %176 {offsets = [0, 128], sizes = [8, 128], strides = [1, 1]} : vector<8x384xf32> to vector<8x128xf32>
    %187 = vector.extract_strided_slice %177 {offsets = [0, 128], sizes = [8, 128], strides = [1, 1]} : vector<8x384xf32> to vector<8x128xf32>
    %188 = arith.addf %186, %187 : vector<8x128xf32>
    %189 = arith.negf %188 : vector<8x128xf32>
    %190 = math.exp %189 : vector<8x128xf32>
    %cst_58 = arith.constant 1.000000e+00 : f32
    %191 = vector.broadcast %cst_58 : f32 to vector<8x128xf32>
    %192 = arith.addf %191, %190 : vector<8x128xf32>
    %193 = arith.divf %191, %192 : vector<8x128xf32>
    %194 = vector.extract_strided_slice %176 {offsets = [0, 256], sizes = [8, 128], strides = [1, 1]} : vector<8x384xf32> to vector<8x128xf32>
    %195 = vector.extract_strided_slice %177 {offsets = [0, 256], sizes = [8, 128], strides = [1, 1]} : vector<8x384xf32> to vector<8x128xf32>
    %196 = vector.broadcast %12 : vector<1x128xf32> to vector<8x128xf32>
    %197 = arith.addf %195, %196 : vector<8x128xf32>
    %198 = arith.mulf %185, %197 : vector<8x128xf32>
    %199 = arith.addf %194, %198 : vector<8x128xf32>
    %200 = math.tanh %199 : vector<8x128xf32>
    %cst_59 = arith.constant 1.000000e+00 : f32
    %201 = vector.broadcast %cst_59 : f32 to vector<8x128xf32>
    %202 = arith.subf %201, %193 : vector<8x128xf32>
    %203 = arith.mulf %202, %200 : vector<8x128xf32>
    %204 = arith.mulf %193, %167 : vector<8x128xf32>
    %205 = arith.addf %203, %204 : vector<8x128xf32>
    %206 = vector.broadcast %172 : i32 to vector<8x1xi32>
    %207 = arith.cmpi slt, %206, %13 : vector<8x1xi32>
    %cst_60 = arith.constant 0.000000e+00 : f32
    %208 = vector.shape_cast %207 : vector<8x1xi1> to vector<8x1xi1>
    %209 = vector.broadcast %208 : vector<8x1xi1> to vector<8x128xi1>
    %210 = vector.broadcast %cst_60 : f32 to vector<8x128xf32>
    %211 = arith.select %209, %205, %210 : vector<8x128xi1>, vector<8x128xf32>
    %c0_61 = arith.constant 0 : index
    %212 = arith.index_cast %172 : i32 to index
    %c0_62 = arith.constant 0 : index
    %c0_63 = arith.constant 0 : index
    %213 = vector.load %arg8[%c0_61, %212, %c0_62, %c0_63] : memref<1x8x8x128xf32, #tpu.memory_space<vmem>>, vector<1x1x8x128xf32>
    %214 = vector.shape_cast %213 : vector<1x1x8x128xf32> to vector<8x128xf32>
    %215 = vector.shape_cast %211 : vector<8x128xf32> to vector<1x1x8x128xf32>
    tpu.vector_store %arg8[%c0_61, %212, %c0_62, %c0_63], %215 {strides = array<i32>} : memref<1x8x8x128xf32, #tpu.memory_space<vmem>>, vector<1x1x8x128xf32>,
    %216 = vector.shape_cast %207 : vector<8x1xi1> to vector<8x1xi1>
    %217 = vector.broadcast %216 : vector<8x1xi1> to vector<8x128xi1>
    %218 = arith.select %217, %205, %167 : vector<8x128xi1>, vector<8x128xf32>
    %c4_i32 = arith.constant 4 : i32
    %c1_i32_64 = arith.constant 1 : i32
    %219 = arith.subi %c1_i32_64, %arg0 : i32
    %220 = arith.muli %c4_i32, %219 : i32
    %c7_i32_65 = arith.constant 7 : i32
    %221 = arith.subi %c7_i32_65, %c4_i32 : i32
    %222 = arith.muli %221, %arg0 : i32
    %223 = arith.addi %220, %222 : i32
    %c8_i32_66 = arith.constant 8 : i32
    %224 = arith.muli %223, %c8_i32_66 : i32
    %225 = tpu.assume_multiple %224, 8 : i32
    %226 = arith.index_cast %225 : i32 to index
    %c0_67 = arith.constant 0 : index
    %227 = vector.load %arg10[%226, %c0_67] : memref<64x384xf32, #tpu.memory_space<vmem>>, vector<8x384xf32>
    %cst_68 = arith.constant dense<0.000000e+00> : vector<8x384xf32>
    %228 = tpu.matmul %218, %10, %cst_68 {dimension_numbers = #tpu.dot_dimension_numbers<[1], [0], [0], [1], [0, 0, 1, 1], [], []>} : vector<8x128xf32>, vector<128x384xf32>, vector<8x384xf32> -> vector<8x384xf32>
    %229 = vector.extract_strided_slice %227 {offsets = [0, 0], sizes = [8, 128], strides = [1, 1]} : vector<8x384xf32> to vector<8x128xf32>
    %230 = vector.extract_strided_slice %228 {offsets = [0, 0], sizes = [8, 128], strides = [1, 1]} : vector<8x384xf32> to vector<8x128xf32>
    %231 = arith.addf %229, %230 : vector<8x128xf32>
    %232 = arith.negf %231 : vector<8x128xf32>
    %233 = math.exp %232 : vector<8x128xf32>
    %cst_69 = arith.constant 1.000000e+00 : f32
    %234 = vector.broadcast %cst_69 : f32 to vector<8x128xf32>
    %235 = arith.addf %234, %233 : vector<8x128xf32>
    %236 = arith.divf %234, %235 : vector<8x128xf32>
    %237 = vector.extract_strided_slice %227 {offsets = [0, 128], sizes = [8, 128], strides = [1, 1]} : vector<8x384xf32> to vector<8x128xf32>
    %238 = vector.extract_strided_slice %228 {offsets = [0, 128], sizes = [8, 128], strides = [1, 1]} : vector<8x384xf32> to vector<8x128xf32>
    %239 = arith.addf %237, %238 : vector<8x128xf32>
    %240 = arith.negf %239 : vector<8x128xf32>
    %241 = math.exp %240 : vector<8x128xf32>
    %cst_70 = arith.constant 1.000000e+00 : f32
    %242 = vector.broadcast %cst_70 : f32 to vector<8x128xf32>
    %243 = arith.addf %242, %241 : vector<8x128xf32>
    %244 = arith.divf %242, %243 : vector<8x128xf32>
    %245 = vector.extract_strided_slice %227 {offsets = [0, 256], sizes = [8, 128], strides = [1, 1]} : vector<8x384xf32> to vector<8x128xf32>
    %246 = vector.extract_strided_slice %228 {offsets = [0, 256], sizes = [8, 128], strides = [1, 1]} : vector<8x384xf32> to vector<8x128xf32>
    %247 = vector.broadcast %12 : vector<1x128xf32> to vector<8x128xf32>
    %248 = arith.addf %246, %247 : vector<8x128xf32>
    %249 = arith.mulf %236, %248 : vector<8x128xf32>
    %250 = arith.addf %245, %249 : vector<8x128xf32>
    %251 = math.tanh %250 : vector<8x128xf32>
    %cst_71 = arith.constant 1.000000e+00 : f32
    %252 = vector.broadcast %cst_71 : f32 to vector<8x128xf32>
    %253 = arith.subf %252, %244 : vector<8x128xf32>
    %254 = arith.mulf %253, %251 : vector<8x128xf32>
    %255 = arith.mulf %244, %218 : vector<8x128xf32>
    %256 = arith.addf %254, %255 : vector<8x128xf32>
    %257 = vector.broadcast %223 : i32 to vector<8x1xi32>
    %258 = arith.cmpi slt, %257, %13 : vector<8x1xi32>
    %cst_72 = arith.constant 0.000000e+00 : f32
    %259 = vector.shape_cast %258 : vector<8x1xi1> to vector<8x1xi1>
    %260 = vector.broadcast %259 : vector<8x1xi1> to vector<8x128xi1>
    %261 = vector.broadcast %cst_72 : f32 to vector<8x128xf32>
    %262 = arith.select %260, %256, %261 : vector<8x128xi1>, vector<8x128xf32>
    %c0_73 = arith.constant 0 : index
    %263 = arith.index_cast %223 : i32 to index
    %c0_74 = arith.constant 0 : index
    %c0_75 = arith.constant 0 : index
    %264 = vector.load %arg8[%c0_73, %263, %c0_74, %c0_75] : memref<1x8x8x128xf32, #tpu.memory_space<vmem>>, vector<1x1x8x128xf32>
    %265 = vector.shape_cast %264 : vector<1x1x8x128xf32> to vector<8x128xf32>
    %266 = vector.shape_cast %262 : vector<8x128xf32> to vector<1x1x8x128xf32>
    tpu.vector_store %arg8[%c0_73, %263, %c0_74, %c0_75], %266 {strides = array<i32>} : memref<1x8x8x128xf32, #tpu.memory_space<vmem>>, vector<1x1x8x128xf32>,
    %267 = vector.shape_cast %258 : vector<8x1xi1> to vector<8x1xi1>
    %268 = vector.broadcast %267 : vector<8x1xi1> to vector<8x128xi1>
    %269 = arith.select %268, %256, %218 : vector<8x128xi1>, vector<8x128xf32>
    %c5_i32 = arith.constant 5 : i32
    %c1_i32_76 = arith.constant 1 : i32
    %270 = arith.subi %c1_i32_76, %arg0 : i32
    %271 = arith.muli %c5_i32, %270 : i32
    %c7_i32_77 = arith.constant 7 : i32
    %272 = arith.subi %c7_i32_77, %c5_i32 : i32
    %273 = arith.muli %272, %arg0 : i32
    %274 = arith.addi %271, %273 : i32
    %c8_i32_78 = arith.constant 8 : i32
    %275 = arith.muli %274, %c8_i32_78 : i32
    %276 = tpu.assume_multiple %275, 8 : i32
    %277 = arith.index_cast %276 : i32 to index
    %c0_79 = arith.constant 0 : index
    %278 = vector.load %arg10[%277, %c0_79] : memref<64x384xf32, #tpu.memory_space<vmem>>, vector<8x384xf32>
    %cst_80 = arith.constant dense<0.000000e+00> : vector<8x384xf32>
    %279 = tpu.matmul %269, %10, %cst_80 {dimension_numbers = #tpu.dot_dimension_numbers<[1], [0], [0], [1], [0, 0, 1, 1], [], []>} : vector<8x128xf32>, vector<128x384xf32>, vector<8x384xf32> -> vector<8x384xf32>
    %280 = vector.extract_strided_slice %278 {offsets = [0, 0], sizes = [8, 128], strides = [1, 1]} : vector<8x384xf32> to vector<8x128xf32>
    %281 = vector.extract_strided_slice %279 {offsets = [0, 0], sizes = [8, 128], strides = [1, 1]} : vector<8x384xf32> to vector<8x128xf32>
    %282 = arith.addf %280, %281 : vector<8x128xf32>
    %283 = arith.negf %282 : vector<8x128xf32>
    %284 = math.exp %283 : vector<8x128xf32>
    %cst_81 = arith.constant 1.000000e+00 : f32
    %285 = vector.broadcast %cst_81 : f32 to vector<8x128xf32>
    %286 = arith.addf %285, %284 : vector<8x128xf32>
    %287 = arith.divf %285, %286 : vector<8x128xf32>
    %288 = vector.extract_strided_slice %278 {offsets = [0, 128], sizes = [8, 128], strides = [1, 1]} : vector<8x384xf32> to vector<8x128xf32>
    %289 = vector.extract_strided_slice %279 {offsets = [0, 128], sizes = [8, 128], strides = [1, 1]} : vector<8x384xf32> to vector<8x128xf32>
    %290 = arith.addf %288, %289 : vector<8x128xf32>
    %291 = arith.negf %290 : vector<8x128xf32>
    %292 = math.exp %291 : vector<8x128xf32>
    %cst_82 = arith.constant 1.000000e+00 : f32
    %293 = vector.broadcast %cst_82 : f32 to vector<8x128xf32>
    %294 = arith.addf %293, %292 : vector<8x128xf32>
    %295 = arith.divf %293, %294 : vector<8x128xf32>
    %296 = vector.extract_strided_slice %278 {offsets = [0, 256], sizes = [8, 128], strides = [1, 1]} : vector<8x384xf32> to vector<8x128xf32>
    %297 = vector.extract_strided_slice %279 {offsets = [0, 256], sizes = [8, 128], strides = [1, 1]} : vector<8x384xf32> to vector<8x128xf32>
    %298 = vector.broadcast %12 : vector<1x128xf32> to vector<8x128xf32>
    %299 = arith.addf %297, %298 : vector<8x128xf32>
    %300 = arith.mulf %287, %299 : vector<8x128xf32>
    %301 = arith.addf %296, %300 : vector<8x128xf32>
    %302 = math.tanh %301 : vector<8x128xf32>
    %cst_83 = arith.constant 1.000000e+00 : f32
    %303 = vector.broadcast %cst_83 : f32 to vector<8x128xf32>
    %304 = arith.subf %303, %295 : vector<8x128xf32>
    %305 = arith.mulf %304, %302 : vector<8x128xf32>
    %306 = arith.mulf %295, %269 : vector<8x128xf32>
    %307 = arith.addf %305, %306 : vector<8x128xf32>
    %308 = vector.broadcast %274 : i32 to vector<8x1xi32>
    %309 = arith.cmpi slt, %308, %13 : vector<8x1xi32>
    %cst_84 = arith.constant 0.000000e+00 : f32
    %310 = vector.shape_cast %309 : vector<8x1xi1> to vector<8x1xi1>
    %311 = vector.broadcast %310 : vector<8x1xi1> to vector<8x128xi1>
    %312 = vector.broadcast %cst_84 : f32 to vector<8x128xf32>
    %313 = arith.select %311, %307, %312 : vector<8x128xi1>, vector<8x128xf32>
    %c0_85 = arith.constant 0 : index
    %314 = arith.index_cast %274 : i32 to index
    %c0_86 = arith.constant 0 : index
    %c0_87 = arith.constant 0 : index
    %315 = vector.load %arg8[%c0_85, %314, %c0_86, %c0_87] : memref<1x8x8x128xf32, #tpu.memory_space<vmem>>, vector<1x1x8x128xf32>
    %316 = vector.shape_cast %315 : vector<1x1x8x128xf32> to vector<8x128xf32>
    %317 = vector.shape_cast %313 : vector<8x128xf32> to vector<1x1x8x128xf32>
    tpu.vector_store %arg8[%c0_85, %314, %c0_86, %c0_87], %317 {strides = array<i32>} : memref<1x8x8x128xf32, #tpu.memory_space<vmem>>, vector<1x1x8x128xf32>,
    %318 = vector.shape_cast %309 : vector<8x1xi1> to vector<8x1xi1>
    %319 = vector.broadcast %318 : vector<8x1xi1> to vector<8x128xi1>
    %320 = arith.select %319, %307, %269 : vector<8x128xi1>, vector<8x128xf32>
    %c6_i32 = arith.constant 6 : i32
    %c1_i32_88 = arith.constant 1 : i32
    %321 = arith.subi %c1_i32_88, %arg0 : i32
    %322 = arith.muli %c6_i32, %321 : i32
    %c7_i32_89 = arith.constant 7 : i32
    %323 = arith.subi %c7_i32_89, %c6_i32 : i32
    %324 = arith.muli %323, %arg0 : i32
    %325 = arith.addi %322, %324 : i32
    %c8_i32_90 = arith.constant 8 : i32
    %326 = arith.muli %325, %c8_i32_90 : i32
    %327 = tpu.assume_multiple %326, 8 : i32
    %328 = arith.index_cast %327 : i32 to index
    %c0_91 = arith.constant 0 : index
    %329 = vector.load %arg10[%328, %c0_91] : memref<64x384xf32, #tpu.memory_space<vmem>>, vector<8x384xf32>
    %cst_92 = arith.constant dense<0.000000e+00> : vector<8x384xf32>
    %330 = tpu.matmul %320, %10, %cst_92 {dimension_numbers = #tpu.dot_dimension_numbers<[1], [0], [0], [1], [0, 0, 1, 1], [], []>} : vector<8x128xf32>, vector<128x384xf32>, vector<8x384xf32> -> vector<8x384xf32>
    %331 = vector.extract_strided_slice %329 {offsets = [0, 0], sizes = [8, 128], strides = [1, 1]} : vector<8x384xf32> to vector<8x128xf32>
    %332 = vector.extract_strided_slice %330 {offsets = [0, 0], sizes = [8, 128], strides = [1, 1]} : vector<8x384xf32> to vector<8x128xf32>
    %333 = arith.addf %331, %332 : vector<8x128xf32>
    %334 = arith.negf %333 : vector<8x128xf32>
    %335 = math.exp %334 : vector<8x128xf32>
    %cst_93 = arith.constant 1.000000e+00 : f32
    %336 = vector.broadcast %cst_93 : f32 to vector<8x128xf32>
    %337 = arith.addf %336, %335 : vector<8x128xf32>
    %338 = arith.divf %336, %337 : vector<8x128xf32>
    %339 = vector.extract_strided_slice %329 {offsets = [0, 128], sizes = [8, 128], strides = [1, 1]} : vector<8x384xf32> to vector<8x128xf32>
    %340 = vector.extract_strided_slice %330 {offsets = [0, 128], sizes = [8, 128], strides = [1, 1]} : vector<8x384xf32> to vector<8x128xf32>
    %341 = arith.addf %339, %340 : vector<8x128xf32>
    %342 = arith.negf %341 : vector<8x128xf32>
    %343 = math.exp %342 : vector<8x128xf32>
    %cst_94 = arith.constant 1.000000e+00 : f32
    %344 = vector.broadcast %cst_94 : f32 to vector<8x128xf32>
    %345 = arith.addf %344, %343 : vector<8x128xf32>
    %346 = arith.divf %344, %345 : vector<8x128xf32>
    %347 = vector.extract_strided_slice %329 {offsets = [0, 256], sizes = [8, 128], strides = [1, 1]} : vector<8x384xf32> to vector<8x128xf32>
    %348 = vector.extract_strided_slice %330 {offsets = [0, 256], sizes = [8, 128], strides = [1, 1]} : vector<8x384xf32> to vector<8x128xf32>
    %349 = vector.broadcast %12 : vector<1x128xf32> to vector<8x128xf32>
    %350 = arith.addf %348, %349 : vector<8x128xf32>
    %351 = arith.mulf %338, %350 : vector<8x128xf32>
    %352 = arith.addf %347, %351 : vector<8x128xf32>
    %353 = math.tanh %352 : vector<8x128xf32>
    %cst_95 = arith.constant 1.000000e+00 : f32
    %354 = vector.broadcast %cst_95 : f32 to vector<8x128xf32>
    %355 = arith.subf %354, %346 : vector<8x128xf32>
    %356 = arith.mulf %355, %353 : vector<8x128xf32>
    %357 = arith.mulf %346, %320 : vector<8x128xf32>
    %358 = arith.addf %356, %357 : vector<8x128xf32>
    %359 = vector.broadcast %325 : i32 to vector<8x1xi32>
    %360 = arith.cmpi slt, %359, %13 : vector<8x1xi32>
    %cst_96 = arith.constant 0.000000e+00 : f32
    %361 = vector.shape_cast %360 : vector<8x1xi1> to vector<8x1xi1>
    %362 = vector.broadcast %361 : vector<8x1xi1> to vector<8x128xi1>
    %363 = vector.broadcast %cst_96 : f32 to vector<8x128xf32>
    %364 = arith.select %362, %358, %363 : vector<8x128xi1>, vector<8x128xf32>
    %c0_97 = arith.constant 0 : index
    %365 = arith.index_cast %325 : i32 to index
    %c0_98 = arith.constant 0 : index
    %c0_99 = arith.constant 0 : index
    %366 = vector.load %arg8[%c0_97, %365, %c0_98, %c0_99] : memref<1x8x8x128xf32, #tpu.memory_space<vmem>>, vector<1x1x8x128xf32>
    %367 = vector.shape_cast %366 : vector<1x1x8x128xf32> to vector<8x128xf32>
    %368 = vector.shape_cast %364 : vector<8x128xf32> to vector<1x1x8x128xf32>
    tpu.vector_store %arg8[%c0_97, %365, %c0_98, %c0_99], %368 {strides = array<i32>} : memref<1x8x8x128xf32, #tpu.memory_space<vmem>>, vector<1x1x8x128xf32>,
    %369 = vector.shape_cast %360 : vector<8x1xi1> to vector<8x1xi1>
    %370 = vector.broadcast %369 : vector<8x1xi1> to vector<8x128xi1>
    %371 = arith.select %370, %358, %320 : vector<8x128xi1>, vector<8x128xf32>
    %c7_i32_100 = arith.constant 7 : i32
    %c1_i32_101 = arith.constant 1 : i32
    %372 = arith.subi %c1_i32_101, %arg0 : i32
    %373 = arith.muli %c7_i32_100, %372 : i32
    %c7_i32_102 = arith.constant 7 : i32
    %374 = arith.subi %c7_i32_102, %c7_i32_100 : i32
    %375 = arith.muli %374, %arg0 : i32
    %376 = arith.addi %373, %375 : i32
    %c8_i32_103 = arith.constant 8 : i32
    %377 = arith.muli %376, %c8_i32_103 : i32
    %378 = tpu.assume_multiple %377, 8 : i32
    %379 = arith.index_cast %378 : i32 to index
    %c0_104 = arith.constant 0 : index
    %380 = vector.load %arg10[%379, %c0_104] : memref<64x384xf32, #tpu.memory_space<vmem>>, vector<8x384xf32>
    %cst_105 = arith.constant dense<0.000000e+00> : vector<8x384xf32>
    %381 = tpu.matmul %371, %10, %cst_105 {dimension_numbers = #tpu.dot_dimension_numbers<[1], [0], [0], [1], [0, 0, 1, 1], [], []>} : vector<8x128xf32>, vector<128x384xf32>, vector<8x384xf32> -> vector<8x384xf32>
    %382 = vector.extract_strided_slice %380 {offsets = [0, 0], sizes = [8, 128], strides = [1, 1]} : vector<8x384xf32> to vector<8x128xf32>
    %383 = vector.extract_strided_slice %381 {offsets = [0, 0], sizes = [8, 128], strides = [1, 1]} : vector<8x384xf32> to vector<8x128xf32>
    %384 = arith.addf %382, %383 : vector<8x128xf32>
    %385 = arith.negf %384 : vector<8x128xf32>
    %386 = math.exp %385 : vector<8x128xf32>
    %cst_106 = arith.constant 1.000000e+00 : f32
    %387 = vector.broadcast %cst_106 : f32 to vector<8x128xf32>
    %388 = arith.addf %387, %386 : vector<8x128xf32>
    %389 = arith.divf %387, %388 : vector<8x128xf32>
    %390 = vector.extract_strided_slice %380 {offsets = [0, 128], sizes = [8, 128], strides = [1, 1]} : vector<8x384xf32> to vector<8x128xf32>
    %391 = vector.extract_strided_slice %381 {offsets = [0, 128], sizes = [8, 128], strides = [1, 1]} : vector<8x384xf32> to vector<8x128xf32>
    %392 = arith.addf %390, %391 : vector<8x128xf32>
    %393 = arith.negf %392 : vector<8x128xf32>
    %394 = math.exp %393 : vector<8x128xf32>
    %cst_107 = arith.constant 1.000000e+00 : f32
    %395 = vector.broadcast %cst_107 : f32 to vector<8x128xf32>
    %396 = arith.addf %395, %394 : vector<8x128xf32>
    %397 = arith.divf %395, %396 : vector<8x128xf32>
    %398 = vector.extract_strided_slice %380 {offsets = [0, 256], sizes = [8, 128], strides = [1, 1]} : vector<8x384xf32> to vector<8x128xf32>
    %399 = vector.extract_strided_slice %381 {offsets = [0, 256], sizes = [8, 128], strides = [1, 1]} : vector<8x384xf32> to vector<8x128xf32>
    %400 = vector.broadcast %12 : vector<1x128xf32> to vector<8x128xf32>
    %401 = arith.addf %399, %400 : vector<8x128xf32>
    %402 = arith.mulf %389, %401 : vector<8x128xf32>
    %403 = arith.addf %398, %402 : vector<8x128xf32>
    %404 = math.tanh %403 : vector<8x128xf32>
    %cst_108 = arith.constant 1.000000e+00 : f32
    %405 = vector.broadcast %cst_108 : f32 to vector<8x128xf32>
    %406 = arith.subf %405, %397 : vector<8x128xf32>
    %407 = arith.mulf %406, %404 : vector<8x128xf32>
    %408 = arith.mulf %397, %371 : vector<8x128xf32>
    %409 = arith.addf %407, %408 : vector<8x128xf32>
    %410 = vector.broadcast %376 : i32 to vector<8x1xi32>
    %411 = arith.cmpi slt, %410, %13 : vector<8x1xi32>
    %cst_109 = arith.constant 0.000000e+00 : f32
    %412 = vector.shape_cast %411 : vector<8x1xi1> to vector<8x1xi1>
    %413 = vector.broadcast %412 : vector<8x1xi1> to vector<8x128xi1>
    %414 = vector.broadcast %cst_109 : f32 to vector<8x128xf32>
    %415 = arith.select %413, %409, %414 : vector<8x128xi1>, vector<8x128xf32>
    %c0_110 = arith.constant 0 : index
    %416 = arith.index_cast %376 : i32 to index
    %c0_111 = arith.constant 0 : index
    %c0_112 = arith.constant 0 : index
    %417 = vector.load %arg8[%c0_110, %416, %c0_111, %c0_112] : memref<1x8x8x128xf32, #tpu.memory_space<vmem>>, vector<1x1x8x128xf32>
    %418 = vector.shape_cast %417 : vector<1x1x8x128xf32> to vector<8x128xf32>
    %419 = vector.shape_cast %415 : vector<8x128xf32> to vector<1x1x8x128xf32>
    tpu.vector_store %arg8[%c0_110, %416, %c0_111, %c0_112], %419 {strides = array<i32>} : memref<1x8x8x128xf32, #tpu.memory_space<vmem>>, vector<1x1x8x128xf32>,
    %420 = vector.shape_cast %411 : vector<8x1xi1> to vector<8x1xi1>
    %421 = vector.broadcast %420 : vector<8x1xi1> to vector<8x128xi1>
    %422 = arith.select %421, %409, %371 : vector<8x128xi1>, vector<8x128xf32>
    %c8_i32_113 = arith.constant 8 : i32
    %c0_114 = arith.constant 0 : index
    %c0_115 = arith.constant 0 : index
    %c0_116 = arith.constant 0 : index
    %423 = vector.load %arg7[%c0_114, %c0_115, %c0_116] : memref<1x128x128xf32, #tpu.memory_space<vmem>>, vector<1x128x128xf32>
    %424 = vector.shape_cast %423 : vector<1x128x128xf32> to vector<128x128xf32>
    %cst_117 = arith.constant dense<0.000000e+00> : vector<8x128xf32>
    %425 = tpu.matmul %422, %424, %cst_117 {dimension_numbers = #tpu.dot_dimension_numbers<[1], [0], [0], [1], [0, 0, 1, 1], [], []>} : vector<8x128xf32>, vector<128x128xf32>, vector<8x128xf32> -> vector<8x128xf32>
    %c0_118 = arith.constant 0 : index
    %c0_119 = arith.constant 0 : index
    %c0_120 = arith.constant 0 : index
    %426 = vector.load %arg9[%c0_118, %c0_119, %c0_120] : memref<1x8x128xf32, #tpu.memory_space<vmem>>, vector<1x8x128xf32>
    %427 = vector.shape_cast %426 : vector<1x8x128xf32> to vector<8x128xf32>
    %428 = vector.shape_cast %425 : vector<8x128xf32> to vector<1x8x128xf32>
    tpu.vector_store %arg9[%c0_118, %c0_119, %c0_120], %428 {strides = array<i32>} : memref<1x8x128xf32, #tpu.memory_space<vmem>>, vector<1x8x128xf32>,
    return
  }
  func.func @transform_0(%arg0: i32) -> (i32, i32) {
    %c0_i32 = arith.constant 0 : i32
    %c0_i32_0 = arith.constant 0 : i32
    %c0_i32_1 = arith.constant 0 : i32
    return %c0_i32, %c0_i32_0 : i32, i32
  }
  func.func @transform_1(%arg0: i32) -> (i32, i32) {
    %c0_i32 = arith.constant 0 : i32
    %c0_i32_0 = arith.constant 0 : i32
    %c0_i32_1 = arith.constant 0 : i32
    return %c0_i32, %c0_i32_0 : i32, i32
  }
  func.func @transform_2(%arg0: i32) -> (i32, i32, i32) {
    %c0_i32 = arith.constant 0 : i32
    %c0_i32_0 = arith.constant 0 : i32
    %c0_i32_1 = arith.constant 0 : i32
    return %arg0, %c0_i32, %c0_i32_0 : i32, i32, i32
  }
  func.func @transform_3(%arg0: i32) -> (i32, i32, i32) {
    %c0_i32 = arith.constant 0 : i32
    %c0_i32_0 = arith.constant 0 : i32
    %c0_i32_1 = arith.constant 0 : i32
    return %arg0, %c0_i32, %c0_i32_0 : i32, i32, i32
  }
  func.func @transform_4(%arg0: i32) -> (i32, i32, i32) {
    %c0_i32 = arith.constant 0 : i32
    %c0_i32_0 = arith.constant 0 : i32
    %c0_i32_1 = arith.constant 0 : i32
    return %arg0, %c0_i32, %c0_i32_0 : i32, i32, i32
  }
  func.func @transform_5(%arg0: i32) -> (i32, i32, i32) {
    %c0_i32 = arith.constant 0 : i32
    %c0_i32_0 = arith.constant 0 : i32
    %c0_i32_1 = arith.constant 0 : i32
    return %arg0, %c0_i32, %c0_i32_0 : i32, i32, i32
  }
  func.func @transform_6(%arg0: i32) -> (i32, i32, i32) {
    %c0_i32 = arith.constant 0 : i32
    %c0_i32_0 = arith.constant 0 : i32
    %c0_i32_1 = arith.constant 0 : i32
    return %arg0, %c0_i32, %c0_i32_0 : i32, i32, i32
  }
  func.func @transform_7(%arg0: i32) -> (i32, i32, i32, i32) {
    %c0_i32 = arith.constant 0 : i32
    %c0_i32_0 = arith.constant 0 : i32
    %c0_i32_1 = arith.constant 0 : i32
    %c0_i32_2 = arith.constant 0 : i32
    return %arg0, %c0_i32, %c0_i32_0, %c0_i32_1 : i32, i32, i32, i32
  }
  func.func @transform_8(%arg0: i32) -> (i32, i32, i32) {
    %c0_i32 = arith.constant 0 : i32
    %c0_i32_0 = arith.constant 0 : i32
    %c0_i32_1 = arith.constant 0 : i32
    return %arg0, %c0_i32, %c0_i32_0 : i32, i32, i32
  }
}

</mosaic_0001>

<bundles_post_ra>
// kernel: tpu_custom_call.1
= control target key start
LH: loop header
LB: loop body
LE: loop exit
PB: predicated region body
PF: predicated region fallthrough
CT: control target
= control target key end

     0   :  { %s3791_s0 = inlined_call_operand.vmem [shape: s32[8,1], index: 0, kind: input, shape index: {}]   ;;  %s3792_s1 = inlined_call_operand.vmem [shape: f32[64,32], index: 1, kind: input, shape index: {}]   ;;  %s3793_s2 = inlined_call_operand.hbm [shape: f32[2,32,384], index: 2, kind: input, shape index: {}]   ;;  %s3794_s3 = inlined_call_operand.hbm [shape: f32[2,128,384], index: 3, kind: input, shape index: {}]   ;;  %s3795_s4 = inlined_call_operand.vmem [shape: f32[2,1,384], index: 4, kind: input, shape index: {}]   ;;  %s3796_s5 = inlined_call_operand.vmem [shape: f32[2,1,128], index: 5, kind: input, shape index: {}]   ;;  %s3797_s6 = inlined_call_operand.hbm [shape: f32[2,128,128], index: 6, kind: input, shape index: {}]   ;;  %s3798_s7 = inlined_call_operand.hbm [shape: f32[2,8,8,128], index: 7, kind: output, shape index: {0}]   ;;  %s3799_s8 = inlined_call_operand.hbm [shape: f32[2,8,128], index: 8, kind: output, shape index: {1}]  }
   0x1   :  { %3832 = sst [smem:[#allocation29_spill]] %s3794_s3 }
   0x2   :  { %3833 = sst [smem:[#allocation30_spill]] %s3798_s7 }
   0x3   :  { %3834 = sst [smem:[#allocation31_spill]] %s3799_s8 }
   0x4   :  { %14 = vsyncpa [#allocation4], 0 }
   0x5   :  { %16 = vsyncpa [#allocation4 + $0x1], 0 }
   0x6   :  { %17 = vsyncpa [#allocation7], 0 }
   0x7   :  { %19 = vsyncpa [#allocation7 + $0x1], 0 }
   0x8   :  { %20 = vsyncpa [#allocation5], 0 }
   0x9   :  { %22 = vsyncpa [#allocation5 + $0x1], 0 }
   0xa   :  { %23 = vsyncpa [#allocation11], 0 }
   0xb   :  { %25 = vsyncpa [#allocation11 + $0x1], 0  ;;  %s2585_s27 = smov 0   ;;  %s2587_s28 = smov 0  }
   0xc   :  { %s2589_s29 = smov 0   ;;  %s2591_s30 = smov 0  }
   0xd LB: > { %3835 = sst [smem:[#allocation16_spill]] %s2518_s27  ;;  %s2606_s9 = sadd.s32 4294967295, %s2530_s30   ;;  %s2530_s30 = sphi %s2591_s30, %s3881_s30   ;;  %s2526_s29 = sphi %s2589_s29, %s3883_s29   ;;  %s2522_s28 = sphi %s2587_s28, %s3885_s28   ;;  %s2518_s27 = sphi %s2585_s27, %s3884_s27  }
   0xe   : > { %3836 = sst [smem:[#allocation17_spill]] %s2526_s29  ;;  %s2036_s10 = sadd.s32 4294967294, %s2530_s30  }
   0xf   : > { %s2610_s11 = sadd.s32 1, %s2530_s30   ;;  %s80_s12 = sadd.s32 1, %s2526_s29 }
  0x10   : > { %3837 = sst [smem:[#allocation18_spill]] %s2610_s11  ;;  %s77_s13 = ssub.s32 %s2530_s30, %s2610_s11 }
  0x11   : > { %p87_p0 = scmp.ne.s32.totalorder %s2526_s29, %s2522_s28  ;;  %p78_p1 = scmp.eq.s32.totalorder %s77_s13, 0 }
  0x12   : > { %p88_p2 = scmp.eq.s32.totalorder %s2530_s30, 0  ;;  %p93_p3 = scmp.ne.s32.totalorder %s2522_s28, %s2518_s27 }
  0x13   : > { %p94_p4 = scmp.eq.s32.totalorder %s2606_s9, 0  ;;  %p221_p7 = scmp.eq.s32.totalorder %s2606_s9, 1 }
  0x14   : > { %s2622_s14 = scalar_select %p78_p1, %s2526_s29, %s80_s12  }
  0x15   : > { %p89_p5 = por %p88_p2, %p87_p0  ;;  %p2624_p6 = por %p94_p4, %p93_p3 }
  0x16   : > { %3838 = sst [smem:[#allocation19_spill]] %s2622_s14  ;;  %p227_p8 = scmp.eq.s32.totalorder %s2036_s10, 1 }
  0x17   : > { %p2038_p9 = scmp.ge.s32.totalorder %s2530_s30, 2  ;;  %p2162_p10 = scmp.lt.s32.totalorder %s2530_s30, 2 }
  0x18   : > { %p2631_p11 = por %p221_p7, %p87_p0  ;;  %p2635_p12 = por %p227_p8, %p93_p3 }
  0x19   : > { %s2640_s18 = sand.u32 1, %s2526_s29   ;;  %p2642_p13 = pnand %p2162_p10, %p89_p5 }
  0x1a   : > { %s3840_s16 = scalar_select %p2631_p11, 1, 0 }
  0x1b   : > { %s3842_s17 = scalar_select %p2635_p12, 1, 0 }
  0x1c   : > { %3841 = sst [smem:[#allocation20_spill]] %s3840_s16  ;;  %s301_s20 = sand.u32 1, %s2530_s30  }
  0x1d   : > { %3843 = sst [smem:[#allocation21_spill]] %s3842_s17  ;;  %s2130_s21 = smul.u32 384, %s2640_s18 }
  0x1e   : > { %s2131_s22 = smul.u32 384, %s2530_s30  ;;  %p2044_p0 = scmp.ge.s32.totalorder %s2530_s30, 1 }
  0x1f   : > { %p356_p1 = scmp.lt.s32.totalorder %s2530_s30, 3  ;;  %s3845_s3 = sld [smem:[#allocation29_spill]] }
  0x20   : > { %s305_s26 = scalar_lea.vmem [#allocation6], %s2130_s21  ;;  %s2658_s14 = scalar_lea.sflag [#allocation7], %s301_s20 }
  0x21   : > { %s313_s10 = sshll.u32 %s305_s26, 4  ;;  %p2654_p2 = pnand %p2044_p0, %p356_p1  ;;  %s314_s10 = int_to_ptr.vmem [resolvable:$true] %s313_s10 }
  0x22   : > { %p2342_p4 = pneg %p2642_p13 }
  0x25   : > { %s310_s25 = scalar_lea.hbm %s3845_s3, %s2131_s22  ;;  %s2345_s23 = scalar_lea.hbm %s3845_s3, 768 }
  0x26   : > { %s311_s12 = sshll.u32 %s310_s25, 4  ;;  %s312_s12 = int_to_ptr.hbm [resolvable:$true] %s311_s12 }
  0x27   : > { %s2338_s29 = sshra.s32 %s312_s12, 4  ;;  %s2339_s29 = int_to_ptr.hbm [resolvable:$true] %s2338_s29 }
  0x28   : > { %s2340_s11 = scalar_lea.hbm %s2339_s29, 384  ;;  %p2346_p8 = scmp.lt.s32.totalorder %s2339_s29, %s3845_s3 }
  0x29   : > { %p2341_p3 = scmp.ne.s32.totalorder %s2339_s29, %s2340_s11  ;;  %p2347_p10 = scmp.lt.s32.totalorder %s2345_s23, %s2340_s11 }
  0x2b   : > { %p2343_p5 = pnand %p2342_p4, %p2341_p3  ;;  %p2348_p0 = por %p2347_p10, %p2346_p8 }
  0x2d   : > { %p2344_p7 = pneg %p2343_p5 }
  0x2f   : > { %p2349_p1 = pnand %p2348_p0, %p2344_p7 }
  0x31   : > { %2352 = shalt.err (!%p2349_p1)
}
  0x32   : > { %s2532_s20 = smov 384   ;;  %s2533_s26 = smov 24  }
  0x33   : > { %2151 = dma.hbm_to_vmem [thread:$0]  (!%p2642_p13), %s312_s12, 6144, %s314_s10, %s2658_s14, %s2532_s20, %s2532_s20, %s2533_s26  }
  0x34   : > { %s2128_s29 = smul.u32 96, %s2640_s18  ;;  %s2041_s21 = sshll.u32 %s2640_s18, 7 }
  0x35   : > { %s2129_s11 = smul.u32 96, %s2530_s30  ;;  %s2118_s27 = sshll.u32 %s2530_s30, 7 }
  0x36   : > { %s283_s25 = scalar_lea.vmem [#allocation3], %s2128_s29  ;;  %s280_s8 = scalar_lea.sflag [#allocation4], %s2640_s18 }
  0x37   : > { %s288_s24 = scalar_lea.hbm %s3793_s2, %s2129_s11  ;;  %s291_s3 = sshll.u32 %s283_s25, 4  ;;  %s292_s3 = int_to_ptr.vmem [resolvable:$true] %s291_s3 }
  0x38   : > { %s289_s17 = sshll.u32 %s288_s24, 4  ;;  %s2375_s22 = scalar_lea.hbm %s3793_s2, 192  ;;  %s290_s17 = int_to_ptr.hbm [resolvable:$true] %s289_s17 }
  0x39   : > { %s2368_s7 = sshra.s32 %s290_s17, 4  ;;  %s2369_s7 = int_to_ptr.hbm [resolvable:$true] %s2368_s7 }
  0x3a   : > { %s2370_s16 = scalar_lea.hbm %s2369_s7, 96  ;;  %p2376_p8 = scmp.lt.s32.totalorder %s2369_s7, %s3793_s2 }
  0x3b   : > { %p2371_p3 = scmp.ne.s32.totalorder %s2369_s7, %s2370_s16  ;;  %p2377_p10 = scmp.lt.s32.totalorder %s2375_s22, %s2370_s16 }
  0x3d   : > { %p2373_p5 = pnand %p2371_p3, %p2342_p4  ;;  %p2378_p0 = por %p2377_p10, %p2376_p8 }
  0x3f   : > { %p2374_p7 = pneg %p2373_p5 }
  0x41   : > { %p2379_p1 = pnand %p2378_p0, %p2374_p7 }
  0x43   : > { %2382 = shalt.err (!%p2379_p1)
}
  0x44   : > { %2148 = dma.hbm_to_vmem [thread:$0]  (!%p2642_p13), %s290_s17, 1536, %s292_s3, %s280_s8, %s2532_s20, %s2532_s20, %s2533_s26  }
  0x45   : > { %s345_s24 = scalar_lea.hbm %s3797_s6, %s2118_s27  ;;  %s340_s25 = scalar_lea.vmem [#allocation8], %s2041_s21 }
  0x46   : > { %s348_s10 = sshll.u32 %s340_s25, 4  ;;  %s346_s12 = sshll.u32 %s345_s24, 4  ;;  %s349_s10 = int_to_ptr.vmem [resolvable:$true] %s348_s10  ;;  %s347_s12 = int_to_ptr.hbm [resolvable:$true] %s346_s12 }
  0x47   : > { %s2398_s7 = sshra.s32 %s347_s12, 4  ;;  %s2405_s3 = scalar_lea.hbm %s3797_s6, 256  ;;  %s2399_s7 = int_to_ptr.hbm [resolvable:$true] %s2398_s7 }
  0x48   : > { %s2400_s16 = scalar_lea.hbm %s2399_s7, 128  ;;  %p2406_p8 = scmp.lt.s32.totalorder %s2399_s7, %s3797_s6 }
  0x49   : > { %p2401_p3 = scmp.ne.s32.totalorder %s2399_s7, %s2400_s16  ;;  %p2407_p10 = scmp.lt.s32.totalorder %s2405_s3, %s2400_s16 }
  0x4b   : > { %p2403_p5 = pnand %p2401_p3, %p2342_p4  ;;  %p2408_p0 = por %p2407_p10, %p2406_p8 }
  0x4d   : > { %p2404_p7 = pneg %p2403_p5 }
  0x4f   : > { %p2409_p1 = pnand %p2408_p0, %p2404_p7 }
  0x51   : > { %2412 = shalt.err (!%p2409_p1)
}
  0x52   : > { %s2534_s27 = smov 128   ;;  %s2535_s20 = smov 8  }
  0x53   : > { %2154 = dma.hbm_to_vmem [thread:$0]  (!%p2642_p13), %s347_s12, 2048, %s349_s10, %s2658_s14, %s2534_s27, %s2534_s27, %s2535_s20  }
  0x54   : > { %360 = sbr.rel (%p2654_p2) target bundleno = 1706 (0x6aa), region = 48 }
  0x59   : > { %s2717_s26 = sand.u32 1, %s2522_s28  }
  0x5a   : > { %s2132_s21 = smul.u32 96, %s2717_s26  ;;  %s363_s29 = scalar_lea.sflag [#allocation4], %s2717_s26 }
  0x5c   : > { %s2721_s18 = scalar_lea.vmem [#allocation3], %s2132_s21 }
  0x5d   : > { %2501 = dma.done.wait (%p2624_p6), %s363_s29, 1536  }
  0x5e   : > { %2503 = vsyncadd (%p2624_p6), %s363_s29, 4294965760  ;;  %s372_s14 = sand.u32 1, %s2606_s9   ;;  %s2133_s19 = smul.u32 384, %s2717_s26 }
  0x5f   : > { %s373_s13 = scalar_lea.sflag [#allocation7], %s372_s14 }
  0x60   : > { %s2729_s23 = scalar_lea.vmem [#allocation6], %s2133_s19 }
  0x61   : > { %2505 = dma.done.wait (%p2624_p6), %s373_s13, 8192  }
  0x62   : > { %2507 = vsyncadd (%p2624_p6), %s373_s13, 4294959104  ;;  %v468_v0 = vld [vmem:[%s2721_s18 + $0x58] sm:$0xff]  ;;  %v465_v1 = vld [vmem:[%s2721_s18 + $0x40] sm:$0xff]  ;;  %vm477_vm0 = vcmask 261120   ;;  %s832_s11 = smul.u32 6, %s2606_s9  ;;  %s2923_s27 = ssub.s32 1, %s2606_s9 }
  0x63   : > { %596 = vmatpush.msra.mxu2 %v468_v0  ;;  %v466_v2 = vld [vmem:[%s2721_s18 + $0x48] sm:$0xff]  ;;  %v467_v3 = vld [vmem:[%s2721_s18 + $0x50] sm:$0xff]  ;;  %v464_v6 = vld [vmem:[%s2721_s18 + $0x38] sm:$0xff]  ;;  %s699_s17 = smul.u32 7, %s2606_s9  ;;  %v2536_v51 = vmov 0.0   ;;  %v3809_v57 = vmov 0  }
  0x64   : > { %v462_v4 = vld [vmem:[%s2721_s18 + $0x28] sm:$0xff]  ;;  %514 = vmatpush.msra.mxu0 %v466_v2  ;;  %555 = vmatpush.msra.mxu1 %v467_v3  ;;  %v463_v5 = vld [vmem:[%s2721_s18 + $0x30] sm:$0xff]  ;;  %v460_v7 = vld [vmem:[%s2721_s18 + $0x18] sm:$0xff]  ;;  %s2934_s20 = sadd.s32 %s832_s11, %s2923_s27  ;;  %p442_p6 = scmp.lt.s32.totalorder %s2606_s9, 1 }
  0x65   : > { %597 = vmatpush.msra.mxu2 %v465_v1  ;;  %v461_v8 = vld [vmem:[%s2721_s18 + $0x20] sm:$0xff]  ;;  %v2745_v9 = vld [vmem:[%s2729_s23 + $0x168] sm:$0xff]  ;;  %v459_v10 = vld [vmem:[%s2721_s18 + $0x10] sm:$0xff]  ;;  %v820_v55 = vstv %s699_s17  ;;  %2204 = vset.pattern.permute.xlu0 %v3809_v57  ;;  %s700_s21 = smul.u32 56, %s2606_s9  ;;  %s2046_s19 = sshll.u32 %s2717_s26, 6 }
  0x66   : > { %515 = vmatpush.msra.mxu0 %v463_v5  ;;  %556 = vmatpush.msra.mxu1 %v464_v6  ;;  %v2749_v11 = vld [vmem:[%s2729_s23 + $0x150] sm:$0xff]  ;;  %v449_v12 = vld [vmem:[%s3792_s1] sm:$0xff]  ;;  %v458_v14 = vld [vmem:[%s2721_s18 + $0x8] sm:$0xff]  ;;  %v951_v59 = vstv %s2934_s20  ;;  %s443_s12 = scalar_select %p442_p6, %s2606_s9, 1 }
  0x67   : > { %598 = vmatpush.msra.mxu2 %v462_v4  ;;  %709 = vmatpush.msra.mxu3 %v2745_v9  ;;  %v457_v13 = vld [vmem:[%s2721_s18] sm:$0xff]  ;;  %v2759_v15 = vld [vmem:[%s2729_s23 + $0x138] sm:$0xff]  ;;  %v2769_v17 = vld [vmem:[%s2729_s23 + $0x108] sm:$0xff]  ;;  %s1486_s18 = smul.u32 6, %s2923_s27  ;;  %s701_s29 = sshra.s32 %s700_s21, 3 }
  0x68   : > { %516 = vmatpush.msra.mxu0 %v460_v7  ;;  %557 = vmatpush.msra.mxu1 %v461_v8  ;;  %v2764_v16 = vld [vmem:[%s2729_s23 + $0x120] sm:$0xff]  ;;  %v2772_v18 = vld [vmem:[%s2729_s23 + $0x178] sm:$0xff]  ;;  %v2777_v19 = vld [vmem:[%s2729_s23 + $0x170] sm:$0xff]  ;;  %s3124_s22 = scalar_lea.vmem %s3796_s5, %s443_s12  ;;  %s2134_s11 = smul.u32 3, %s443_s12 }
  0x69   : > { %599 = vmatpush.msra.mxu2 %v459_v10  ;;  %710 = vmatpush.msra.mxu3 %v2749_v11  ;;  %v450_v20 = vld [vmem:[%s3792_s1 + $0x8] sm:$0xff]  ;;  %v2784_v21 = vld [vmem:[%s2729_s23 + $0xf0] sm:$0xff]  ;;  %v2790_v22 = vld [vmem:[%s2729_s23 + $0x158] sm:$0xff]  ;;  %s2984_s13 = sadd.s32 %s2606_s9, %s1486_s18  ;;  %s2119_s18 = smul.u32 24, %s701_s29 }
  0x6a   : > { %2064 = vmatmul.msk.f32.vlgmr.msra.gmra.mxu2 %vm477_vm0, %v449_v12  ;;  %517 = vmatpush.msra.mxu0 %v457_v13  ;;  %v2793_v23 = vld [vmem:[%s2729_s23 + $0xd8] sm:$0xff]  ;;  %v2800_v24 = vld [vmem:[%s2729_s23 + $0x140] sm:$0xff]  ;;  %v2813_v27 = vld [vmem:[%s2729_s23 + $0x148] sm:$0xff]  ;;  %v1605_v5 = vstv %s2984_s13  ;;  %s445_s17 = scalar_lea.vmem %s3795_s4, %s2134_s11  ;;  %s3199_s15 = scalar_lea.vmem [#allocation9], %s2046_s19 }
  0x6b   : > { %558 = vmatpush.msra.mxu1 %v458_v14  ;;  %2048 = vmatmul.msk.f32.vlgmr.msra.gmra.mxu0 %vm477_vm0, %v449_v12  ;;  %v2803_v25 = vld [vmem:[%s2729_s23 + $0x160] sm:$0xff]  ;;  %v2816_v28 = vld [vmem:[%s2729_s23 + $0xa8] sm:$0xff]  ;;  %v451_v30 = vld [vmem:[%s3792_s1 + $0x10] sm:$0xff]  ;;  %s3189_s14 = scalar_lea.vmem [#allocation2], %s2119_s18  ;;  %s829_s24 = scalar_lea.vmem %s3199_s15, %s700_s21 [#allocation9] }
  0x6c   : > { %2056 = vmatmul.msk.f32.vlgmr.msra.gmra.mxu1 %vm477_vm0, %v449_v12  ;;  %711 = vmatpush.msra.mxu3 %v2759_v15  ;;  %v2807_v26 = vld [vmem:[%s2729_s23 + $0xc0] sm:$0xff]  ;;  %v2820_v29 = vld [vmem:[%s2729_s23 + $0x128] sm:$0xff]  ;;  %v2829_v31 = vld [vmem:[%s2729_s23 + $0x90] sm:$0xff]  ;;  %s2076_s25 = sshll.u32 %s2934_s20, 3  ;;  %s963_s16 = smul.u32 5, %s2606_s9 }
  0x6d   : > { %843 = vmatpush.msrb.mxu1 %v2745_v9  ;;  %749 = vmatpush.msrb.mxu0 %v2772_v18  ;;  %v2832_v32 = vld [vmem:[%s2729_s23 + $0x110] sm:$0xff]  ;;  %v2839_v33 = vld [vmem:[%s2729_s23 + $0x78] sm:$0xff]  ;;  %v2852_v36 = vld [vmem:[%s2729_s23 + $0x60] sm:$0xff]  ;;  %s835_s10 = sshra.s32 %s2076_s25, 3  ;;  %s2083_s11 = sshll.u32 %s2923_s27, 1 }
  0x6e   : > { %712 = vmatpush.msra.mxu3 %v2764_v16  ;;  %863 = vmatpush.msrb.mxu2 %v2777_v19  ;;  %v2845_v34 = vld [vmem:[%s2729_s23 + $0xf8] sm:$0xff]  ;;  %v2848_v35 = vld [vmem:[%s2729_s23 + $0x130] sm:$0xff]  ;;  %v2861_v38 = vld [vmem:[%s2729_s23 + $0x48] sm:$0xff]  ;;  %s2120_s12 = smul.u32 24, %s835_s10  ;;  %s2088_s8 = sshll.u32 %s2606_s9, 2 }
  0x6f   : > { %844 = vmatpush.msrb.mxu1 %v2749_v11  ;;  %750 = vmatpush.msrb.mxu0 %v2803_v25  ;;  %v2858_v37 = vld [vmem:[%s2729_s23 + $0x118] sm:$0xff]  ;;  %v2864_v39 = vld [vmem:[%s2729_s23 + $0xe0] sm:$0xff]  ;;  %v2874_v41 = vld [vmem:[%s2729_s23 + $0x30] sm:$0xff]  ;;  %s1093_s3 = smul.u32 3, %s2923_s27  ;;  %s959_s18 = scalar_lea.vmem %s3199_s15, %s2076_s25 [#allocation9] }
  0x70   : > { %713 = vmatpush.msra.mxu3 %v2769_v17  ;;  %864 = vmatpush.msrb.mxu2 %v2790_v22  ;;  %v452_v40 = vld [vmem:[%s3792_s1 + $0x18] sm:$0xff]  ;;  %v2877_v42 = vld [vmem:[%s2729_s23 + $0xc8] sm:$0xff]  ;;  %v2890_v44 = vld [vmem:[%s2729_s23 + $0xb0] sm:$0xff]  ;;  %s3258_s7 = scalar_lea.vmem [#allocation2], %s2120_s12  ;;  %s1616_s29 = smul.u32 7, %s2923_s27 }
  0x71   : > { %845 = vmatpush.msrb.mxu1 %v2759_v15  ;;  %751 = vmatpush.msrb.mxu0 %v2813_v27  ;;  %v2884_v43 = vld [vmem:[%s2729_s23 + $0x18] sm:$0xff]  ;;  %v2893_v45 = vld [vmem:[%s2729_s23 + $0x100] sm:$0xff]  ;;  %v2903_v47 = vld [vmem:[%s2729_s23 + $0xe8] sm:$0xff]  ;;  %s3270_s21 = sadd.s32 %s2088_s8, %s1093_s3  ;;  %s1355_s3 = smul.u32 5, %s2923_s27 }
  0x72   : > { %2065 = vmatmul.msk.f32.gmra.mxu2 %vm477_vm0, %v450_v20  ;;  %714 = vmatpush.msra.mxu3 %v2784_v21  ;;  %3847 = vst [vmem:[#allocation22_spill] sm:$0xff] %v2884_v43  ;;  %v2897_v46 = vld [vmem:[%s2729_s23] sm:$0xff]  ;;  %v2906_v48 = vld [vmem:[%s2729_s23 + $0x98] sm:$0xff]  ;;  %v2912_v49 = vld [vmem:[%s2729_s23 + $0xd0] sm:$0xff]  ;;  %s2089_s10 = sshll.u32 %s3270_s21, 3  ;;  %s2098_s8 = sshll.u32 %s2606_s9, 1 }
  0x73   : > { %2049 = vmatmul.msk.f32.gmra.mxu0 %vm477_vm0, %v450_v20  ;;  %865 = vmatpush.msrb.mxu2 %v2800_v24  ;;  %3848 = vst [vmem:[#allocation23_spill] sm:$0xff] %v2897_v46  ;;  %v453_v50 = vld [vmem:[%s3792_s1 + $0x20] sm:$0xff]  ;;  %v2930_v52 = vld [vmem:[%s2729_s23 + $0xb8] sm:$0xff]  ;;  %v2952_v56 = vld [vmem:[%s2729_s23 + $0x88] sm:$0xff]  ;;  %s1097_s12 = sshra.s32 %s2089_s10, 3 }
  0x74   : > { %2057 = vmatmul.msk.f32.gmra.mxu1 %vm477_vm0, %v450_v20  ;;  %715 = vmatpush.msra.mxu3 %v2793_v23  ;;  %v2940_v53 = vld [vmem:[%s2729_s23 + $0xa0] sm:$0xff]  ;;  %v454_v61 = vld [vmem:[%s3792_s1 + $0x28] sm:$0xff]  ;;  %v2967_v62 = vld [vmem:[%s2729_s23 + $0x70] sm:$0xff] }
  0x75   : > { %846 = vmatpush.msrb.mxu1 %v2764_v16  ;;  %866 = vmatpush.msrb.mxu2 %v2820_v29  ;;  %v2945_v54 = vld [vmem:[%s3791_s0] sm:$0xff]  ;;  %v2971_v63 = vld [vmem:[%s2729_s23 + $0x68] sm:$0xff]  ;;  %v2978_v0 = vld [vmem:[%s2729_s23 + $0x58] sm:$0xff] }
  0x76   : > { %716 = vmatpush.msra.mxu3 %v2807_v26  ;;  %752 = vmatpush.msrb.mxu0 %v2848_v35  ;;  %3849 = vst [vmem:[#allocation24_spill] sm:$0xff] %v2945_v54  ;;  %vm821_vm1 = vcmp.lt.s32.totalorder %v820_v55, %v2945_v54  ;;  %v2958_v60 = vld [vmem:[%s2729_s23 + $0x80] sm:$0xff]  ;;  %vm952_vm2 = vcmp.lt.s32.totalorder %v951_v59, %v2945_v54  ;;  %v2994_v3 = vld [vmem:[%s2729_s23 + $0x50] sm:$0xff]  ;;  %v2999_v4 = vld [vmem:[%s2729_s23 + $0x28] sm:$0xff] }
  0x77   : > { %847 = vmatpush.msrb.mxu1 %v2769_v17  ;;  %867 = vmatpush.msrb.mxu2 %v2832_v32  ;;  %v822_v58 = vsel %vm821_vm1, 1, %v3809_v57  ;;  %v2989_v1 = vld [vmem:[%s2729_s23 + $0x40] sm:$0xff]  ;;  %v953_v2 = vsel %vm952_vm2, 1, %v3809_v57  ;;  %3850 = vst [vmem:[#allocation25_spill] sm:$0xff] %v2999_v4  ;;  %v455_v6 = vld [vmem:[%s3792_s1 + $0x30] sm:$0xff]  ;;  %v3009_v7 = vld [vmem:[%s2729_s23 + $0x38] sm:$0xff]  ;;  %vm1606_vm3 = vcmp.lt.s32.totalorder %v1605_v5, %v2945_v54 }
  0x78   : > { %717 = vmatpush.msra.mxu3 %v2816_v28  ;;  %753 = vmatpush.msrb.mxu0 %v2858_v37  ;;  %v3012_v8 = vld [vmem:[%s2729_s23 + $0x10] sm:$0xff]  ;;  %v3025_v10 = vld [vmem:[%s2729_s23 + $0x20] sm:$0xff]  ;;  %v1607_v12 = vsel %vm1606_vm3, 1, %v3809_v57  ;;  %v3032_v13 = vld [vmem:[%s2729_s23 + $0x8] sm:$0xff] }
  0x79   : > { %848 = vmatpush.msrb.mxu1 %v2784_v21  ;;  %868 = vmatpush.msrb.mxu2 %v2845_v34  ;;  %3851 = vst [vmem:[#allocation26_spill] sm:$0xff] %v3012_v8  ;;  %v456_v14 = vld [vmem:[%s3792_s1 + $0x38] sm:$0xff]  ;;  %v469_v20 = vld [vmem:[%s445_s17] sm:$0x7]  ;;  %s3266_s17 = sadd.s32 %s2083_s11, %s963_s16  ;;  %s2093_s11 = sshll.u32 %s2923_s27, 2 }
  0x7a   : > { %2066 = vmatmul.msk.f32.gmra.mxu2 %vm477_vm0, %v451_v30  ;;  %718 = vmatpush.msra.mxu3 %v2829_v31  ;;  %3852 = vst [vmem:[#allocation27_spill] sm:$0xff] %v3025_v10  ;;  %v3162_v59 = vperm.slane %v469_v20, 2  ;;  %s2084_s20 = sshll.u32 %s3266_s17, 3 }
  0x7b   : > { %2050 = vmatmul.msk.f32.gmra.mxu0 %vm477_vm0, %v451_v30  ;;  %849 = vmatpush.msrb.mxu1 %v2793_v23  ;;  %3853 = vst [vmem:[#allocation28_spill] sm:$0xff] %v3032_v13  ;;  %s1090_s25 = scalar_lea.vmem %s3199_s15, %s2084_s20 [#allocation9] }
  0x7c   : > { %2058 = vmatmul.msk.f32.gmra.mxu1 %vm477_vm0, %v451_v30  ;;  %719 = vmatpush.msra.mxu3 %v2839_v33  ;;  %v3156_v30 = vperm.slane %v469_v20, 0 }
  0x7d   : > { %869 = vmatpush.msrb.mxu2 %v2864_v39  ;;  %850 = vmatpush.msrb.mxu1 %v2807_v26 }
  0x7e   : > { %720 = vmatpush.msra.mxu3 %v2852_v36  ;;  %754 = vmatpush.msrb.mxu0 %v2893_v45 }
  0x7f   : > { %870 = vmatpush.msrb.mxu2 %v2877_v42  ;;  %851 = vmatpush.msrb.mxu1 %v2816_v28 }
  0x80   : > { %721 = vmatpush.msra.mxu3 %v2861_v38  ;;  %755 = vmatpush.msrb.mxu0 %v2903_v47 }
  0x81   : > { %871 = vmatpush.msrb.mxu2 %v2890_v44  ;;  %852 = vmatpush.msrb.mxu1 %v2829_v31 }
  0x82   : > { %2067 = vmatmul.msk.f32.gmra.mxu2 %vm477_vm0, %v452_v40  ;;  %722 = vmatpush.msra.mxu3 %v2874_v41 }
  0x83   : > { %2051 = vmatmul.msk.f32.gmra.mxu0 %vm477_vm0, %v452_v40  ;;  %872 = vmatpush.msrb.mxu2 %v2906_v48 }
  0x84   : > { %2059 = vmatmul.msk.f32.gmra.mxu1 %vm477_vm0, %v452_v40  ;;  %723 = vmatpush.msra.mxu3 %v2884_v43  ;;  %v3158_v40 = vperm.slane %v469_v20, 1 }
  0x85   : > { %853 = vmatpush.msrb.mxu1 %v2839_v33  ;;  %756 = vmatpush.msrb.mxu0 %v2912_v49 }
  0x86   : > { %724 = vmatpush.msra.mxu3 %v2897_v46  ;;  %824 = vperm.xlu0 %2204, %v822_v58  }
  0x87   : > { %725 = vmatmul.f32.vlgmr.msra.gmra.mxu3 %v2536_v51  ;;  %854 = vmatpush.msrb.mxu1 %v2852_v36 }
  0x88   : > { %729 = vmatpush.msrb.mxu3 %v2777_v19  ;;  %757 = vmatpush.msrb.mxu0 %v2930_v52 }
  0x89   : > { %873 = vmatpush.msrb.mxu2 %v2958_v60  ;;  %855 = vmatpush.msrb.mxu1 %v2861_v38 }
  0x8a   : > { %730 = vmatpush.msrb.mxu3 %v2790_v22  ;;  %2068 = vmatmul.msk.f32.gmra.mxu2 %vm477_vm0, %v453_v50 }
  0x8b   : > { %2052 = vmatmul.msk.f32.gmra.mxu0 %vm477_vm0, %v453_v50  ;;  %874 = vmatpush.msrb.mxu2 %v2971_v63 }
  0x8c   : > { %731 = vmatpush.msrb.mxu3 %v2800_v24  ;;  %2060 = vmatmul.msk.f32.gmra.mxu1 %vm477_vm0, %v453_v50 }
  0x8d   : > { %758 = vmatpush.msrb.mxu0 %v2940_v53  ;;  %875 = vmatpush.msrb.mxu2 %v2994_v3 }
  0x8e   : > { %732 = vmatpush.msrb.mxu3 %v2820_v29  ;;  %955 = vperm.xlu0 %2204, %v953_v2  }
  0x8f   : > { %759 = vmatpush.msrb.mxu0 %v2952_v56  ;;  %856 = vmatpush.msrb.mxu1 %v2874_v41 }
  0x90   : > { %733 = vmatpush.msrb.mxu3 %v2832_v32  ;;  %876 = vmatpush.msrb.mxu2 %v3009_v7 }
  0x91   : > { %760 = vmatpush.msrb.mxu0 %v2967_v62  ;;  %857 = vmatpush.msrb.mxu1 %v2884_v43 }
  0x92   : > { %734 = vmatpush.msrb.mxu3 %v2845_v34  ;;  %2069 = vmatmul.msk.f32.gmra.mxu2 %vm477_vm0, %v454_v61 }
  0x93   : > { %2053 = vmatmul.msk.f32.gmra.mxu0 %vm477_vm0, %v454_v61  ;;  %877 = vmatpush.msrb.mxu2 %v3025_v10 }
  0x94   : > { %735 = vmatpush.msrb.mxu3 %v2864_v39  ;;  %2061 = vmatmul.msk.f32.gmra.mxu1 %vm477_vm0, %v454_v61 }
  0x95   : > { %761 = vmatpush.msrb.mxu0 %v2978_v0  ;;  %858 = vmatpush.msrb.mxu1 %v2897_v46 }
  0x96   : > { %736 = vmatpush.msrb.mxu3 %v2877_v42  ;;  %1609 = vperm.xlu0 %2204, %v1607_v12  }
  0x97   : > { %762 = vmatpush.msrb.mxu0 %v2989_v1  ;;  %878 = vmatpush.msrb.mxu2 %v3032_v13 }
  0x98   : > { %737 = vmatpush.msrb.mxu3 %v2890_v44  ;;  %994 = vmatpush.msra.mxu1 %v2777_v19 }
  0x99   : > { %763 = vmatpush.msrb.mxu0 %v2999_v4  ;;  %1014 = vmatpush.msra.mxu2 %v2772_v18 }
  0x9a   : > { %738 = vmatpush.msrb.mxu3 %v2906_v48  ;;  %2070 = vmatmul.msk.f32.gmra.mxu2 %vm477_vm0, %v455_v6 }
  0x9b   : > { %764 = vmatpush.msrb.mxu0 %v3012_v8  ;;  %995 = vmatpush.msra.mxu1 %v2790_v22 }
  0x9c   : > { %2054 = vmatmul.msk.f32.gmra.mxu0 %vm477_vm0, %v455_v6  ;;  %739 = vmatpush.msrb.mxu3 %v2958_v60 }
  0x9d   : > { %2062 = vmatmul.msk.f32.gmra.mxu1 %vm477_vm0, %v455_v6  ;;  %974 = vmatpush.msra.mxu0 %v2745_v9 }
  0x9e   : > { %740 = vmatpush.msrb.mxu3 %v2971_v63  ;;  %1015 = vmatpush.msra.mxu2 %v2803_v25 }
  0x9f   : > { %975 = vmatpush.msra.mxu0 %v2749_v11  ;;  %996 = vmatpush.msra.mxu1 %v2800_v24 }
  0xa0   : > { %741 = vmatpush.msrb.mxu3 %v2994_v3  ;;  %1016 = vmatpush.msra.mxu2 %v2813_v27 }
  0xa1   : > { %976 = vmatpush.msra.mxu0 %v2759_v15  ;;  %997 = vmatpush.msra.mxu1 %v2820_v29 }
  0xa2   : > { %742 = vmatpush.msrb.mxu3 %v3009_v7  ;;  %2071 = vmatmul.msk.f32.gmra.mxu2 %vm477_vm0, %v456_v14 }
  0xa3   : > { %977 = vmatpush.msra.mxu0 %v2764_v16  ;;  %1017 = vmatpush.msra.mxu2 %v2848_v35 }
  0xa4   : > { %2055 = vmatmul.msk.f32.gmra.mxu0 %vm477_vm0, %v456_v14  ;;  %743 = vmatpush.msrb.mxu3 %v3025_v10 }
  0xa5   : > { %2063 = vmatmul.msk.f32.gmra.mxu1 %vm477_vm0, %v456_v14  ;;  %978 = vmatpush.msra.mxu0 %v2769_v17 }
  0xa6   : > { %744 = vmatpush.msrb.mxu3 %v3032_v13  ;;  %998 = vmatpush.msra.mxu1 %v2832_v32 }
  0xa7   : > { %745 = vmatmul.f32.vlgmr.msrb.gmra.mxu3 %v2536_v51  ;;  %1018 = vmatpush.msra.mxu2 %v2858_v37 }
  0xa8   : > { %883 = vmatpush.msra.mxu3 %v2772_v18  ;;  %979 = vmatpush.msra.mxu0 %v2784_v21 }
  0xa9   : > { %999 = vmatpush.msra.mxu1 %v2845_v34  ;;  %1019 = vmatpush.msra.mxu2 %v2893_v45 }
  0xaa   : > { %884 = vmatpush.msra.mxu3 %v2803_v25  ;;  %980 = vmatpush.msra.mxu0 %v2793_v23 }
  0xab   : > { %1000 = vmatpush.msra.mxu1 %v2864_v39  ;;  %1020 = vmatpush.msra.mxu2 %v2903_v47 }
  0xac   : > { %765 = vmatmul.f32.vlgmr.msrb.gmra.mxu0 %v2536_v51  ;;  %885 = vmatpush.msra.mxu3 %v2813_v27 }
  0xad   : > { %981 = vmatpush.msra.mxu0 %v2807_v26  ;;  %1001 = vmatpush.msra.mxu1 %v2877_v42 }
  0xae   : > { %886 = vmatpush.msra.mxu3 %v2848_v35  ;;  %1021 = vmatpush.msra.mxu2 %v2912_v49 }
  0xaf   : > { %982 = vmatpush.msra.mxu0 %v2816_v28  ;;  %1002 = vmatpush.msra.mxu1 %v2890_v44 }
  0xb0   : > { %887 = vmatpush.msra.mxu3 %v2858_v37  ;;  %1022 = vmatpush.msra.mxu2 %v2930_v52 }
  0xb1   : > { %983 = vmatpush.msra.mxu0 %v2829_v31  ;;  %1003 = vmatpush.msra.mxu1 %v2906_v48 }
  0xb2   : > { %888 = vmatpush.msra.mxu3 %v2893_v45  ;;  %1023 = vmatpush.msra.mxu2 %v2940_v53 }
  0xb3   : > { %984 = vmatpush.msra.mxu0 %v2839_v33  ;;  %1004 = vmatpush.msra.mxu1 %v2958_v60 }
  0xb4   : > { %889 = vmatpush.msra.mxu3 %v2903_v47  ;;  %1024 = vmatpush.msra.mxu2 %v2952_v56 }
  0xb5   : > { %985 = vmatpush.msra.mxu0 %v2852_v36  ;;  %1005 = vmatpush.msra.mxu1 %v2971_v63 }
  0xb6   : > { %890 = vmatpush.msra.mxu3 %v2912_v49  ;;  %1025 = vmatpush.msra.mxu2 %v2967_v62 }
  0xb7   : > { %986 = vmatpush.msra.mxu0 %v2861_v38  ;;  %1006 = vmatpush.msra.mxu1 %v2994_v3 }
  0xb8   : > { %891 = vmatpush.msra.mxu3 %v2930_v52  ;;  %1026 = vmatpush.msra.mxu2 %v2978_v0 }
  0xb9   : > { %987 = vmatpush.msra.mxu0 %v2874_v41  ;;  %1007 = vmatpush.msra.mxu1 %v3009_v7 }
  0xba   : > { %892 = vmatpush.msra.mxu3 %v2940_v53  ;;  %1027 = vmatpush.msra.mxu2 %v2989_v1 }
  0xbb   : > { %988 = vmatpush.msra.mxu0 %v2884_v43  ;;  %1008 = vmatpush.msra.mxu1 %v3025_v10 }
  0xbc   : > { %893 = vmatpush.msra.mxu3 %v2952_v56  ;;  %1028 = vmatpush.msra.mxu2 %v2999_v4 }
  0xbd   : > { %989 = vmatpush.msra.mxu0 %v2897_v46  ;;  %1009 = vmatpush.msra.mxu1 %v3032_v13 }
  0xbe   : > { %894 = vmatpush.msra.mxu3 %v2967_v62  ;;  %1029 = vmatpush.msra.mxu2 %v3012_v8 }
  0xbf   : > { %2205 = vset.pattern.permute.xlu1 %v3809_v57  ;;  %1125 = vmatpush.msrb.mxu0 %v2777_v19 }
  0xc0   : > { %895 = vmatpush.msra.mxu3 %v2978_v0  ;;  %2206 = vset.pattern.permute.xlu2 %v3809_v57 }
  0xc1   : > { %1126 = vmatpush.msrb.mxu0 %v2790_v22 }
  0xc2   : > { %896 = vmatpush.msra.mxu3 %v2989_v1 }
  0xc3   : > { %1127 = vmatpush.msrb.mxu0 %v2800_v24 }
  0xc4   : > { %897 = vmatpush.msra.mxu3 %v2999_v4 }
  0xc5   : > { %1128 = vmatpush.msrb.mxu0 %v2820_v29 }
  0xc6   : > { %898 = vmatpush.msra.mxu3 %v3012_v8 }
  0xc7   : > { %1129 = vmatpush.msrb.mxu0 %v2832_v32 }
  0xc8   : > { %1105 = vmatpush.msrb.mxu3 %v2745_v9 }
  0xc9   : > { %1130 = vmatpush.msrb.mxu0 %v2845_v34 }
  0xca   : > { %1106 = vmatpush.msrb.mxu3 %v2749_v11 }
  0xcb   : > { %1131 = vmatpush.msrb.mxu0 %v2864_v39 }
  0xcc   : > { %1107 = vmatpush.msrb.mxu3 %v2759_v15 }
  0xcd   : > { %1132 = vmatpush.msrb.mxu0 %v2877_v42 }
  0xce   : > { %1108 = vmatpush.msrb.mxu3 %v2764_v16 }
  0xcf   : > { %1133 = vmatpush.msrb.mxu0 %v2890_v44 }
  0xd0   : > { %1109 = vmatpush.msrb.mxu3 %v2769_v17 }
  0xd1   : > { %1134 = vmatpush.msrb.mxu0 %v2906_v48 }
  0xd2   : > { %1110 = vmatpush.msrb.mxu3 %v2784_v21 }
  0xd3   : > { %1135 = vmatpush.msrb.mxu0 %v2958_v60 }
  0xd4   : > { %1111 = vmatpush.msrb.mxu3 %v2793_v23 }
  0xd5   : > { %1136 = vmatpush.msrb.mxu0 %v2971_v63 }
  0xd6   : > { %1112 = vmatpush.msrb.mxu3 %v2807_v26 }
  0xd7   : > { %1137 = vmatpush.msrb.mxu0 %v2994_v3 }
  0xd8   : > { %1113 = vmatpush.msrb.mxu3 %v2816_v28 }
  0xd9   : > { %1138 = vmatpush.msrb.mxu0 %v3009_v7 }
  0xda   : > { %1114 = vmatpush.msrb.mxu3 %v2829_v31 }
  0xdb   : > { %1139 = vmatpush.msrb.mxu0 %v3025_v10 }
  0xdc   : > { %1115 = vmatpush.msrb.mxu3 %v2839_v33 }
  0xdd   : > { %1140 = vmatpush.msrb.mxu0 %v3032_v13 }
  0xde   : > { %1116 = vmatpush.msrb.mxu3 %v2852_v36 }
  0xe0   : > { %1117 = vmatpush.msrb.mxu3 %v2861_v38 }
  0xe2   : > { %1118 = vmatpush.msrb.mxu3 %v2874_v41 }
  0xe4   : > { %1119 = vmatpush.msrb.mxu3 %v2884_v43 }
  0xe6   : > { %1120 = vmatpush.msrb.mxu3 %v2897_v46  ;;  %v3194_v46 = vld [vmem:[%s3124_s22] ss:$0 sm:$0xff] }
  0xe8   : > { %v519_v50 = vpop.f32.mrf.mxu0 }
  0xe9   : > { %v520_v51 = vadd.f32 %v519_v50, %v3156_v30  ;;  %v560_v55 = vpop.f32.mrf.mxu1 }
  0xea   : > { %v561_v58 = vadd.f32 %v560_v55, %v3158_v40 }
  0xeb   : > { %625 = vst [vmem:[#allocation2] sm:$0xff] %v520_v51 }
  0xec   : > { %626 = vst [vmem:[#allocation2 + $0x8] sm:$0xff] %v561_v58 }
  0xed   : > { %v601_v61 = vpop.f32.mrf.mxu2 }
  0xee   : > { %v602_v2 = vadd.f32 %v601_v61, %v3162_v59 }
  0xf0   : > { %627 = vst [vmem:[#allocation2 + $0x10] sm:$0xff] %v602_v2  ;;  %v522_v5 = vpop.f32.mrf.mxu0 }
  0xf1   : > { %v523_v6 = vadd.f32 %v522_v5, %v3156_v30  ;;  %v563_v12 = vpop.f32.mrf.mxu1 }
  0xf2   : > { %v564_v14 = vadd.f32 %v563_v12, %v3158_v40 }
  0xf3   : > { %628 = vst [vmem:[#allocation2 + $0x18] sm:$0xff] %v523_v6 }
  0xf4   : > { %629 = vst [vmem:[#allocation2 + $0x20] sm:$0xff] %v564_v14 }
  0xf5   : > { %v604_v50 = vpop.f32.mrf.mxu2 }
  0xf6   : > { %v605_v57 = vadd.f32 %v604_v50, %v3162_v59 }
  0xf8   : > { %630 = vst [vmem:[#allocation2 + $0x28] sm:$0xff] %v605_v57  ;;  %v525_v20 = vpop.f32.mrf.mxu0 }
  0xf9   : > { %v526_v51 = vadd.f32 %v525_v20, %v3156_v30  ;;  %v566_v55 = vpop.f32.mrf.mxu1 }
  0xfa   : > { %v567_v58 = vadd.f32 %v566_v55, %v3158_v40 }
  0xfb   : > { %631 = vst [vmem:[#allocation2 + $0x30] sm:$0xff] %v526_v51 }
  0xfc   : > { %632 = vst [vmem:[#allocation2 + $0x38] sm:$0xff] %v567_v58 }
  0xfd   : > { %v607_v61 = vpop.f32.mrf.mxu2 }
  0xfe   : > { %v608_v2 = vadd.f32 %v607_v61, %v3162_v59 }
 0x100   : > { %633 = vst [vmem:[#allocation2 + $0x40] sm:$0xff] %v608_v2  ;;  %v528_v5 = vpop.f32.mrf.mxu0 }
 0x101   : > { %v529_v6 = vadd.f32 %v528_v5, %v3156_v30  ;;  %v569_v12 = vpop.f32.mrf.mxu1 }
 0x102   : > { %v570_v14 = vadd.f32 %v569_v12, %v3158_v40 }
 0x103   : > { %634 = vst [vmem:[#allocation2 + $0x48] sm:$0xff] %v529_v6 }
 0x104   : > { %635 = vst [vmem:[#allocation2 + $0x50] sm:$0xff] %v570_v14 }
 0x105   : > { %v610_v57 = vpop.f32.mrf.mxu2 }
 0x106   : > { %v611_v50 = vadd.f32 %v610_v57, %v3162_v59 }
 0x108   : > { %636 = vst [vmem:[#allocation2 + $0x58] sm:$0xff] %v611_v50  ;;  %v531_v20 = vpop.f32.mrf.mxu0 }
 0x109   : > { %v532_v51 = vadd.f32 %v531_v20, %v3156_v30  ;;  %v572_v55 = vpop.f32.mrf.mxu1 }
 0x10a   : > { %v573_v58 = vadd.f32 %v572_v55, %v3158_v40 }
 0x10b   : > { %637 = vst [vmem:[#allocation2 + $0x60] sm:$0xff] %v532_v51 }
 0x10c   : > { %638 = vst [vmem:[#allocation2 + $0x68] sm:$0xff] %v573_v58 }
 0x10d   : > { %v613_v61 = vpop.f32.mrf.mxu2 }
 0x10e   : > { %v614_v2 = vadd.f32 %v613_v61, %v3162_v59 }
 0x110   : > { %639 = vst [vmem:[#allocation2 + $0x70] sm:$0xff] %v614_v2  ;;  %v534_v5 = vpop.f32.mrf.mxu0 }
 0x111   : > { %v535_v6 = vadd.f32 %v534_v5, %v3156_v30  ;;  %v575_v12 = vpop.f32.mrf.mxu1 }
 0x112   : > { %v576_v14 = vadd.f32 %v575_v12, %v3158_v40 }
 0x113   : > { %640 = vst [vmem:[#allocation2 + $0x78] sm:$0xff] %v535_v6 }
 0x114   : > { %641 = vst [vmem:[#allocation2 + $0x80] sm:$0xff] %v576_v14 }
 0x115   : > { %v616_v57 = vpop.f32.mrf.mxu2 }
 0x116   : > { %v617_v50 = vadd.f32 %v616_v57, %v3162_v59  ;;  %v726_v57 = vpop.f32.mrf.mxu3 }
 0x118   : > { %642 = vst [vmem:[#allocation2 + $0x88] sm:$0xff] %v617_v50 }
 0x119   : > { %v537_v20 = vpop.f32.mrf.mxu0 }
 0x11a   : > { %v538_v51 = vadd.f32 %v537_v20, %v3156_v30  ;;  %v578_v55 = vpop.f32.mrf.mxu1 }
 0x11b   : > { %v579_v58 = vadd.f32 %v578_v55, %v3158_v40 }
 0x11c   : > { %643 = vst [vmem:[#allocation2 + $0x90] sm:$0xff] %v538_v51 }
 0x11d   : > { %644 = vst [vmem:[#allocation2 + $0x98] sm:$0xff] %v579_v58  ;;  %v619_v61 = vpop.f32.mrf.mxu2 }
 0x11e   : > { %v620_v2 = vadd.f32 %v619_v61, %v3162_v59 }
 0x120   : > { %645 = vst [vmem:[#allocation2 + $0xa0] sm:$0xff] %v620_v2 }
 0x121   : > { %v540_v5 = vpop.f32.mrf.mxu0 }
 0x122   : > { %v541_v6 = vadd.f32 %v540_v5, %v3156_v30  ;;  %v581_v12 = vpop.f32.mrf.mxu1 }
 0x123   : > { %v582_v14 = vadd.f32 %v581_v12, %v3158_v40 }
 0x124   : > { %646 = vst [vmem:[#allocation2 + $0xa8] sm:$0xff] %v541_v6 }
 0x125   : > { %647 = vst [vmem:[#allocation2 + $0xb0] sm:$0xff] %v582_v14  ;;  %v622_v50 = vpop.f32.mrf.mxu2 }
 0x126   : > { %v623_v20 = vadd.f32 %v622_v50, %v3162_v59 }
 0x128   : > { %648 = vst [vmem:[#allocation2 + $0xb8] sm:$0xff] %v623_v20 }
 0x12a   : > { %v746_v51 = vpop.f32.mrf.mxu3 }
 0x12f   : > { %v706_v30 = vld [vmem:[%s3189_s14] sm:$0xff]  ;;  %v707_v55 = vld [vmem:[%s3189_s14 + $0x8] sm:$0xff] }
 0x130   : > { %v769_v58 = vadd.f32 %v726_v57, %v706_v30  ;;  %v789_v61 = vadd.f32 %v746_v51, %v707_v55  ;;  %v766_v51 = vpop.f32.mrf.mxu0 }
 0x132   : > { %v2073_v40 = vmul.f32 -1.442695, %v769_v58  ;;  %v2074_v2 = vmul.f32 -1.442695, %v789_v61 }
 0x134   : > { %2208 = vpow2.f32 %v2073_v40 }
 0x135   : > { %2210 = vpow2.f32 %v2074_v2  ;;  %v812_v2 = vadd.f32 %v3194_v46, %v766_v51 }
 0x13a   : > { %v2209_v5 = vpop.eup %2208 }
 0x13b   : > { %v2211_v6 = vpop.eup %2210  ;;  %v773_v12 = vadd.f32 1.0, %v2209_v5 }
 0x13c   : > { %v793_v59 = vadd.f32 1.0, %v2211_v6 }
 0x13d   : > { %2212 = vrcp.f32 %v773_v12  ;;  %v785_v30 = vand.u32 2147483648, %v773_v12  ;;  %v783_v58 = vand.u32 2147483647, %v773_v12  ;;  %vm779_vm5 = vweird.f32 %v773_v12 }
 0x13e   : > { %2214 = vrcp.f32 %v793_v59  ;;  %v805_v10 = vand.u32 2147483648, %v793_v59  ;;  %vm799_vm9 = vweird.f32 %v793_v59  ;;  %v803_v43 = vand.u32 2147483647, %v793_v59 }
 0x13f   : > { %v786_v5 = vor.u32 1.1754944e-38, %v785_v30  ;;  %vm784_vm7 = vcmp.eq.f32.partialorder %v783_v58, 8.507059e+37 }
 0x140   : > { %vm804_vm11 = vcmp.eq.f32.partialorder %v803_v43, 8.507059e+37 }
 0x143   : > { %v2213_v14 = vpop.eup %2212 }
 0x144   : > { %v2215_v50 = vpop.eup %2214  ;;  %v775_v20 = vmul.f32 %v2213_v14, %v773_v12  ;;  %vm780_vm4 = vweird.f32 %v2213_v14  ;;  %v806_v12 = vor.u32 1.1754944e-38, %v805_v10 }
 0x145   : > { %v795_v54 = vmul.f32 %v2215_v50, %v793_v59  ;;  %vm781_vm6 = vmor %vm779_vm5, %vm780_vm4  ;;  %vm800_vm8 = vweird.f32 %v2215_v50  ;;  %v1734_v59 = vstv %s1616_s29 }
 0x146   : > { %v776_v13 = vsub.f32 1.0, %v775_v20  ;;  %vm801_vm10 = vmor %vm799_vm9, %vm800_vm8 }
 0x147   : > { %v796_v57 = vsub.f32 1.0, %v795_v54 }
 0x148   : > { %v777_v55 = vmul.f32 %v2213_v14, %v776_v13  ;;  %v708_v13 = vld [vmem:[%s3189_s14 + $0x10] sm:$0xff]  ;;  %s966_s14 = sshra.s32 %s2084_s20, 3  ;;  %s3567_s20 = sadd.s32 %s2098_s8, %s1355_s3 }
 0x149   : > { %v797_v61 = vmul.f32 %v2215_v50, %v796_v57  ;;  %s2121_s19 = smul.u32 24, %s966_s14  ;;  %s1221_s14 = scalar_lea.vmem %s3199_s15, %s2089_s10 [#allocation9] }
 0x14a   : > { %v778_v40 = vadd.f32 %v2213_v14, %v777_v55  ;;  %v825_v55 = vpop.permute.xlu0 %824 }
 0x14b   : > { %v798_v8 = vadd.f32 %v2215_v50, %v797_v61  ;;  %vm826_vm12 = vcmp.eq.s32.totalorder %v825_v55, 1 }
 0x14c   : > { %v782_v6 = vsel %vm781_vm6, %v2213_v14, %v778_v40 }
 0x14d   : > { %v787_v20 = vsel %vm784_vm7, %v786_v5, %v782_v6  ;;  %v802_v57 = vsel %vm801_vm10, %v2215_v50, %v798_v8 }
 0x14e   : > { %v813_v54 = vmul.f32 %v812_v2, %v787_v20  ;;  %v807_v51 = vsel %vm804_vm11, %v806_v12, %v802_v57 }
 0x14f   : > { %v816_v14 = vsub.f32 1.0, %v807_v51  ;;  %v818_v61 = vmul.f32 0.0, %v807_v51 }
 0x150   : > { %v814_v4 = vadd.f32 %v813_v54, %v708_v13 }
 0x152   : > { %2216 = vtanh.f32 %v814_v4 }
 0x158   : > { %v2217_v30 = vpop.eup %2216 }
 0x159   : > { %v817_v58 = vmul.f32 %v2217_v30, %v816_v14  ;;  %v842_v14 = vld [vmem:[%s3258_s7 + $0x10] sm:$0xff] }
 0x15b   : > { %v819_v40 = vadd.f32 %v818_v61, %v817_v58 }
 0x15d   : > { %2078 = vmatmul.msk.f32.vlgmr.msrb.gmra.mxu1 %vm826_vm12, %v819_v40  ;;  %2079 = vmatmul.msk.f32.vlgmr.msrb.gmra.mxu2 %vm826_vm12, %v819_v40  ;;  %v3204_v8 = vsel %vm826_vm12, %v819_v40, 0.0 }
 0x15e   : > { %2080 = vmatmul.msk.f32.vlgmr.msra.gmra.mxu3 %vm826_vm12, %v819_v40  ;;  %830 = vst [vmem:[%s829_s24] sm:$0xff] %v3204_v8  ;;  %1145 = vmatpush.msrb.mxu1 %v2772_v18  ;;  %v3859_v18 = vld [vmem:[#allocation28_spill] sm:$0xff]  ;;  %s3435_s24 = scalar_lea.vmem [#allocation2], %s2121_s19 }
 0x15f   : > { %1236 = vmatpush.msrb.mxu2 %v2745_v9  ;;  %1256 = vmatpush.msra.mxu3 %v2777_v19  ;;  %v3854_v9 = vld [vmem:[#allocation25_spill] sm:$0xff]  ;;  %v840_v19 = vld [vmem:[%s3258_s7] sm:$0xff] }
 0x160   : > { %1146 = vmatpush.msrb.mxu1 %v2803_v25 }
 0x161   : > { %1237 = vmatpush.msrb.mxu2 %v2749_v11  ;;  %1257 = vmatpush.msra.mxu3 %v2790_v22  ;;  %v3855_v11 = vld [vmem:[#allocation22_spill] sm:$0xff] }
 0x162   : > { %1147 = vmatpush.msrb.mxu1 %v2813_v27 }
 0x163   : > { %1238 = vmatpush.msrb.mxu2 %v2759_v15  ;;  %1258 = vmatpush.msra.mxu3 %v2800_v24  ;;  %v3856_v15 = vld [vmem:[#allocation27_spill] sm:$0xff]  ;;  %v841_v24 = vld [vmem:[%s3258_s7 + $0x8] sm:$0xff]  ;;  %s2122_s7 = smul.u32 24, %s1097_s12  ;;  %s2099_s12 = sshll.u32 %s3567_s20, 3 }
 0x164   : > { %1148 = vmatpush.msrb.mxu1 %v2848_v35  ;;  %v3861_v35 = vmov 0  }
 0x165   : > { %1239 = vmatpush.msrb.mxu2 %v2764_v16  ;;  %1259 = vmatpush.msra.mxu3 %v2820_v29  ;;  %v3857_v16 = vld [vmem:[#allocation26_spill] sm:$0xff]  ;;  %s3553_s16 = scalar_lea.vmem [#allocation2], %s2122_s7  ;;  %s1359_s7 = sshra.s32 %s2099_s12, 3 }
 0x166   : > { %1149 = vmatpush.msrb.mxu1 %v2858_v37  ;;  %v1213_v37 = vstv %s3270_s21 }
 0x167   : > { %1240 = vmatpush.msrb.mxu2 %v2769_v17  ;;  %1260 = vmatpush.msra.mxu3 %v2832_v32  ;;  %v3858_v17 = vld [vmem:[#allocation23_spill] sm:$0xff] }
 0x168   : > { %1150 = vmatpush.msrb.mxu1 %v2893_v45 }
 0x169   : > { %1241 = vmatpush.msrb.mxu2 %v2784_v21  ;;  %1261 = vmatpush.msra.mxu3 %v2845_v34 }
 0x16a   : > { %1151 = vmatpush.msrb.mxu1 %v2903_v47 }
 0x16b   : > { %1242 = vmatpush.msrb.mxu2 %v2793_v23  ;;  %1262 = vmatpush.msra.mxu3 %v2864_v39 }
 0x16c   : > { %1152 = vmatpush.msrb.mxu1 %v2912_v49 }
 0x16d   : > { %1243 = vmatpush.msrb.mxu2 %v2807_v26  ;;  %1263 = vmatpush.msra.mxu3 %v2877_v42 }
 0x16e   : > { %1153 = vmatpush.msrb.mxu1 %v2930_v52 }
 0x16f   : > { %1244 = vmatpush.msrb.mxu2 %v2816_v28  ;;  %1264 = vmatpush.msra.mxu3 %v2890_v44 }
 0x170   : > { %1154 = vmatpush.msrb.mxu1 %v2940_v53 }
 0x171   : > { %1245 = vmatpush.msrb.mxu2 %v2829_v31  ;;  %1265 = vmatpush.msra.mxu3 %v2906_v48  ;;  %v1082_v31 = vstv %s3266_s17 }
 0x172   : > { %1155 = vmatpush.msrb.mxu1 %v2952_v56 }
 0x173   : > { %1246 = vmatpush.msrb.mxu2 %v2839_v33  ;;  %1266 = vmatpush.msra.mxu3 %v2958_v60  ;;  %v3860_v33 = vld [vmem:[#allocation24_spill] sm:$0xff] }
 0x174   : > { %1156 = vmatpush.msrb.mxu1 %v2967_v62  ;;  %vm1083_vm13 = vcmp.lt.s32.totalorder %v1082_v31, %v3860_v33  ;;  %vm1214_vm14 = vcmp.lt.s32.totalorder %v1213_v37, %v3860_v33  ;;  %vm1735_vm3 = vcmp.lt.s32.totalorder %v1734_v59, %v3860_v33  ;;  %v3304_v31 = vld [vmem:[%s2729_s23 + $0x160] sm:$0xff]  ;;  %v3312_v33 = vld [vmem:[%s2729_s23 + $0x158] sm:$0xff] }
 0x175   : > { %1247 = vmatpush.msrb.mxu2 %v2852_v36  ;;  %1267 = vmatpush.msra.mxu3 %v2971_v63  ;;  %v1084_v36 = vsel %vm1083_vm13, 1, %v3861_v35  ;;  %v1215_v43 = vsel %vm1214_vm14, 1, %v3861_v35  ;;  %v1736_v55 = vsel %vm1735_vm3, 1, %v3861_v35  ;;  %v3324_v37 = vld [vmem:[%s2729_s23 + $0x140] sm:$0xff] }
 0x176   : > { %1157 = vmatpush.msrb.mxu1 %v2978_v0  ;;  %1086 = vperm.xlu1 %2205, %v1084_v36   ;;  %v3320_v36 = vld [vmem:[%s2729_s23 + $0x138] sm:$0xff]  ;;  %v3366_v59 = vld [vmem:[%s2729_s23 + $0xe0] sm:$0xff] }
 0x177   : > { %1248 = vmatpush.msrb.mxu2 %v2861_v38  ;;  %1268 = vmatpush.msra.mxu3 %v2994_v3 }
 0x178   : > { %1158 = vmatpush.msrb.mxu1 %v2989_v1 }
 0x179   : > { %1249 = vmatpush.msrb.mxu2 %v2874_v41  ;;  %1269 = vmatpush.msra.mxu3 %v3009_v7 }
 0x17a   : > { %1159 = vmatpush.msrb.mxu1 %v3854_v9 }
 0x17b   : > { %1250 = vmatpush.msrb.mxu2 %v3855_v11  ;;  %1270 = vmatpush.msra.mxu3 %v3856_v15 }
 0x17c   : > { %1160 = vmatpush.msrb.mxu1 %v3857_v16 }
 0x17d   : > { %1251 = vmatpush.msrb.mxu2 %v3858_v17  ;;  %1271 = vmatpush.msra.mxu3 %v3859_v18 }
 0x17e   : > { %1217 = vperm.xlu1 %2205, %v1215_v43   ;;  %v3344_v43 = vld [vmem:[%s2729_s23 + $0x108] sm:$0xff] }
 0x186   : > { %1738 = vperm.xlu1 %2205, %v1736_v55  }
 0x1da   : > { %v860_v21 = vpop.f32.mrf.mxu1 }
 0x1db   : > { %v903_v22 = vadd.f32 %v860_v21, %v840_v19 }
 0x1dd   : > { %v2081_v23 = vmul.f32 -1.442695, %v903_v22 }
 0x1df   : > { %2218 = vpow2.f32 %v2081_v23 }
 0x1e0   : > { %v880_v25 = vpop.f32.mrf.mxu2 }
 0x1e1   : > { %v923_v26 = vadd.f32 %v880_v25, %v841_v24  ;;  %v900_v44 = vpop.f32.mrf.mxu3  ;;  %v956_v24 = vpop.permute.xlu0 %955 }
 0x1e2   : > { %v943_v6 = vadd.f32 %v3194_v46, %v900_v44  ;;  %vm957_vm8 = vcmp.eq.s32.totalorder %v956_v24, 1  ;;  %v3348_v44 = vld [vmem:[%s2729_s23 + $0x110] sm:$0xff] }
 0x1e3   : > { %v2082_v27 = vmul.f32 -1.442695, %v923_v26 }
 0x1e5   : > { %v2219_v28 = vpop.eup %2218  ;;  %2220 = vpow2.f32 %v2082_v27 }
 0x1e6   : > { %v907_v29 = vadd.f32 1.0, %v2219_v28  ;;  %v3292_v28 = vld [vmem:[%s2729_s23 + $0x178] sm:$0xff] }
 0x1e8   : > { %2222 = vrcp.f32 %v907_v29  ;;  %v919_v42 = vand.u32 2147483648, %v907_v29  ;;  %v917_v4 = vand.u32 2147483647, %v907_v29  ;;  %vm913_vm0 = vweird.f32 %v907_v29 }
 0x1ea   : > { %v920_v5 = vor.u32 1.1754944e-38, %v919_v42  ;;  %vm918_vm2 = vcmp.eq.f32.partialorder %v917_v4, 8.507059e+37  ;;  %v3340_v42 = vld [vmem:[%s2729_s23 + $0x118] sm:$0xff] }
 0x1eb   : > { %v2221_v32 = vpop.eup %2220  ;;  %v3357_v4 = vld [vmem:[%s2729_s23 + $0xf8] sm:$0xff] }
 0x1ec   : > { %v927_v34 = vadd.f32 1.0, %v2221_v32  ;;  %v3308_v32 = vld [vmem:[%s2729_s23 + $0x150] sm:$0xff] }
 0x1ee   : > { %v2223_v38 = vpop.eup %2222  ;;  %2224 = vrcp.f32 %v927_v34  ;;  %v939_v12 = vand.u32 2147483648, %v927_v34  ;;  %v937_v30 = vand.u32 2147483647, %v927_v34  ;;  %vm933_vm5 = vweird.f32 %v927_v34 }
 0x1ef   : > { %v909_v39 = vmul.f32 %v2223_v38, %v907_v29  ;;  %vm914_vm15 = vweird.f32 %v2223_v38  ;;  %v3296_v29 = vld [vmem:[%s2729_s23 + $0x168] sm:$0xff] }
 0x1f0   : > { %vm915_vm1 = vmor %vm913_vm0, %vm914_vm15  ;;  %v940_v11 = vor.u32 1.1754944e-38, %v939_v12  ;;  %vm938_vm7 = vcmp.eq.f32.partialorder %v937_v30, 8.507059e+37 }
 0x1f1   : > { %v910_v41 = vsub.f32 1.0, %v909_v39  ;;  %v3332_v39 = vld [vmem:[%s2729_s23 + $0x120] sm:$0xff] }
 0x1f3   : > { %v911_v48 = vmul.f32 %v2223_v38, %v910_v41  ;;  %v3336_v41 = vld [vmem:[%s2729_s23 + $0x128] sm:$0xff] }
 0x1f4   : > { %v2225_v10 = vpop.eup %2224 }
 0x1f5   : > { %v929_v50 = vmul.f32 %v2225_v10, %v927_v34  ;;  %v912_v2 = vadd.f32 %v2223_v38, %v911_v48  ;;  %vm934_vm4 = vweird.f32 %v2225_v10  ;;  %v3316_v34 = vld [vmem:[%s2729_s23 + $0x148] sm:$0xff]  ;;  %v3353_v48 = vld [vmem:[%s2729_s23 + $0xf0] sm:$0xff] }
 0x1f6   : > { %vm935_vm6 = vmor %vm933_vm5, %vm934_vm4 }
 0x1f7   : > { %v930_v20 = vsub.f32 1.0, %v929_v50  ;;  %v916_v54 = vsel %vm915_vm1, %v2223_v38, %v912_v2  ;;  %v3328_v38 = vld [vmem:[%s2729_s23 + $0x130] sm:$0xff]  ;;  %v3375_v50 = vld [vmem:[%s2729_s23 + $0xc8] sm:$0xff] }
 0x1f8   : > { %v921_v13 = vsel %vm918_vm2, %v920_v5, %v916_v54  ;;  %v3384_v2 = vld [vmem:[%s2729_s23 + $0xb0] sm:$0xff]  ;;  %v3393_v5 = vld [vmem:[%s2729_s23 + $0x98] sm:$0xff] }
 0x1f9   : > { %v931_v57 = vmul.f32 %v2225_v10, %v930_v20  ;;  %v944_v51 = vmul.f32 %v943_v6, %v921_v13 }
 0x1fb   : > { %v945_v58 = vadd.f32 %v944_v51, %v842_v14  ;;  %v932_v61 = vadd.f32 %v2225_v10, %v931_v57 }
 0x1fd   : > { %2226 = vtanh.f32 %v945_v58  ;;  %v936_v40 = vsel %vm935_vm6, %v2225_v10, %v932_v61  ;;  %v3362_v10 = vld [vmem:[%s2729_s23 + $0xd8] sm:$0xff] }
 0x1fe   : > { %v941_v17 = vsel %vm938_vm7, %v940_v11, %v936_v40 }
 0x1ff   : > { %v947_v19 = vsub.f32 1.0, %v941_v17  ;;  %v949_v23 = vmul.f32 %v941_v17, %v3204_v8 }
 0x203   : > { %v2227_v21 = vpop.eup %2226 }
 0x204   : > { %v948_v22 = vmul.f32 %v2227_v21, %v947_v19 }
 0x206   : > { %v950_v25 = vadd.f32 %v949_v23, %v948_v22 }
 0x208   : > { %v958_v26 = vsel %vm957_vm8, %v950_v25, 0.0  ;;  %v3286_v27 = vsel %vm957_vm8, %v950_v25, %v3204_v8  ;;  %v3300_v8 = vld [vmem:[%s2729_s23 + $0x170] sm:$0xff] }
 0x209   : > { %960 = vst [vmem:[%s959_s18] sm:$0xff] %v958_v26  ;;  %990 = vmatmul.f32.vlgmr.msra.gmra.mxu0 %v3286_v27  ;;  %1010 = vmatmul.f32.vlgmr.msra.gmra.mxu1 %v3286_v27  ;;  %s1617_s18 = smul.u32 56, %s2923_s27 }
 0x20a   : > { %1030 = vmatmul.f32.vlgmr.msra.gmra.mxu2 %v3286_v27  ;;  %1276 = vmatpush.msra.mxu0 %v3292_v28 }
 0x20b   : > { %1367 = vmatpush.msra.mxu1 %v3296_v29  ;;  %1387 = vmatpush.msra.mxu2 %v3300_v8 }
 0x20c   : > { %1277 = vmatpush.msra.mxu0 %v3304_v31 }
 0x20d   : > { %1368 = vmatpush.msra.mxu1 %v3308_v32  ;;  %1388 = vmatpush.msra.mxu2 %v3312_v33 }
 0x20e   : > { %1278 = vmatpush.msra.mxu0 %v3316_v34 }
 0x20f   : > { %1369 = vmatpush.msra.mxu1 %v3320_v36  ;;  %1389 = vmatpush.msra.mxu2 %v3324_v37 }
 0x210   : > { %1279 = vmatpush.msra.mxu0 %v3328_v38 }
 0x211   : > { %1370 = vmatpush.msra.mxu1 %v3332_v39  ;;  %1390 = vmatpush.msra.mxu2 %v3336_v41 }
 0x212   : > { %1280 = vmatpush.msra.mxu0 %v3340_v42 }
 0x213   : > { %1371 = vmatpush.msra.mxu1 %v3344_v43  ;;  %1391 = vmatpush.msra.mxu2 %v3348_v44 }
 0x214   : > { %1281 = vmatpush.msra.mxu0 %v2893_v45  ;;  %v3371_v45 = vld [vmem:[%s2729_s23 + $0xc0] sm:$0xff] }
 0x215   : > { %1372 = vmatpush.msra.mxu1 %v3353_v48  ;;  %1392 = vmatpush.msra.mxu2 %v3357_v4 }
 0x216   : > { %1282 = vmatpush.msra.mxu0 %v2903_v47  ;;  %v3380_v47 = vld [vmem:[%s2729_s23 + $0xa8] sm:$0xff] }
 0x217   : > { %1373 = vmatpush.msra.mxu1 %v3362_v10  ;;  %1393 = vmatpush.msra.mxu2 %v3366_v59 }
 0x218   : > { %1283 = vmatpush.msra.mxu0 %v2912_v49  ;;  %v3389_v49 = vld [vmem:[%s2729_s23 + $0x90] sm:$0xff] }
 0x219   : > { %1374 = vmatpush.msra.mxu1 %v3371_v45  ;;  %1394 = vmatpush.msra.mxu2 %v3375_v50 }
 0x21a   : > { %1284 = vmatpush.msra.mxu0 %v2930_v52  ;;  %v3398_v52 = vld [vmem:[%s2729_s23 + $0x78] sm:$0xff] }
 0x21b   : > { %1375 = vmatpush.msra.mxu1 %v3380_v47  ;;  %1395 = vmatpush.msra.mxu2 %v3384_v2 }
 0x21c   : > { %1285 = vmatpush.msra.mxu0 %v2940_v53  ;;  %v3404_v53 = vld [vmem:[%s2729_s23 + $0x60] sm:$0xff] }
 0x21d   : > { %1376 = vmatpush.msra.mxu1 %v3389_v49  ;;  %1396 = vmatpush.msra.mxu2 %v3393_v5 }
 0x21e   : > { %1286 = vmatpush.msra.mxu0 %v2952_v56  ;;  %v3410_v56 = vld [vmem:[%s2729_s23 + $0x48] sm:$0xff] }
 0x21f   : > { %1377 = vmatpush.msra.mxu1 %v3398_v52  ;;  %1397 = vmatpush.msra.mxu2 %v2958_v60  ;;  %v3416_v60 = vld [vmem:[%s2729_s23 + $0x30] sm:$0xff] }
 0x220   : > { %1287 = vmatpush.msra.mxu0 %v2967_v62  ;;  %v3422_v62 = vld [vmem:[%s2729_s23 + $0x18] sm:$0xff] }
 0x221   : > { %1378 = vmatpush.msra.mxu1 %v3404_v53  ;;  %1398 = vmatpush.msra.mxu2 %v2971_v63  ;;  %3862 = vst [vmem:[#allocation25_spill] sm:$0xff] %v3422_v62  ;;  %v3428_v63 = vld [vmem:[%s2729_s23] sm:$0xff] }
 0x222   : > { %1288 = vmatpush.msra.mxu0 %v2978_v0  ;;  %3863 = vst [vmem:[#allocation22_spill] sm:$0xff] %v3428_v63  ;;  %v971_v0 = vld [vmem:[%s3435_s24] sm:$0xff] }
 0x223   : > { %1379 = vmatpush.msra.mxu1 %v3410_v56  ;;  %1399 = vmatpush.msra.mxu2 %v2994_v3  ;;  %v972_v3 = vld [vmem:[%s3435_s24 + $0x8] sm:$0xff] }
 0x224   : > { %1289 = vmatpush.msra.mxu0 %v2989_v1 }
 0x225   : > { %1380 = vmatpush.msra.mxu1 %v3416_v60  ;;  %1400 = vmatpush.msra.mxu2 %v3009_v7 }
 0x226   : > { %1290 = vmatpush.msra.mxu0 %v3854_v9 }
 0x227   : > { %1381 = vmatpush.msra.mxu1 %v3422_v62  ;;  %1401 = vmatpush.msra.mxu2 %v3856_v15 }
 0x228   : > { %1291 = vmatpush.msra.mxu0 %v3857_v16 }
 0x229   : > { %1382 = vmatpush.msra.mxu1 %v3428_v63  ;;  %1402 = vmatpush.msra.mxu2 %v3859_v18 }
 0x286   : > { %v991_v1 = vpop.f32.mrf.mxu0  ;;  %v1011_v7 = vpop.f32.mrf.mxu1 }
 0x287   : > { %v1034_v9 = vadd.f32 %v991_v1, %v971_v0  ;;  %v1054_v15 = vadd.f32 %v1011_v7, %v972_v3  ;;  %v973_v1 = vld [vmem:[%s3435_s24 + $0x10] sm:$0xff] }
 0x289   : > { %v2086_v16 = vmul.f32 -1.442695, %v1034_v9  ;;  %v2087_v6 = vmul.f32 -1.442695, %v1054_v15 }
 0x28b   : > { %2228 = vpow2.f32 %v2086_v16 }
 0x28c   : > { %2230 = vpow2.f32 %v2087_v6 }
 0x28d   : > { %v1031_v11 = vpop.f32.mrf.mxu2 }
 0x28e   : > { %v1074_v23 = vadd.f32 %v3194_v46, %v1031_v11  ;;  %v3506_v11 = vld [vmem:[%s2729_s23 + $0x70] sm:$0xff] }
 0x291   : > { %v2229_v20 = vpop.eup %2228 }
 0x292   : > { %v2231_v18 = vpop.eup %2230  ;;  %v1038_v54 = vadd.f32 1.0, %v2229_v20 }
 0x293   : > { %v1058_v13 = vadd.f32 1.0, %v2231_v18  ;;  %v1087_v18 = vpop.permute.xlu1 %1086 }
 0x294   : > { %2232 = vrcp.f32 %v1038_v54  ;;  %v1050_v58 = vand.u32 2147483648, %v1038_v54  ;;  %v1048_v40 = vand.u32 2147483647, %v1038_v54  ;;  %vm1044_vm10 = vweird.f32 %v1038_v54 }
 0x295   : > { %2234 = vrcp.f32 %v1058_v13  ;;  %v1070_v0 = vand.u32 2147483648, %v1058_v13  ;;  %vm1064_vm14 = vweird.f32 %v1058_v13  ;;  %v1068_v3 = vand.u32 2147483647, %v1058_v13 }
 0x296   : > { %v1051_v21 = vor.u32 1.1754944e-38, %v1050_v58  ;;  %vm1049_vm12 = vcmp.eq.f32.partialorder %v1048_v40, 8.507059e+37  ;;  %vm1088_vm1 = vcmp.eq.s32.totalorder %v1087_v18, 1  ;;  %v3491_v58 = vld [vmem:[%s2729_s23 + $0xa0] sm:$0xff] }
 0x297   : > { %v1071_v15 = vor.u32 1.1754944e-38, %v1070_v0  ;;  %vm1069_vm0 = vcmp.eq.f32.partialorder %v1068_v3, 8.507059e+37  ;;  %v3502_v40 = vld [vmem:[%s2729_s23 + $0x80] sm:$0xff]  ;;  %v3547_v0 = vld [vmem:[%s2729_s23 + $0x8] sm:$0xff] }
 0x298   : > { %3868 = vst [vmem:[#allocation24_spill] sm:$0xff] %v3547_v0 }
 0x29a   : > { %v2233_v57 = vpop.eup %2232 }
 0x29b   : > { %v2235_v12 = vpop.eup %2234  ;;  %v1040_v51 = vmul.f32 %v2233_v57, %v1038_v54  ;;  %vm1045_vm9 = vweird.f32 %v2233_v57 }
 0x29c   : > { %v1060_v14 = vmul.f32 %v2235_v12, %v1058_v13  ;;  %vm1046_vm11 = vmor %vm1044_vm10, %vm1045_vm9  ;;  %vm1065_vm13 = vweird.f32 %v2235_v12 }
 0x29d   : > { %v1041_v30 = vsub.f32 1.0, %v1040_v51  ;;  %vm1066_vm15 = vmor %vm1064_vm14, %vm1065_vm13 }
 0x29e   : > { %v1061_v55 = vsub.f32 1.0, %v1060_v14 }
 0x29f   : > { %v1042_v61 = vmul.f32 %v2233_v57, %v1041_v30  ;;  %v3479_v30 = vld [vmem:[%s2729_s23 + $0xd0] sm:$0xff] }
 0x2a0   : > { %v1062_v17 = vmul.f32 %v2235_v12, %v1061_v55  ;;  %v3485_v55 = vld [vmem:[%s2729_s23 + $0xb8] sm:$0xff] }
 0x2a1   : > { %v1043_v19 = vadd.f32 %v2233_v57, %v1042_v61  ;;  %v3497_v61 = vld [vmem:[%s2729_s23 + $0x88] sm:$0xff] }
 0x2a2   : > { %v1063_v25 = vadd.f32 %v2235_v12, %v1062_v17  ;;  %v3511_v17 = vld [vmem:[%s2729_s23 + $0x68] sm:$0xff] }
 0x2a3   : > { %v1047_v22 = vsel %vm1046_vm11, %v2233_v57, %v1043_v19  ;;  %v3515_v19 = vld [vmem:[%s2729_s23 + $0x58] sm:$0xff] }
 0x2a4   : > { %v1052_v24 = vsel %vm1049_vm12, %v1051_v21, %v1047_v22  ;;  %v1067_v9 = vsel %vm1066_vm15, %v2235_v12, %v1063_v25  ;;  %v3473_v12 = vld [vmem:[%s2729_s23 + $0xe8] sm:$0xff]  ;;  %v3520_v21 = vld [vmem:[%s2729_s23 + $0x50] sm:$0xff]  ;;  %v3524_v22 = vld [vmem:[%s2729_s23 + $0x40] sm:$0xff] }
 0x2a5   : > { %v1075_v26 = vmul.f32 %v1074_v23, %v1052_v24  ;;  %v1072_v16 = vsel %vm1069_vm0, %v1071_v15, %v1067_v9  ;;  %v3529_v23 = vld [vmem:[%s2729_s23 + $0x38] sm:$0xff]  ;;  %v3533_v24 = vld [vmem:[%s2729_s23 + $0x28] sm:$0xff]  ;;  %v3538_v25 = vld [vmem:[%s2729_s23 + $0x20] sm:$0xff] }
 0x2a6   : > { %v1078_v6 = vsub.f32 1.0, %v1072_v16  ;;  %v1080_v57 = vmul.f32 %v1072_v16, %v3286_v27  ;;  %3864 = vst [vmem:[#allocation27_spill] sm:$0xff] %v3529_v23  ;;  %v1102_v15 = vld [vmem:[%s3553_s16] sm:$0xff] }
 0x2a7   : > { %v1076_v7 = vadd.f32 %v1075_v26, %v973_v1  ;;  %3865 = vst [vmem:[#allocation26_spill] sm:$0xff] %v3533_v24  ;;  %v3542_v26 = vld [vmem:[%s2729_s23 + $0x10] sm:$0xff]  ;;  %v1103_v1 = vld [vmem:[%s3553_s16 + $0x8] sm:$0xff] }
 0x2a8   : > { %3866 = vst [vmem:[#allocation23_spill] sm:$0xff] %v3538_v25 }
 0x2a9   : > { %2236 = vtanh.f32 %v1076_v7  ;;  %3867 = vst [vmem:[#allocation28_spill] sm:$0xff] %v3542_v26 }
 0x2af   : > { %v2237_v20 = vpop.eup %2236 }
 0x2b0   : > { %v1079_v54 = vmul.f32 %v2237_v20, %v1078_v6 }
 0x2b2   : > { %v1081_v51 = vadd.f32 %v1080_v57, %v1079_v54 }
 0x2b4   : > { %v1089_v14 = vsel %vm1088_vm1, %v1081_v51, 0.0  ;;  %v3446_v13 = vsel %vm1088_vm1, %v1081_v51, %v3286_v27  ;;  %v3467_v27 = vld [vmem:[%s2729_s23 + $0x100] sm:$0xff]  ;;  %s1225_s23 = smul.u32 3, %s2606_s9 }
 0x2b5   : > { %1091 = vst [vmem:[%s1090_s25] sm:$0xff] %v1089_v14  ;;  %1121 = vmatmul.f32.vlgmr.msrb.gmra.mxu3 %v3446_v13  ;;  %1141 = vmatmul.f32.vlgmr.msrb.gmra.mxu0 %v3446_v13 }
 0x2b6   : > { %1161 = vmatmul.f32.vlgmr.msrb.gmra.mxu1 %v3446_v13  ;;  %1407 = vmatpush.msrb.mxu3 %v3292_v28  ;;  %s3561_s17 = sadd.s32 %s2093_s11, %s1225_s23  ;;  %s2103_s11 = sshll.u32 %s2984_s13, 3 }
 0x2b7   : > { %1497 = vmatpush.msrb.mxu0 %v3296_v29  ;;  %1517 = vmatpush.msrb.mxu1 %v3300_v8  ;;  %s2094_s21 = sshll.u32 %s3561_s17, 3  ;;  %s1489_s3 = sshra.s32 %s2103_s11, 3 }
 0x2b8   : > { %1408 = vmatpush.msrb.mxu3 %v3304_v31  ;;  %s1228_s19 = sshra.s32 %s2094_s21, 3  ;;  %s1352_s10 = scalar_lea.vmem %s3199_s15, %s2094_s21 [#allocation9] }
 0x2b9   : > { %1498 = vmatpush.msrb.mxu0 %v3308_v32  ;;  %1518 = vmatpush.msrb.mxu1 %v3312_v33  ;;  %s2123_s24 = smul.u32 24, %s1228_s19  ;;  %s1613_s29 = scalar_lea.vmem %s3199_s15, %s2103_s11 [#allocation9] }
 0x2ba   : > { %1409 = vmatpush.msrb.mxu3 %v3316_v34  ;;  %s2125_s8 = smul.u32 24, %s1489_s3  ;;  %s1784_s3 = scalar_lea.sflag [#allocation5], %s2717_s26 }
 0x2bb   : > { %1499 = vmatpush.msrb.mxu0 %v3320_v36  ;;  %1519 = vmatpush.msrb.mxu1 %v3324_v37  ;;  %s3635_s25 = scalar_lea.vmem [#allocation2], %s2123_s24  ;;  %s1743_s24 = scalar_lea.vmem %s3199_s15, %s1617_s18 [#allocation9] }
 0x2bc   : > { %1410 = vmatpush.msrb.mxu3 %v3328_v38 }
 0x2bd   : > { %1500 = vmatpush.msrb.mxu0 %v3332_v39  ;;  %1520 = vmatpush.msrb.mxu1 %v3336_v41 }
 0x2be   : > { %1411 = vmatpush.msrb.mxu3 %v3340_v42 }
 0x2bf   : > { %1501 = vmatpush.msrb.mxu0 %v3344_v43  ;;  %1521 = vmatpush.msrb.mxu1 %v3348_v44 }
 0x2c0   : > { %1412 = vmatpush.msrb.mxu3 %v3467_v27 }
 0x2c1   : > { %1502 = vmatpush.msrb.mxu0 %v3353_v48  ;;  %1522 = vmatpush.msrb.mxu1 %v3357_v4 }
 0x2c2   : > { %1413 = vmatpush.msrb.mxu3 %v3473_v12 }
 0x2c3   : > { %1503 = vmatpush.msrb.mxu0 %v3362_v10  ;;  %1523 = vmatpush.msrb.mxu1 %v3366_v59 }
 0x2c4   : > { %1414 = vmatpush.msrb.mxu3 %v3479_v30 }
 0x2c5   : > { %1504 = vmatpush.msrb.mxu0 %v3371_v45  ;;  %1524 = vmatpush.msrb.mxu1 %v3375_v50 }
 0x2c6   : > { %1415 = vmatpush.msrb.mxu3 %v3485_v55 }
 0x2c7   : > { %1505 = vmatpush.msrb.mxu0 %v3380_v47  ;;  %1525 = vmatpush.msrb.mxu1 %v3384_v2 }
 0x2c8   : > { %1416 = vmatpush.msrb.mxu3 %v3491_v58 }
 0x2c9   : > { %1506 = vmatpush.msrb.mxu0 %v3389_v49  ;;  %1526 = vmatpush.msrb.mxu1 %v3393_v5 }
 0x2ca   : > { %1417 = vmatpush.msrb.mxu3 %v3497_v61 }
 0x2cb   : > { %1507 = vmatpush.msrb.mxu0 %v3398_v52  ;;  %1527 = vmatpush.msrb.mxu1 %v3502_v40 }
 0x2cc   : > { %1418 = vmatpush.msrb.mxu3 %v3506_v11 }
 0x2cd   : > { %1508 = vmatpush.msrb.mxu0 %v3404_v53  ;;  %1528 = vmatpush.msrb.mxu1 %v3511_v17 }
 0x2ce   : > { %1419 = vmatpush.msrb.mxu3 %v3515_v19 }
 0x2cf   : > { %1509 = vmatpush.msrb.mxu0 %v3410_v56  ;;  %1529 = vmatpush.msrb.mxu1 %v3520_v21 }
 0x2d0   : > { %1420 = vmatpush.msrb.mxu3 %v3524_v22 }
 0x2d1   : > { %1510 = vmatpush.msrb.mxu0 %v3416_v60  ;;  %1530 = vmatpush.msrb.mxu1 %v3529_v23 }
 0x2d2   : > { %1421 = vmatpush.msrb.mxu3 %v3533_v24 }
 0x2d3   : > { %1511 = vmatpush.msrb.mxu0 %v3422_v62  ;;  %1531 = vmatpush.msrb.mxu1 %v3538_v25 }
 0x2d4   : > { %1422 = vmatpush.msrb.mxu3 %v3542_v26 }
 0x2d5   : > { %1512 = vmatpush.msrb.mxu0 %v3428_v63  ;;  %1532 = vmatpush.msrb.mxu1 %v3547_v0 }
 0x332   : > { %v1142_v3 = vpop.f32.mrf.mxu0 }
 0x333   : > { %v1185_v7 = vadd.f32 %v1142_v3, %v1103_v1  ;;  %v1344_v1 = vstv %s3561_s17  ;;  %v2336_v3 = vld [vmem:[%s3791_s0] sm:$0xff]  ;;  %v1162_v25 = vpop.f32.mrf.mxu1  ;;  %s3692_s17 = scalar_lea.vmem [#allocation2], %s2125_s8 }
 0x334   : > { %vm1345_vm2 = vcmp.lt.s32.totalorder %v1344_v1, %v2336_v3 }
 0x335   : > { %v2092_v9 = vmul.f32 -1.442695, %v1185_v7 }
 0x337   : > { %2238 = vpow2.f32 %v2092_v9  ;;  %v1346_v9 = vsel %vm1345_vm2, 1, %v3861_v35 }
 0x338   : > { %v1122_v16 = vpop.f32.mrf.mxu3  ;;  %1348 = vperm.xlu2 %2206, %v1346_v9   ;;  %v1205_v9 = vadd.f32 %v3194_v46, %v1162_v25 }
 0x339   : > { %v1165_v6 = vadd.f32 %v1122_v16, %v1102_v15  ;;  %v1475_v15 = vstv %s3567_s20  ;;  %s1618_s20 = sshra.s32 %s1617_s18, 3 }
 0x33a   : > { %vm1476_vm3 = vcmp.lt.s32.totalorder %v1475_v15, %v2336_v3  ;;  %s2126_s21 = smul.u32 24, %s1618_s20 }
 0x33b   : > { %v2091_v20 = vmul.f32 -1.442695, %v1165_v6  ;;  %v1477_v0 = vsel %vm1476_vm3, 1, %v3861_v35 }
 0x33c   : > { %s3716_s19 = scalar_lea.vmem [#allocation2], %s2126_s21 }
 0x33d   : > { %v2239_v18 = vpop.eup %2238  ;;  %2240 = vpow2.f32 %v2091_v20 }
 0x33e   : > { %v1189_v54 = vadd.f32 1.0, %v2239_v18 }
 0x340   : > { %2242 = vrcp.f32 %v1189_v54  ;;  %1479 = vperm.xlu2 %2206, %v1477_v0   ;;  %v1201_v15 = vand.u32 2147483648, %v1189_v54  ;;  %vm1195_vm9 = vweird.f32 %v1189_v54 }
 0x342   : > { %v1202_v0 = vor.u32 1.1754944e-38, %v1201_v15 }
 0x343   : > { %v2241_v57 = vpop.eup %2240 }
 0x344   : > { %v1169_v51 = vadd.f32 1.0, %v2241_v57 }
 0x346   : > { %2244 = vrcp.f32 %v1169_v51  ;;  %v2243_v14 = vpop.eup %2242  ;;  %v1181_v57 = vand.u32 2147483648, %v1169_v51  ;;  %v1179_v26 = vand.u32 2147483647, %v1169_v51  ;;  %vm1175_vm5 = vweird.f32 %v1169_v51 }
 0x347   : > { %v1191_v7 = vmul.f32 %v2243_v14, %v1189_v54  ;;  %vm1196_vm8 = vweird.f32 %v2243_v14 }
 0x348   : > { %v1182_v24 = vor.u32 1.1754944e-38, %v1181_v57  ;;  %vm1180_vm7 = vcmp.eq.f32.partialorder %v1179_v26, 8.507059e+37  ;;  %vm1197_vm10 = vmor %vm1195_vm9, %vm1196_vm8 }
 0x349   : > { %v1192_v20 = vsub.f32 1.0, %v1191_v7 }
 0x34b   : > { %v1193_v1 = vmul.f32 %v2243_v14, %v1192_v20  ;;  %v1104_v20 = vld [vmem:[%s3553_s16 + $0x10] sm:$0xff]  ;;  %s2124_s16 = smul.u32 24, %s1359_s7 }
 0x34c   : > { %v2245_v16 = vpop.eup %2244 }
 0x34d   : > { %v1171_v6 = vmul.f32 %v2245_v16, %v1169_v51  ;;  %vm1176_vm4 = vweird.f32 %v2245_v16  ;;  %v1194_v7 = vadd.f32 %v2243_v14, %v1193_v1  ;;  %s3670_s23 = scalar_lea.vmem [#allocation2], %s2124_s16 }
 0x34e   : > { %vm1177_vm6 = vmor %vm1175_vm5, %vm1176_vm4 }
 0x34f   : > { %v1172_v18 = vsub.f32 1.0, %v1171_v6  ;;  %v1199_v6 = vand.u32 2147483647, %v1189_v54  ;;  %v1198_v51 = vsel %vm1197_vm10, %v2243_v14, %v1194_v7 }
 0x351   : > { %v1173_v63 = vmul.f32 %v2245_v16, %v1172_v18  ;;  %vm1200_vm11 = vcmp.eq.f32.partialorder %v1199_v6, 8.507059e+37 }
 0x352   : > { %v1203_v18 = vsel %vm1200_vm11, %v1202_v0, %v1198_v51  ;;  %v1235_v51 = vld [vmem:[%s3635_s25 + $0x10] sm:$0xff] }
 0x353   : > { %v1174_v62 = vadd.f32 %v2245_v16, %v1173_v63  ;;  %v1209_v25 = vsub.f32 1.0, %v1203_v18 }
 0x355   : > { %v1178_v23 = vsel %vm1177_vm6, %v2245_v16, %v1174_v62 }
 0x356   : > { %v1183_v3 = vsel %vm1180_vm7, %v1182_v24, %v1178_v23  ;;  %v1211_v23 = vmul.f32 %v1203_v18, %v3446_v13  ;;  %v1218_v24 = vpop.permute.xlu1 %1217 }
 0x357   : > { %v1206_v35 = vmul.f32 %v1205_v9, %v1183_v3  ;;  %vm1219_vm12 = vcmp.eq.s32.totalorder %v1218_v24, 1 }
 0x359   : > { %v1207_v63 = vadd.f32 %v1206_v35, %v1104_v20 }
 0x35b   : > { %2246 = vtanh.f32 %v1207_v63 }
 0x361   : > { %v2247_v62 = vpop.eup %2246 }
 0x362   : > { %v1210_v26 = vmul.f32 %v2247_v62, %v1209_v25 }
 0x364   : > { %v1212_v16 = vadd.f32 %v1211_v23, %v1210_v26 }
 0x366   : > { %v1220_v57 = vsel %vm1219_vm12, %v1212_v16, 0.0  ;;  %v3579_v54 = vsel %vm1219_vm12, %v1212_v16, %v3446_v13 }
 0x367   : > { %1222 = vst [vmem:[%s1221_s14] sm:$0xff] %v1220_v57  ;;  %1252 = vmatmul.f32.vlgmr.msrb.gmra.mxu2 %v3579_v54  ;;  %1272 = vmatmul.f32.vlgmr.msra.gmra.mxu3 %v3579_v54  ;;  %s2045_s14 = sshll.u32 %s2717_s26, 7 }
 0x368   : > { %1292 = vmatmul.f32.vlgmr.msra.gmra.mxu0 %v3579_v54  ;;  %1537 = vmatpush.msrb.mxu2 %v3292_v28  ;;  %s3712_s13 = scalar_lea.vmem [#allocation8], %s2045_s14 }
 0x369   : > { %1626 = vmatpush.msra.mxu3 %v3296_v29  ;;  %1646 = vmatpush.msra.mxu0 %v3300_v8  ;;  %v3869_v29 = vld [vmem:[#allocation27_spill] sm:$0xff]  ;;  %v3870_v8 = vld [vmem:[#allocation26_spill] sm:$0xff] }
 0x36a   : > { %1538 = vmatpush.msrb.mxu2 %v3304_v31 }
 0x36b   : > { %1627 = vmatpush.msra.mxu3 %v3308_v32  ;;  %1647 = vmatpush.msra.mxu0 %v3312_v33  ;;  %v3871_v32 = vld [vmem:[#allocation25_spill] sm:$0xff]  ;;  %v3872_v33 = vld [vmem:[#allocation23_spill] sm:$0xff] }
 0x36c   : > { %1539 = vmatpush.msrb.mxu2 %v3316_v34 }
 0x36d   : > { %1628 = vmatpush.msra.mxu3 %v3320_v36  ;;  %1648 = vmatpush.msra.mxu0 %v3324_v37  ;;  %v3873_v36 = vld [vmem:[#allocation28_spill] sm:$0xff]  ;;  %v3874_v37 = vld [vmem:[#allocation22_spill] sm:$0xff] }
 0x36e   : > { %1540 = vmatpush.msrb.mxu2 %v3328_v38 }
 0x36f   : > { %1629 = vmatpush.msra.mxu3 %v3332_v39  ;;  %1649 = vmatpush.msra.mxu0 %v3336_v41  ;;  %v3875_v39 = vld [vmem:[#allocation24_spill] sm:$0xff] }
 0x370   : > { %1541 = vmatpush.msrb.mxu2 %v3340_v42  ;;  %v1233_v41 = vld [vmem:[%s3635_s25] sm:$0xff] }
 0x371   : > { %1630 = vmatpush.msra.mxu3 %v3344_v43  ;;  %1650 = vmatpush.msra.mxu0 %v3348_v44  ;;  %v1234_v44 = vld [vmem:[%s3635_s25 + $0x8] sm:$0xff] }
 0x372   : > { %1542 = vmatpush.msrb.mxu2 %v3467_v27 }
 0x373   : > { %1631 = vmatpush.msra.mxu3 %v3353_v48  ;;  %1651 = vmatpush.msra.mxu0 %v3357_v4 }
 0x374   : > { %1543 = vmatpush.msrb.mxu2 %v3473_v12 }
 0x375   : > { %1632 = vmatpush.msra.mxu3 %v3362_v10  ;;  %1652 = vmatpush.msra.mxu0 %v3366_v59 }
 0x376   : > { %1544 = vmatpush.msrb.mxu2 %v3479_v30 }
 0x377   : > { %1633 = vmatpush.msra.mxu3 %v3371_v45  ;;  %1653 = vmatpush.msra.mxu0 %v3375_v50 }
 0x378   : > { %1545 = vmatpush.msrb.mxu2 %v3485_v55 }
 0x379   : > { %1634 = vmatpush.msra.mxu3 %v3380_v47  ;;  %1654 = vmatpush.msra.mxu0 %v3384_v2 }
 0x37a   : > { %1546 = vmatpush.msrb.mxu2 %v3491_v58 }
 0x37b   : > { %1635 = vmatpush.msra.mxu3 %v3389_v49  ;;  %1655 = vmatpush.msra.mxu0 %v3393_v5 }
 0x37c   : > { %1547 = vmatpush.msrb.mxu2 %v3497_v61 }
 0x37d   : > { %1636 = vmatpush.msra.mxu3 %v3398_v52  ;;  %1656 = vmatpush.msra.mxu0 %v3502_v40 }
 0x37e   : > { %1548 = vmatpush.msrb.mxu2 %v3506_v11 }
 0x37f   : > { %1637 = vmatpush.msra.mxu3 %v3404_v53  ;;  %1657 = vmatpush.msra.mxu0 %v3511_v17 }
 0x380   : > { %1549 = vmatpush.msrb.mxu2 %v3515_v19 }
 0x381   : > { %1638 = vmatpush.msra.mxu3 %v3410_v56  ;;  %1658 = vmatpush.msra.mxu0 %v3520_v21 }
 0x382   : > { %1550 = vmatpush.msrb.mxu2 %v3524_v22 }
 0x383   : > { %1639 = vmatpush.msra.mxu3 %v3416_v60  ;;  %1659 = vmatpush.msra.mxu0 %v3869_v29 }
 0x384   : > { %1551 = vmatpush.msrb.mxu2 %v3870_v8 }
 0x385   : > { %1640 = vmatpush.msra.mxu3 %v3871_v32  ;;  %1660 = vmatpush.msra.mxu0 %v3872_v33 }
 0x386   : > { %1552 = vmatpush.msrb.mxu2 %v3873_v36 }
 0x387   : > { %1641 = vmatpush.msra.mxu3 %v3874_v37  ;;  %1661 = vmatpush.msra.mxu0 %v3875_v39 }
 0x392   : > { %v1349_v24 = vpop.permute.xlu2 %1348 }
 0x393   : > { %vm1350_vm5 = vcmp.eq.s32.totalorder %v1349_v24, 1 }
 0x3e5   : > { %v1293_v14 = vpop.f32.mrf.mxu0 }
 0x3e6   : > { %v1336_v7 = vadd.f32 %v3194_v46, %v1293_v14  ;;  %v1480_v14 = vpop.permute.xlu2 %1479 }
 0x3ea   : > { %v1253_v43 = vpop.f32.mrf.mxu2  ;;  %v1273_v48 = vpop.f32.mrf.mxu3 }
 0x3eb   : > { %v1296_v4 = vadd.f32 %v1253_v43, %v1233_v41  ;;  %v1316_v10 = vadd.f32 %v1273_v48, %v1234_v44 }
 0x3ed   : > { %v2096_v59 = vmul.f32 -1.442695, %v1296_v4  ;;  %v2097_v45 = vmul.f32 -1.442695, %v1316_v10 }
 0x3ef   : > { %2248 = vpow2.f32 %v2096_v59  ;;  %v3675_v59 = vld [vmem:[%s3124_s22] ss:$0 sm:$0xff]  ;;  %s1483_s22 = scalar_lea.vmem %s3199_s15, %s2099_s12 [#allocation9]  ;;  %s2127_s12 = sshll.u32 %s2606_s9, 6 }
 0x3f0   : > { %2250 = vpow2.f32 %v2097_v45 }
 0x3f5   : > { %v2249_v50 = vpop.eup %2248 }
 0x3f6   : > { %v2251_v47 = vpop.eup %2250  ;;  %v1300_v2 = vadd.f32 1.0, %v2249_v50 }
 0x3f7   : > { %v1320_v49 = vadd.f32 1.0, %v2251_v47 }
 0x3f8   : > { %2252 = vrcp.f32 %v1300_v2  ;;  %v1312_v13 = vand.u32 2147483648, %v1300_v2  ;;  %v1310_v21 = vand.u32 2147483647, %v1300_v2  ;;  %vm1306_vm14 = vweird.f32 %v1300_v2 }
 0x3f9   : > { %2254 = vrcp.f32 %v1320_v49  ;;  %v1332_v20 = vand.u32 2147483648, %v1320_v49  ;;  %vm1326_vm2 = vweird.f32 %v1320_v49  ;;  %v1330_v0 = vand.u32 2147483647, %v1320_v49 }
 0x3fa   : > { %v1313_v3 = vor.u32 1.1754944e-38, %v1312_v13  ;;  %vm1311_vm0 = vcmp.eq.f32.partialorder %v1310_v21, 8.507059e+37 }
 0x3fb   : > { %v1333_v62 = vor.u32 1.1754944e-38, %v1332_v20  ;;  %vm1331_vm4 = vcmp.eq.f32.partialorder %v1330_v0, 8.507059e+37  ;;  %v1495_v20 = vld [vmem:[%s3692_s17 + $0x8] sm:$0xff] }
 0x3fe   : > { %v2253_v5 = vpop.eup %2252 }
 0x3ff   : > { %v2255_v52 = vpop.eup %2254  ;;  %v1302_v53 = vmul.f32 %v2253_v5, %v1300_v2  ;;  %vm1307_vm13 = vweird.f32 %v2253_v5 }
 0x400   : > { %v1322_v56 = vmul.f32 %v2255_v52, %v1320_v49  ;;  %vm1308_vm15 = vmor %vm1306_vm14, %vm1307_vm13  ;;  %vm1327_vm1 = vweird.f32 %v2255_v52  ;;  %vm1481_vm14 = vcmp.eq.s32.totalorder %v1480_v14, 1  ;;  %v1755_v14 = vld [vmem:[%s3712_s13 + $0x48] sm:$0xff] }
 0x401   : > { %v1303_v60 = vsub.f32 1.0, %v1302_v53  ;;  %vm1328_vm3 = vmor %vm1326_vm2, %vm1327_vm1 }
 0x402   : > { %v1323_v40 = vsub.f32 1.0, %v1322_v56 }
 0x403   : > { %v1304_v17 = vmul.f32 %v2253_v5, %v1303_v60 }
 0x404   : > { %v1324_v1 = vmul.f32 %v2255_v52, %v1323_v40 }
 0x405   : > { %v1305_v9 = vadd.f32 %v2253_v5, %v1304_v17 }
 0x406   : > { %v1325_v6 = vadd.f32 %v2255_v52, %v1324_v1 }
 0x407   : > { %v1309_v15 = vsel %vm1308_vm15, %v2253_v5, %v1305_v9 }
 0x408   : > { %v1314_v35 = vsel %vm1311_vm0, %v1313_v3, %v1309_v15  ;;  %v1329_v25 = vsel %vm1328_vm3, %v2255_v52, %v1325_v6  ;;  %v1366_v52 = vld [vmem:[%s3670_s23 + $0x10] sm:$0xff] }
 0x409   : > { %v1337_v63 = vmul.f32 %v1336_v7, %v1314_v35  ;;  %v1334_v26 = vsel %vm1331_vm4, %v1333_v62, %v1329_v25  ;;  %v1494_v35 = vld [vmem:[%s3692_s17] sm:$0xff] }
 0x40a   : > { %v1340_v46 = vsub.f32 1.0, %v1334_v26  ;;  %v1342_v57 = vmul.f32 %v1334_v26, %v3579_v54 }
 0x40b   : > { %v1338_v18 = vadd.f32 %v1337_v63, %v1235_v51 }
 0x40d   : > { %2256 = vtanh.f32 %v1338_v18 }
 0x413   : > { %v2257_v23 = vpop.eup %2256 }
 0x414   : > { %v1341_v16 = vmul.f32 %v2257_v23, %v1340_v46 }
 0x416   : > { %v1343_v29 = vadd.f32 %v1342_v57, %v1341_v16 }
 0x418   : > { %v1351_v32 = vsel %vm1350_vm5, %v1343_v29, 0.0  ;;  %v3646_v33 = vsel %vm1350_vm5, %v1343_v29, %v3579_v54 }
 0x419   : > { %1353 = vst [vmem:[%s1352_s10] sm:$0xff] %v1351_v32  ;;  %1383 = vmatmul.f32.vlgmr.msra.gmra.mxu1 %v3646_v33  ;;  %1403 = vmatmul.f32.vlgmr.msra.gmra.mxu2 %v3646_v33  ;;  %s1801_s10 = sshll.u32 %s3199_s15, 4  ;;  %s1802_s10 = int_to_ptr.vmem [resolvable:$true] %s1801_s10 }
 0x41a   : > { %1423 = vmatmul.f32.vlgmr.msrb.gmra.mxu3 %v3646_v33  ;;  %1666 = vmatpush.msra.mxu1 %v3292_v28  ;;  %v1364_v28 = vld [vmem:[%s3670_s23] sm:$0xff] }
 0x41c   : > { %1667 = vmatpush.msra.mxu1 %v3304_v31 }
 0x41e   : > { %1668 = vmatpush.msra.mxu1 %v3316_v34 }
 0x420   : > { %1669 = vmatpush.msra.mxu1 %v3328_v38 }
 0x422   : > { %1670 = vmatpush.msra.mxu1 %v3340_v42  ;;  %v1365_v42 = vld [vmem:[%s3670_s23 + $0x8] sm:$0xff]  ;;  %s3877_s23 = sld [smem:[#allocation30_spill]] }
 0x424   : > { %1671 = vmatpush.msra.mxu1 %v3467_v27 }
 0x426   : > { %1672 = vmatpush.msra.mxu1 %v3473_v12 }
 0x428   : > { %1673 = vmatpush.msra.mxu1 %v3479_v30  ;;  %s2448_s15 = scalar_lea.hbm %s3877_s23, 128 }
 0x42a   : > { %1674 = vmatpush.msra.mxu1 %v3485_v55 }
 0x42c   : > { %1675 = vmatpush.msra.mxu1 %v3491_v58 }
 0x42e   : > { %1676 = vmatpush.msra.mxu1 %v3497_v61 }
 0x430   : > { %1677 = vmatpush.msra.mxu1 %v3506_v11 }
 0x432   : > { %1678 = vmatpush.msra.mxu1 %v3515_v19 }
 0x434   : > { %1679 = vmatpush.msra.mxu1 %v3524_v22 }
 0x436   : > { %1680 = vmatpush.msra.mxu1 %v3870_v8 }
 0x438   : > { %1681 = vmatpush.msra.mxu1 %v3873_v36 }
 0x496   : > { %v1384_v31 = vpop.f32.mrf.mxu1 }
 0x497   : > { %v1427_v34 = vadd.f32 %v1384_v31, %v1364_v28 }
 0x499   : > { %v2101_v38 = vmul.f32 -1.442695, %v1427_v34 }
 0x49b   : > { %2258 = vpow2.f32 %v2101_v38 }
 0x49c   : > { %v1404_v27 = vpop.f32.mrf.mxu2 }
 0x49d   : > { %v1447_v12 = vadd.f32 %v1404_v27, %v1365_v42  ;;  %v1424_v41 = vpop.f32.mrf.mxu3 }
 0x49e   : > { %v1467_v45 = vadd.f32 %v3675_v59, %v1424_v41 }
 0x49f   : > { %v2102_v30 = vmul.f32 -1.442695, %v1447_v12 }
 0x4a1   : > { %v2259_v55 = vpop.eup %2258  ;;  %2260 = vpow2.f32 %v2102_v30 }
 0x4a2   : > { %v1431_v58 = vadd.f32 1.0, %v2259_v55 }
 0x4a4   : > { %2262 = vrcp.f32 %v1431_v58  ;;  %v1443_v8 = vand.u32 2147483648, %v1431_v58  ;;  %v1441_v37 = vand.u32 2147483647, %v1431_v58  ;;  %vm1437_vm7 = vweird.f32 %v1431_v58 }
 0x4a6   : > { %v1444_v48 = vor.u32 1.1754944e-38, %v1443_v8  ;;  %vm1442_vm9 = vcmp.eq.f32.partialorder %v1441_v37, 8.507059e+37 }
 0x4a7   : > { %v2261_v61 = vpop.eup %2260 }
 0x4a8   : > { %v1451_v11 = vadd.f32 1.0, %v2261_v61 }
 0x4aa   : > { %v2263_v19 = vpop.eup %2262  ;;  %2264 = vrcp.f32 %v1451_v11  ;;  %v1463_v2 = vand.u32 2147483648, %v1451_v11  ;;  %v1461_v5 = vand.u32 2147483647, %v1451_v11  ;;  %vm1457_vm11 = vweird.f32 %v1451_v11 }
 0x4ab   : > { %v1433_v22 = vmul.f32 %v2263_v19, %v1431_v58  ;;  %vm1438_vm6 = vweird.f32 %v2263_v19 }
 0x4ac   : > { %vm1439_vm8 = vmor %vm1437_vm7, %vm1438_vm6  ;;  %v1464_v60 = vor.u32 1.1754944e-38, %v1463_v2  ;;  %vm1462_vm13 = vcmp.eq.f32.partialorder %v1461_v5, 8.507059e+37  ;;  %v1760_v2 = vld [vmem:[%s3712_s13 + $0x70] sm:$0xff] }
 0x4ad   : > { %v1434_v54 = vsub.f32 1.0, %v1433_v22 }
 0x4af   : > { %v1435_v36 = vmul.f32 %v2263_v19, %v1434_v54  ;;  %v1496_v54 = vld [vmem:[%s3692_s17 + $0x10] sm:$0xff] }
 0x4b0   : > { %v2265_v39 = vpop.eup %2264 }
 0x4b1   : > { %v1453_v43 = vmul.f32 %v2265_v39, %v1451_v11  ;;  %v1436_v44 = vadd.f32 %v2263_v19, %v1435_v36  ;;  %vm1458_vm10 = vweird.f32 %v2265_v39 }
 0x4b2   : > { %vm1459_vm12 = vmor %vm1457_vm11, %vm1458_vm10 }
 0x4b3   : > { %v1454_v4 = vsub.f32 1.0, %v1453_v43  ;;  %v1440_v10 = vsel %vm1439_vm8, %v2263_v19, %v1436_v44  ;;  %v1610_v44 = vpop.permute.xlu0 %1609 }
 0x4b4   : > { %v1445_v50 = vsel %vm1442_vm9, %v1444_v48, %v1440_v10  ;;  %vm1611_vm7 = vcmp.eq.s32.totalorder %v1610_v44, 1 }
 0x4b5   : > { %v1455_v47 = vmul.f32 %v2265_v39, %v1454_v4  ;;  %v1468_v49 = vmul.f32 %v1467_v45, %v1445_v50 }
 0x4b7   : > { %v1456_v53 = vadd.f32 %v2265_v39, %v1455_v47  ;;  %v1469_v56 = vadd.f32 %v1468_v49, %v1366_v52  ;;  %v1761_v47 = vld [vmem:[%s3712_s13 + $0x78] sm:$0xff]  ;;  %v1624_v49 = vld [vmem:[%s3716_s19 + $0x8] sm:$0xff] }
 0x4b8   : > { %1762 = vmatpush.msra.mxu2 %v1761_v47  ;;  %v1759_v52 = vld [vmem:[%s3712_s13 + $0x68] sm:$0xff] }
 0x4b9   : > { %v1460_v13 = vsel %vm1459_vm12, %v2265_v39, %v1456_v53  ;;  %2266 = vtanh.f32 %v1469_v56  ;;  %v1758_v56 = vld [vmem:[%s3712_s13 + $0x60] sm:$0xff] }
 0x4ba   : > { %v1465_v40 = vsel %vm1462_vm13, %v1464_v60, %v1460_v13  ;;  %1763 = vmatpush.msra.mxu2 %v1760_v2  ;;  %v1757_v13 = vld [vmem:[%s3712_s13 + $0x58] sm:$0xff] }
 0x4bb   : > { %v1471_v17 = vsub.f32 1.0, %v1465_v40  ;;  %v1473_v9 = vmul.f32 %v1465_v40, %v3646_v33  ;;  %v1756_v40 = vld [vmem:[%s3712_s13 + $0x50] sm:$0xff] }
 0x4bc   : > { %1764 = vmatpush.msra.mxu2 %v1759_v52 }
 0x4be   : > { %1765 = vmatpush.msra.mxu2 %v1758_v56 }
 0x4bf   : > { %v2267_v21 = vpop.eup %2266 }
 0x4c0   : > { %v1472_v1 = vmul.f32 %v2267_v21, %v1471_v17  ;;  %1766 = vmatpush.msra.mxu2 %v1757_v13  ;;  %v1623_v17 = vld [vmem:[%s3716_s19] sm:$0xff] }
 0x4c2   : > { %v1474_v3 = vadd.f32 %v1473_v9, %v1472_v1  ;;  %1767 = vmatpush.msra.mxu2 %v1756_v40  ;;  %v1754_v9 = vld [vmem:[%s3712_s13 + $0x40] sm:$0xff] }
 0x4c4   : > { %v1482_v7 = vsel %vm1481_vm14, %v1474_v3, 0.0  ;;  %v3684_v15 = vsel %vm1481_vm14, %v1474_v3, %v3646_v33  ;;  %1768 = vmatpush.msra.mxu2 %v1755_v14 }
 0x4c5   : > { %1484 = vst [vmem:[%s1483_s22] sm:$0xff] %v1482_v7  ;;  %1513 = vmatmul.f32.vlgmr.msrb.gmra.mxu0 %v3684_v15  ;;  %1533 = vmatmul.f32.vlgmr.msrb.gmra.mxu1 %v3684_v15  ;;  %v1753_v7 = vld [vmem:[%s3712_s13 + $0x38] sm:$0xff]  ;;  %s1800_s22 = scalar_lea.hbm %s3877_s23, %s2127_s12 }
 0x4c6   : > { %1553 = vmatmul.f32.vlgmr.msrb.gmra.mxu2 %v3684_v15  ;;  %s1803_s11 = sshll.u32 %s1800_s22, 4  ;;  %s1804_s11 = int_to_ptr.hbm [resolvable:$true] %s1803_s11 }
 0x4c7   : > { %1769 = vmatpush.msra.mxu2 %v1754_v9  ;;  %s2442_s27 = sshra.s32 %s1804_s11, 4  ;;  %s2443_s27 = int_to_ptr.hbm [resolvable:$true] %s2442_s27 }
 0x4c8   : > { %s2444_s8 = scalar_lea.hbm %s2443_s27, 64  ;;  %p2449_p3 = scmp.lt.s32.totalorder %s2443_s27, %s3877_s23 }
 0x4c9   : > { %1770 = vmatpush.msra.mxu2 %v1753_v7  ;;  %p2445_p13 = scmp.ne.s32.totalorder %s2443_s27, %s2444_s8  ;;  %p2450_p5 = scmp.lt.s32.totalorder %s2448_s15, %s2444_s8 }
 0x4cb   : > { %p2446_p2 = pnand %p2445_p13, %p2631_p11  ;;  %p2451_p7 = por %p2450_p5, %p2449_p3 }
 0x4cd   : > { %p2447_p4 = pneg %p2446_p2 }
 0x4cf   : > { %p2452_p8 = pnand %p2451_p7, %p2447_p4 }
 0x542   : > { %v1514_v6 = vpop.f32.mrf.mxu0  ;;  %v1534_v63 = vpop.f32.mrf.mxu1 }
 0x543   : > { %v1557_v51 = vadd.f32 %v1514_v6, %v1494_v35  ;;  %v1577_v0 = vadd.f32 %v1534_v63, %v1495_v20  ;;  %v1752_v6 = vld [vmem:[%s3712_s13 + $0x30] sm:$0xff]  ;;  %v1751_v20 = vld [vmem:[%s3712_s13 + $0x28] sm:$0xff]  ;;  %v1750_v63 = vld [vmem:[%s3712_s13 + $0x20] sm:$0xff] }
 0x544   : > { %1771 = vmatpush.msra.mxu2 %v1752_v6 }
 0x545   : > { %v2105_v18 = vmul.f32 -1.442695, %v1557_v51  ;;  %v2106_v25 = vmul.f32 -1.442695, %v1577_v0 }
 0x546   : > { %1772 = vmatpush.msra.mxu2 %v1751_v20 }
 0x547   : > { %2268 = vpow2.f32 %v2105_v18  ;;  %v1749_v18 = vld [vmem:[%s3712_s13 + $0x18] sm:$0xff] }
 0x548   : > { %2270 = vpow2.f32 %v2106_v25  ;;  %1773 = vmatpush.msra.mxu2 %v1750_v63  ;;  %v1748_v25 = vld [vmem:[%s3712_s13 + $0x10] sm:$0xff] }
 0x549   : > { %v1554_v42 = vpop.f32.mrf.mxu2 }
 0x54a   : > { %v1597_v55 = vadd.f32 %v3675_v59, %v1554_v42  ;;  %1774 = vmatpush.msra.mxu2 %v1749_v18 }
 0x54c   : > { %1775 = vmatpush.msra.mxu2 %v1748_v25 }
 0x54d   : > { %v2269_v62 = vpop.eup %2268 }
 0x54e   : > { %v2271_v26 = vpop.eup %2270  ;;  %v1561_v46 = vadd.f32 1.0, %v2269_v62 }
 0x54f   : > { %v1581_v23 = vadd.f32 1.0, %v2271_v26  ;;  %v1747_v26 = vld [vmem:[%s3712_s13 + $0x8] sm:$0xff] }
 0x550   : > { %2272 = vrcp.f32 %v1561_v46  ;;  %v1573_v28 = vand.u32 2147483648, %v1561_v46  ;;  %v1571_v34 = vand.u32 2147483647, %v1561_v46  ;;  %vm1567_vm0 = vweird.f32 %v1561_v46  ;;  %1776 = vmatpush.msra.mxu2 %v1747_v26 }
 0x551   : > { %2274 = vrcp.f32 %v1581_v23  ;;  %v1593_v11 = vand.u32 2147483648, %v1581_v23  ;;  %vm1587_vm4 = vweird.f32 %v1581_v23  ;;  %v1591_v22 = vand.u32 2147483647, %v1581_v23 }
 0x552   : > { %v1574_v12 = vor.u32 1.1754944e-38, %v1573_v28  ;;  %vm1572_vm2 = vcmp.eq.f32.partialorder %v1571_v34, 8.507059e+37 }
 0x553   : > { %v1594_v37 = vor.u32 1.1754944e-38, %v1593_v11  ;;  %vm1592_vm6 = vcmp.eq.f32.partialorder %v1591_v22, 8.507059e+37  ;;  %v1625_v11 = vld [vmem:[%s3716_s19 + $0x10] sm:$0xff] }
 0x556   : > { %v2273_v24 = vpop.eup %2272 }
 0x557   : > { %v2275_v16 = vpop.eup %2274  ;;  %v1563_v57 = vmul.f32 %v2273_v24, %v1561_v46  ;;  %vm1568_vm15 = vweird.f32 %v2273_v24 }
 0x558   : > { %v1583_v29 = vmul.f32 %v2275_v16, %v1581_v23  ;;  %vm1569_vm1 = vmor %vm1567_vm0, %vm1568_vm15  ;;  %vm1588_vm3 = vweird.f32 %v2275_v16  ;;  %v1746_v23 = vld [vmem:[%s3712_s13] sm:$0xff] }
 0x559   : > { %v1564_v32 = vsub.f32 1.0, %v1563_v57  ;;  %vm1589_vm5 = vmor %vm1587_vm4, %vm1588_vm3  ;;  %1777 = vmatpush.msra.mxu2 %v1746_v23 }
 0x55a   : > { %v1584_v33 = vsub.f32 1.0, %v1583_v29 }
 0x55b   : > { %v1565_v31 = vmul.f32 %v2273_v24, %v1564_v32 }
 0x55c   : > { %v1585_v38 = vmul.f32 %v2275_v16, %v1584_v33 }
 0x55d   : > { %v1566_v27 = vadd.f32 %v2273_v24, %v1565_v31 }
 0x55e   : > { %v1586_v58 = vadd.f32 %v2275_v16, %v1585_v38 }
 0x55f   : > { %v1570_v30 = vsel %vm1569_vm1, %v2273_v24, %v1566_v27 }
 0x560   : > { %v1575_v61 = vsel %vm1572_vm2, %v1574_v12, %v1570_v30  ;;  %v1590_v36 = vsel %vm1589_vm5, %v2275_v16, %v1586_v58 }
 0x561   : > { %v1598_v19 = vmul.f32 %v1597_v55, %v1575_v61  ;;  %v1595_v39 = vsel %vm1592_vm6, %v1594_v37, %v1590_v36 }
 0x562   : > { %v1601_v41 = vsub.f32 1.0, %v1595_v39  ;;  %v1603_v4 = vmul.f32 %v1595_v39, %v3684_v15  ;;  %v1739_v39 = vpop.permute.xlu1 %1738 }
 0x563   : > { %v1599_v8 = vadd.f32 %v1598_v19, %v1496_v54  ;;  %vm1740_vm0 = vcmp.eq.s32.totalorder %v1739_v39, 1 }
 0x565   : > { %2276 = vtanh.f32 %v1599_v8 }
 0x56b   : > { %v2277_v43 = vpop.eup %2276 }
 0x56c   : > { %v1602_v48 = vmul.f32 %v2277_v43, %v1601_v41 }
 0x56e   : > { %v1604_v10 = vadd.f32 %v1603_v4, %v1602_v48 }
 0x570   : > { %v1612_v45 = vsel %vm1611_vm7, %v1604_v10, 0.0  ;;  %v3703_v50 = vsel %vm1611_vm7, %v1604_v10, %v3684_v15 }
 0x571   : > { %1614 = vst [vmem:[%s1613_s29] sm:$0xff] %v1612_v45  ;;  %1642 = vmatmul.f32.vlgmr.msra.gmra.mxu3 %v3703_v50  ;;  %1662 = vmatmul.f32.vlgmr.msra.gmra.mxu0 %v3703_v50 }
 0x572   : > { %1682 = vmatmul.f32.vlgmr.msra.gmra.mxu1 %v3703_v50 }
 0x5ee   : > { %v1663_v5 = vpop.f32.mrf.mxu0 }
 0x5ef   : > { %v1706_v53 = vadd.f32 %v1663_v5, %v1624_v49  ;;  %v1683_v34 = vpop.f32.mrf.mxu1 }
 0x5f0   : > { %v1726_v27 = vadd.f32 %v3675_v59, %v1683_v34 }
 0x5f1   : > { %v2109_v60 = vmul.f32 -1.442695, %v1706_v53 }
 0x5f3   : > { %2278 = vpow2.f32 %v2109_v60 }
 0x5f4   : > { %v1643_v21 = vpop.f32.mrf.mxu3 }
 0x5f5   : > { %v1686_v1 = vadd.f32 %v1643_v21, %v1623_v17 }
 0x5f7   : > { %v2108_v3 = vmul.f32 -1.442695, %v1686_v1 }
 0x5f9   : > { %v2279_v15 = vpop.eup %2278  ;;  %2280 = vpow2.f32 %v2108_v3 }
 0x5fa   : > { %v1710_v35 = vadd.f32 1.0, %v2279_v15 }
 0x5fc   : > { %2282 = vrcp.f32 %v1710_v35  ;;  %v1722_v58 = vand.u32 2147483648, %v1710_v35  ;;  %vm1716_vm13 = vweird.f32 %v1710_v35  ;;  %v1720_v19 = vand.u32 2147483647, %v1710_v35 }
 0x5fe   : > { %v1723_v8 = vor.u32 1.1754944e-38, %v1722_v58  ;;  %vm1721_vm15 = vcmp.eq.f32.partialorder %v1720_v19, 8.507059e+37 }
 0x5ff   : > { %v2281_v51 = vpop.eup %2280 }
 0x600   : > { %v1690_v0 = vadd.f32 1.0, %v2281_v51 }
 0x602   : > { %2284 = vrcp.f32 %v1690_v0  ;;  %v2283_v62 = vpop.eup %2282  ;;  %v1702_v32 = vand.u32 2147483648, %v1690_v0  ;;  %v1700_v28 = vand.u32 2147483647, %v1690_v0  ;;  %vm1696_vm9 = vweird.f32 %v1690_v0 }
 0x603   : > { %v1712_v46 = vmul.f32 %v2283_v62, %v1710_v35  ;;  %vm1717_vm12 = vweird.f32 %v2283_v62 }
 0x604   : > { %v1703_v42 = vor.u32 1.1754944e-38, %v1702_v32  ;;  %vm1701_vm11 = vcmp.eq.f32.partialorder %v1700_v28, 8.507059e+37  ;;  %vm1718_vm14 = vmor %vm1716_vm13, %vm1717_vm12 }
 0x605   : > { %v1713_v57 = vsub.f32 1.0, %v1712_v46 }
 0x607   : > { %v1714_v31 = vmul.f32 %v2283_v62, %v1713_v57 }
 0x608   : > { %v2285_v24 = vpop.eup %2284 }
 0x609   : > { %v1692_v16 = vmul.f32 %v2285_v24, %v1690_v0  ;;  %vm1697_vm8 = vweird.f32 %v2285_v24  ;;  %v1715_v55 = vadd.f32 %v2283_v62, %v1714_v31 }
 0x60a   : > { %vm1698_vm10 = vmor %vm1696_vm9, %vm1697_vm8 }
 0x60b   : > { %v1693_v29 = vsub.f32 1.0, %v1692_v16  ;;  %v1719_v54 = vsel %vm1718_vm14, %v2283_v62, %v1715_v55 }
 0x60c   : > { %v1724_v59 = vsel %vm1721_vm15, %v1723_v8, %v1719_v54 }
 0x60d   : > { %v1694_v33 = vmul.f32 %v2285_v24, %v1693_v29  ;;  %v1730_v36 = vsub.f32 1.0, %v1724_v59  ;;  %v1732_v43 = vmul.f32 %v1724_v59, %v3703_v50 }
 0x60f   : > { %v1695_v38 = vadd.f32 %v2285_v24, %v1694_v33 }
 0x611   : > { %v1699_v12 = vsel %vm1698_vm10, %v2285_v24, %v1695_v38 }
 0x612   : > { %v1704_v30 = vsel %vm1701_vm11, %v1703_v42, %v1699_v12 }
 0x613   : > { %v1727_v61 = vmul.f32 %v1726_v27, %v1704_v30 }
 0x615   : > { %v1728_v22 = vadd.f32 %v1727_v61, %v1625_v11 }
 0x617   : > { %2286 = vtanh.f32 %v1728_v22 }
 0x61d   : > { %v2287_v37 = vpop.eup %2286 }
 0x61e   : > { %v1731_v41 = vmul.f32 %v2287_v37, %v1730_v36 }
 0x620   : > { %v1733_v44 = vadd.f32 %v1732_v43, %v1731_v41 }
 0x622   : > { %v1741_v48 = vsel %vm1740_vm0, %v1733_v44, 0.0  ;;  %v1745_v4 = vsel %vm1740_vm0, %v1733_v44, %v3703_v50 }
 0x623   : > { %1744 = vst [vmem:[%s1743_s24] sm:$0xff] %v1741_v48  ;;  %1778 = vmatmul.f32.vlgmr.msra.gmra.mxu2 %v1745_v4 }
 0x624   : > { %2455 = shalt.err (!%p2452_p8)
}
 0x625   : > { %s2538_s14 = smov 128   ;;  %s2539_s21 = smov 8  }
 0x626   : > { %2141 = dma.vmem_to_hbm [thread:$0]  (%p2631_p11), %s1802_s10, 1024, %s1804_s11, %s1784_s3, %s2538_s14, %s2538_s14, %s2539_s21  }
 0x627   : > { %s2047_s13 = sshll.u32 %s2717_s26, 3  ;;  %s2115_s19 = sshll.u32 %s2606_s9, 3 }
 0x628   : > { %s3878_s7 = sld [smem:[#allocation31_spill]]  ;;  %s441_s22 = scalar_lea.vmem [#allocation10], %s2047_s13 }
 0x629   : > { %s1818_s27 = sshll.u32 %s441_s22, 4  ;;  %s1789_s17 = scalar_lea.sflag [#allocation11], %s2717_s26  ;;  %s1819_s27 = int_to_ptr.vmem [resolvable:$true] %s1818_s27 }
 0x62e   : > { %s1816_s16 = scalar_lea.hbm %s3878_s7, %s2115_s19  ;;  %s2476_s11 = scalar_lea.hbm %s3878_s7, 16 }
 0x62f   : > { %s1820_s8 = sshll.u32 %s1816_s16, 4  ;;  %s1821_s8 = int_to_ptr.hbm [resolvable:$true] %s1820_s8 }
 0x630   : > { %s2470_s29 = sshra.s32 %s1821_s8, 4  ;;  %s2471_s29 = int_to_ptr.hbm [resolvable:$true] %s2470_s29 }
 0x631   : > { %s2472_s15 = scalar_lea.hbm %s2471_s29, 8  ;;  %p2477_p6 = scmp.lt.s32.totalorder %s2471_s29, %s3878_s7 }
 0x632   : > { %p2473_p10 = scmp.ne.s32.totalorder %s2471_s29, %s2472_s15  ;;  %p2478_p13 = scmp.lt.s32.totalorder %s2476_s11, %s2472_s15 }
 0x634   : > { %p2474_p0 = pnand %p2473_p10, %p2631_p11  ;;  %p2479_p2 = por %p2478_p13, %p2477_p6 }
 0x636   : > { %p2475_p1 = pneg %p2474_p0 }
 0x638   : > { %p2480_p4 = pnand %p2479_p2, %p2475_p1 }
 0x6a6   : > { %v1779_v10 = vpop.f32.mrf.mxu2 }
 0x6a7   : > { %1782 = vst [vmem:[%s441_s22] sm:$0xff] %v1779_v10 }
 0x6a8   : > { %2483 = shalt.err (!%p2480_p4)
}
 0x6a9   : > { %2142 = dma.vmem_to_hbm [thread:$0]  (%p2631_p11), %s1819_s27, 128, %s1821_s8, %s1789_s17  }
 0x6aa PF: > { %s3879_s26 = sld [smem:[#allocation16_spill]]  ;;  %p2156_p3 = pnand %p2038_p9, %p2635_p12 }
 0x6ac   : > { %p2157_p5 = pneg %p2156_p3 }
 0x6b0   : > { %s1832_s14 = sand.u32 1, %s3879_s26  }
 0x6b1   : > { %s1833_s21 = scalar_lea.sflag [#allocation5], %s1832_s14 }
 0x6b2   : > { %2509 = dma.done.wait (%p2157_p5), %s1833_s21, 1024  }
 0x6b3   : > { %2511 = vsyncadd (%p2157_p5), %s1833_s21, 4294966272  ;;  %s1843_s13 = scalar_lea.sflag [#allocation11], %s1832_s14 }
 0x6b4   : > { %2513 = dma.done.wait (%p2157_p5), %s1843_s13, 128  }
 0x6b5   : > { %2515 = vsyncadd (%p2157_p5), %s1843_s13, 4294967168  ;;  %s3881_s30 = sld [smem:[#allocation18_spill]]  ;;  %s3884_s27 = smov %s2522_s28 }
 0x6b6   : > { %s3882_s19 = sld [smem:[#allocation17_spill]] }
 0x6b7   : > { %s3883_s29 = sld [smem:[#allocation19_spill]] }
 0x6bb   : > { %p28_p11 = scmp.ge.s32.totalorder %s3881_s30, 4  }
 0x6bc   : > { %s3885_s28 = smov %s3882_s19 }
 0x6bd   :  { %30 = sbr.rel (!%p28_p11) target bundleno = 13 (0xd), region = 156 }
 0x6c2   :  { %1849 = vsyncpa [#allocation4], 1 }
 0x6c3   :  { %1851 = vsyncpa [#allocation4 + $0x1], 1 }
 0x6c4   :  { %1852 = vsyncpa [#allocation7], 1 }
 0x6c5   :  { %1854 = vsyncpa [#allocation7 + $0x1], 1 }
 0x6c6   :  { %1855 = vsyncpa [#allocation5], 1 }
 0x6c7   :  { %1857 = vsyncpa [#allocation5 + $0x1], 1 }
 0x6c8   :  { %1858 = vsyncpa [#allocation11], 1 }
 0x6c9   :  { %1860 = vsyncpa [#allocation11 + $0x1], 1 }

</bundles_post_ra>
